<compile_context>
chip_gen: v7x
topology: tpu7x:2x2x1
jax: 0.10.0
libtpu: 0.0.40
codegen_flags: <defaults>
</compile_context>

<pallas_src>
import functools

import numpy as np
import jax
import jax.numpy as jnp
from jax.experimental import pallas as pl
from jax.experimental.pallas import tpu as pltpu


# ----------------------------------------------------------------------------
# Constant gather / scatter matrices (built in numpy at trace time)
# ----------------------------------------------------------------------------
def _gather_mat(kh, kw, in_hw, out_hw, stride, pad):
    """(A @ G)[c, i*out+j] = A_img[c, stride*i+kh-pad, stride*j+kw-pad] (0 if OOB)."""
    g = np.zeros((in_hw * in_hw, out_hw * out_hw), np.float32)
    for i in range(out_hw):
        for j in range(out_hw):
            r, s = stride * i + kh - pad, stride * j + kw - pad
            if 0 <= r < in_hw and 0 <= s < in_hw:
                g[r * in_hw + s, i * out_hw + j] = 1.0
    return g


def _scatter_mat(kh, kw, in_hw, out_hw, stride, pad):
    """Transposed-conv tap: input (i,j) lands at output (stride*i+kh-pad, ...)."""
    g = np.zeros((in_hw * in_hw, out_hw * out_hw), np.float32)
    for i in range(in_hw):
        for j in range(in_hw):
            p, q = stride * i + kh - pad, stride * j + kw - pad
            if 0 <= p < out_hw and 0 <= q < out_hw:
                g[i * in_hw + j, p * out_hw + q] = 1.0
    return g


@functools.lru_cache(maxsize=None)
def _build_index_mats(hw):
    h2, h4 = hw // 2, hw // 4
    s1 = np.stack([_gather_mat(kh, kw, hw, h2, 2, 1)
                   for kh in range(3) for kw in range(3)])      # (9,  hw^2, h2^2)
    s2 = np.stack([_gather_mat(kh, kw, h2, h4, 2, 1)
                   for kh in range(3) for kw in range(3)])      # (9,  h2^2, h4^2)
    t1 = np.stack([_scatter_mat(kh, kw, h4, h2, 2, 1)
                   for kh in range(4) for kw in range(4)])      # (16, h4^2, h2^2)
    t2 = np.stack([_scatter_mat(kh, kw, h2, hw, 2, 1)
                   for kh in range(4) for kw in range(4)])      # (16, h2^2, hw^2)
    return s1, s2, t1, t2


# ----------------------------------------------------------------------------
# Fused Pallas kernel (one grid step == TB batch elements)
# ----------------------------------------------------------------------------
def _cnn_kernel(t_ref, x_ref,
                tew1_ref, teb1_ref, tew2_ref, teb2_ref,
                w1_ref, g1_ref, b1_ref,
                w2_ref, g2_ref, b2_ref,
                wd1_ref, t1_ref, bd1_ref,
                wd2_ref, t2_ref, bd2_ref,
                out_ref):
    f32, bf16 = jnp.float32, jnp.bfloat16
    nc = g1_ref.shape[0]          # 9 conv taps (3x3)
    nd = t1_ref.shape[0]          # 16 deconv taps (4x4)
    co1 = b1_ref.shape[0]         # 32 channels out of deconv1
    tb = x_ref.shape[0]           # images per grid step

    # Shared per-step weights (bf16), reused across the TB in-step images.
    w1, w2 = w1_ref[...], w2_ref[...]            # (32, 9), (64, 288)
    wd1, wd2 = wd1_ref[...], wd2_ref[...]        # (512, 64), (16, 32)
    b1, b2 = b1_ref[...], b2_ref[...]            # (32, 1), (64, 1)   f32
    bd1, bd2 = bd1_ref[...], bd2_ref[...]        # (32, 1), (1, 1)    f32

    def conv_im2col(a_bf, g_ref, w_flat, bias):
        # a_bf: (Ci, S_in) bf16.  Stack the 9 per-tap gathers along K (in vregs)
        # and do ONE big-K channel matmul: (Co, taps*Ci) @ (taps*Ci, S_out).
        col = jnp.concatenate(
            [jnp.dot(a_bf, g_ref[tap], preferred_element_type=f32)
             for tap in range(nc)], axis=0)                       # (taps*Ci, S_out)
        acc = jnp.dot(w_flat, col.astype(bf16), preferred_element_type=f32)
        return jnp.maximum(acc + bias, 0.0)

    def deconv_taps(a_bf, w_stack, g_ref, bias, co, relu):
        # Channel-first (reassociated): one fused (taps*Co, Ci) @ (Ci, S_in)
        # channel matmul, then cheap per-tap scatters against the 0/1 matrices.
        u = jnp.dot(w_stack, a_bf, preferred_element_type=f32)    # (taps*Co, S_in)
        acc = None
        for tap in range(nd):
            part = jnp.dot(u[tap * co:(tap + 1) * co].astype(bf16), g_ref[tap],
                           preferred_element_type=f32)            # (Co, S_out)
            acc = part if acc is None else acc + part
        acc = acc + bias
        return jnp.maximum(acc, 0.0) if relu else acc

    for b in range(tb):  # static unroll; TB is small
        # ---- time embedding: Linear(1,128) -> ReLU -> Linear(128,32) --------
        tn = t_ref[b] * (1.0 / 1000.0)                                     # (1, 1)
        h = jnp.maximum(tew1_ref[...] * tn + teb1_ref[...], 0.0)           # (128, 1)
        e = jnp.dot(tew2_ref[...], h, preferred_element_type=f32) + teb2_ref[...]  # (32, 1)

        # ---- layers (channels in sublanes, spatial in lanes) -----------------
        a0 = x_ref[b].astype(bf16)                                         # (1, 256)
        x1 = conv_im2col(a0, g1_ref, w1, b1) + e                           # (32, 64)
        x2 = conv_im2col(x1.astype(bf16), g2_ref, w2, b2)                  # (64, 16)
        y = deconv_taps(x2.astype(bf16), wd1, t1_ref, bd1, co1, True) + x1  # (32, 64)
        o = deconv_taps(y.astype(bf16), wd2, t2_ref, bd2, 1, False)        # (1, 256)

        out_ref[b] = o.astype(out_ref.dtype)


# ----------------------------------------------------------------------------
# Parameter packing (PyTorch-native layouts -> fused kernel layouts)
# ----------------------------------------------------------------------------
def _pack_params(p):
    bf16 = jnp.bfloat16

    def conv_flat(w):
        # Conv2d weight (Co, Ci, K, K) -> (Co, K*K*Ci); col index = (kh*K+kw)*Ci + ci.
        co, ci, k, _ = w.shape
        return jnp.transpose(w, (0, 2, 3, 1)).reshape(co, k * k * ci).astype(bf16)

    def deconv_stack(w):
        # ConvTranspose2d weight (Ci, Co, K, K) -> (K*K*Co, Ci); row = (kh*K+kw)*Co + co.
        ci, co, k, _ = w.shape
        return jnp.transpose(w, (2, 3, 1, 0)).reshape(k * k * co, ci).astype(bf16)

    return dict(
        te_w1=p["te_w1"],                    # (128, 1)   f32
        te_b1=p["te_b1"][:, None],           # (128, 1)
        te_w2=p["te_w2"],                    # (32, 128)
        te_b2=p["te_b2"][:, None],           # (32, 1)
        w1=conv_flat(p["c1_w"]),             # (32, 9)    bf16
        b1=p["c1_b"][:, None],               # (32, 1)    f32
        w2=conv_flat(p["c2_w"]),             # (64, 288)  bf16
        b2=p["c2_b"][:, None],               # (64, 1)
        wd1=deconv_stack(p["d1_w"]),         # (512, 64)  bf16
        bd1=p["d1_b"][:, None],              # (32, 1)
        wd2=deconv_stack(p["d2_w"]),         # (16, 32)   bf16
        bd2=p["d2_b"][:, None],              # (1, 1)
    )


def _pick_tb(batch):
    """Largest TB that divides B while keeping >= 2 grid steps (v7x has 2 TCs)."""
    best = 1
    for tb in range(1, min(batch, 8) + 1):
        if batch % tb == 0 and batch // tb >= 2:
            best = tb
    return best


# ----------------------------------------------------------------------------
# Forward pass
# ----------------------------------------------------------------------------
def cnn_forward(params, x, t):
    """x: (B, 1, H, W) float32 NCHW; t: (B,) integer timesteps."""
    B, C, H, W = x.shape
    assert C == 1 and H == W and H % 4 == 0

    s1, s2, t1m, t2m = (jnp.asarray(m, dtype=jnp.bfloat16)   # 0/1: exact in bf16
                        for m in _build_index_mats(H))
    kp = _pack_params(params)

    tb = _pick_tb(B)
    grid = (B // tb,)

    xf = x.reshape(B, 1, H * W)                        # free reshape (row-major spatial)
    tf = t.astype(jnp.float32).reshape(B, 1, 1)

    def rep(a):                                        # replicated constant, VMEM-resident
        nd = a.ndim
        return pl.BlockSpec(a.shape, lambda i, _n=nd: (0,) * _n)

    def per_step(shape):                               # TB-image slab per grid step
        nd = len(shape)
        return pl.BlockSpec(shape, lambda i, _n=nd: (i,) + (0,) * (_n - 1))

    in_specs = [
        per_step((tb, 1, 1)),                          # t
        per_step((tb, 1, H * W)),                      # x
        rep(kp["te_w1"]), rep(kp["te_b1"]), rep(kp["te_w2"]), rep(kp["te_b2"]),
        rep(kp["w1"]), rep(s1), rep(kp["b1"]),
        rep(kp["w2"]), rep(s2), rep(kp["b2"]),
        rep(kp["wd1"]), rep(t1m), rep(kp["bd1"]),
        rep(kp["wd2"]), rep(t2m), rep(kp["bd2"]),
    ]

    out_flat = pl.pallas_call(
        _cnn_kernel,
        grid=grid,
        in_specs=in_specs,
        out_specs=pl.BlockSpec((tb, 1, H * W), lambda i: (i, 0, 0)),
        out_shape=jax.ShapeDtypeStruct((B, 1, H * W), jnp.float32),
        compiler_params=pltpu.CompilerParams(dimension_semantics=("parallel",)),
    )(tf, xf,
      kp["te_w1"], kp["te_b1"], kp["te_w2"], kp["te_b2"],
      kp["w1"], s1, kp["b1"],
      kp["w2"], s2, kp["b2"],
      kp["wd1"], t1m, kp["bd1"],
      kp["wd2"], t2m, kp["bd2"])

    return out_flat.reshape(B, 1, H, W)


# ----------------------------------------------------------------------------
# Plain-JAX f32 reference (for the in-script correctness check)
# ----------------------------------------------------------------------------
def reference_forward(params, x, t):
    dn = ("NCHW", "OIHW", "NCHW")
    hp = jax.lax.Precision.HIGHEST

    tn = t.astype(jnp.float32)[:, None] / 1000.0
    h = jax.nn.relu(tn * params["te_w1"].T + params["te_b1"][None, :])
    e = jnp.dot(h, params["te_w2"].T, precision=hp) + params["te_b2"][None, :]

    def conv(z, w, b):
        return jax.lax.conv_general_dilated(
            z, w, (2, 2), [(1, 1), (1, 1)], dimension_numbers=dn,
            precision=hp) + b[None, :, None, None]

    def deconv(z, w, b, k=4, s=2, p=1):
        w_eq = jnp.flip(w, (2, 3)).transpose(1, 0, 2, 3)
        return jax.lax.conv_general_dilated(
            z, w_eq, (1, 1), [(k - 1 - p, k - 1 - p)] * 2,
            lhs_dilation=(s, s), dimension_numbers=dn,
            precision=hp) + b[None, :, None, None]

    x1 = jax.nn.relu(conv(x, params["c1_w"], params["c1_b"])) + e[:, :, None, None]
    x2 = jax.nn.relu(conv(x1, params["c2_w"], params["c2_b"]))
    y = jax.nn.relu(deconv(x2, params["d1_w"], params["d1_b"])) + x1
    return deconv(y, params["d2_w"], params["d2_b"])


# ----------------------------------------------------------------------------
# Params (PyTorch-native shapes)
# ----------------------------------------------------------------------------
def init_params(key):
    ks = jax.random.split(key, 12)

    def w(k, shape, fan_in, scale=1.0):
        return jax.random.normal(k, shape, jnp.float32) * (scale / np.sqrt(fan_in))

    return dict(
        te_w1=w(ks[0], (128, 1), 1.0),
        te_b1=w(ks[1], (128,), 1.0, 0.1),
        te_w2=w(ks[2], (32, 128), 128.0),
        te_b2=w(ks[3], (32,), 1.0, 0.1),
        c1_w=w(ks[4], (32, 1, 3, 3), 9.0),            # Conv2d(1, 32, 3, s=2, p=1)
        c1_b=w(ks[5], (32,), 1.0, 0.1),
        c2_w=w(ks[6], (64, 32, 3, 3), 32.0 * 9.0),    # Conv2d(32, 64, 3, s=2, p=1)
        c2_b=w(ks[7], (64,), 1.0, 0.1),
        d1_w=w(ks[8], (64, 32, 4, 4), 64.0 * 16.0),   # ConvTranspose2d(64, 32, 4, s=2, p=1)
        d1_b=w(ks[9], (32,), 1.0, 0.1),
        d2_w=w(ks[10], (32, 1, 4, 4), 32.0 * 16.0),   # ConvTranspose2d(32, 1, 4, s=2, p=1)
        d2_b=w(ks[11], (1,), 1.0, 0.1),
    )


if __name__ == "__main__":
    key = jax.random.PRNGKey(0)
    pkey, xkey, tkey = jax.random.split(key, 3)
    params = init_params(pkey)

    B, H, W = 2, 16, 16
    x = jax.random.normal(xkey, (B, 1, H, W), jnp.float32)
    t = jax.random.randint(tkey, (B,), 0, 1000)

    out = jax.jit(cnn_forward)(params, x, t)
    jax.block_until_ready(out)
    assert out.shape == (B, 1, H, W), out.shape
    assert out.dtype == jnp.float32

    # bf16 MXU operands (f32 accumulation) -> tolerance sized for bf16 rounding
    # through 4 conv/deconv layers against the pure-f32 reference.
    ref = reference_forward(params, x, t)
    assert jnp.allclose(out, ref, atol=5e-2, rtol=5e-2), \
        float(jnp.max(jnp.abs(out - ref)))

    print("KERNEL_OK")
</pallas_src>

<mosaic_0001>
module attributes {stable_mosaic.version = 11 : i64} {
  func.func @_cnn_kernel(%arg0: i32, %arg1: memref<1x1x1xf32, #tpu.memory_space<vmem>>, %arg2: memref<1x1x256xf32, #tpu.memory_space<vmem>>, %arg3: memref<128x1xf32, #tpu.memory_space<vmem>>, %arg4: memref<128x1xf32, #tpu.memory_space<vmem>>, %arg5: memref<32x128xf32, #tpu.memory_space<vmem>>, %arg6: memref<32x1xf32, #tpu.memory_space<vmem>>, %arg7: memref<32x9xbf16, #tpu.memory_space<vmem>>, %arg8: memref<9x256x64xbf16, #tpu.memory_space<vmem>>, %arg9: memref<32x1xf32, #tpu.memory_space<vmem>>, %arg10: memref<64x288xbf16, #tpu.memory_space<vmem>>, %arg11: memref<9x64x16xbf16, #tpu.memory_space<vmem>>, %arg12: memref<64x1xf32, #tpu.memory_space<vmem>>, %arg13: memref<512x64xbf16, #tpu.memory_space<vmem>>, %arg14: memref<16x16x64xbf16, #tpu.memory_space<vmem>>, %arg15: memref<32x1xf32, #tpu.memory_space<vmem>>, %arg16: memref<16x32xbf16, #tpu.memory_space<vmem>>, %arg17: memref<16x64x256xbf16, #tpu.memory_space<vmem>>, %arg18: memref<1x1xf32, #tpu.memory_space<vmem>>, %arg19: memref<1x1x256xf32, #tpu.memory_space<vmem>>) attributes {dimension_semantics = [#tpu.dimension_semantics<parallel>], iteration_bounds = array<i64: 2>, scalar_prefetch = 0 : i64, scratch_operands = 0 : i64, tpu.core_type = #tpu.core_type<tc>, window_params = [{transform_indices = @transform_0, window_bounds = array<i64: 1, 1, 1>}, {transform_indices = @transform_1, window_bounds = array<i64: 1, 1, 256>}, {pipeline_mode = #tpu.pipeline_mode<synchronous>, transform_indices = @transform_2, window_bounds = array<i64: 128, 1>}, {pipeline_mode = #tpu.pipeline_mode<synchronous>, transform_indices = @transform_3, window_bounds = array<i64: 128, 1>}, {pipeline_mode = #tpu.pipeline_mode<synchronous>, transform_indices = @transform_4, window_bounds = array<i64: 32, 128>}, {pipeline_mode = #tpu.pipeline_mode<synchronous>, transform_indices = @transform_5, window_bounds = array<i64: 32, 1>}, {pipeline_mode = #tpu.pipeline_mode<synchronous>, transform_indices = @transform_6, window_bounds = array<i64: 32, 9>}, {pipeline_mode = #tpu.pipeline_mode<synchronous>, transform_indices = @transform_7, window_bounds = array<i64: 9, 256, 64>}, {pipeline_mode = #tpu.pipeline_mode<synchronous>, transform_indices = @transform_8, window_bounds = array<i64: 32, 1>}, {pipeline_mode = #tpu.pipeline_mode<synchronous>, transform_indices = @transform_9, window_bounds = array<i64: 64, 288>}, {pipeline_mode = #tpu.pipeline_mode<synchronous>, transform_indices = @transform_10, window_bounds = array<i64: 9, 64, 16>}, {pipeline_mode = #tpu.pipeline_mode<synchronous>, transform_indices = @transform_11, window_bounds = array<i64: 64, 1>}, {pipeline_mode = #tpu.pipeline_mode<synchronous>, transform_indices = @transform_12, window_bounds = array<i64: 512, 64>}, {pipeline_mode = #tpu.pipeline_mode<synchronous>, transform_indices = @transform_13, window_bounds = array<i64: 16, 16, 64>}, {pipeline_mode = #tpu.pipeline_mode<synchronous>, transform_indices = @transform_14, window_bounds = array<i64: 32, 1>}, {pipeline_mode = #tpu.pipeline_mode<synchronous>, transform_indices = @transform_15, window_bounds = array<i64: 16, 32>}, {pipeline_mode = #tpu.pipeline_mode<synchronous>, transform_indices = @transform_16, window_bounds = array<i64: 16, 64, 256>}, {pipeline_mode = #tpu.pipeline_mode<synchronous>, transform_indices = @transform_17, window_bounds = array<i64: 1, 1>}, {transform_indices = @transform_18, window_bounds = array<i64: 1, 1, 256>}]} {
    %c0 = arith.constant 0 : index
    %c0_0 = arith.constant 0 : index
    %0 = vector.load %arg7[%c0, %c0_0] : memref<32x9xbf16, #tpu.memory_space<vmem>>, vector<32x9xbf16>
    %c0_1 = arith.constant 0 : index
    %c0_2 = arith.constant 0 : index
    %1 = vector.load %arg10[%c0_1, %c0_2] : memref<64x288xbf16, #tpu.memory_space<vmem>>, vector<64x288xbf16>
    %c0_3 = arith.constant 0 : index
    %c0_4 = arith.constant 0 : index
    %2 = vector.load %arg13[%c0_3, %c0_4] : memref<512x64xbf16, #tpu.memory_space<vmem>>, vector<512x64xbf16>
    %c0_5 = arith.constant 0 : index
    %c0_6 = arith.constant 0 : index
    %3 = vector.load %arg16[%c0_5, %c0_6] : memref<16x32xbf16, #tpu.memory_space<vmem>>, vector<16x32xbf16>
    %c0_7 = arith.constant 0 : index
    %c0_8 = arith.constant 0 : index
    %4 = vector.load %arg9[%c0_7, %c0_8] : memref<32x1xf32, #tpu.memory_space<vmem>>, vector<32x1xf32>
    %c0_9 = arith.constant 0 : index
    %c0_10 = arith.constant 0 : index
    %5 = vector.load %arg12[%c0_9, %c0_10] : memref<64x1xf32, #tpu.memory_space<vmem>>, vector<64x1xf32>
    %c0_11 = arith.constant 0 : index
    %c0_12 = arith.constant 0 : index
    %6 = vector.load %arg15[%c0_11, %c0_12] : memref<32x1xf32, #tpu.memory_space<vmem>>, vector<32x1xf32>
    %c0_13 = arith.constant 0 : index
    %c0_14 = arith.constant 0 : index
    %7 = vector.load %arg18[%c0_13, %c0_14] : memref<1x1xf32, #tpu.memory_space<vmem>>, vector<1x1xf32>
    %c0_15 = arith.constant 0 : index
    %c0_16 = arith.constant 0 : index
    %c0_17 = arith.constant 0 : index
    %8 = vector.load %arg1[%c0_15, %c0_16, %c0_17] : memref<1x1x1xf32, #tpu.memory_space<vmem>>, vector<1x1x1xf32>
    %9 = vector.shape_cast %8 : vector<1x1x1xf32> to vector<1x1xf32>
    %cst = arith.constant 1.000000e-03 : f32
    %10 = vector.broadcast %cst : f32 to vector<1x1xf32>
    %11 = arith.mulf %9, %10 : vector<1x1xf32>
    %c0_18 = arith.constant 0 : index
    %c0_19 = arith.constant 0 : index
    %12 = vector.load %arg3[%c0_18, %c0_19] : memref<128x1xf32, #tpu.memory_space<vmem>>, vector<128x1xf32>
    %13 = vector.broadcast %11 : vector<1x1xf32> to vector<128x1xf32>
    %14 = arith.mulf %12, %13 : vector<128x1xf32>
    %c0_20 = arith.constant 0 : index
    %c0_21 = arith.constant 0 : index
    %15 = vector.load %arg4[%c0_20, %c0_21] : memref<128x1xf32, #tpu.memory_space<vmem>>, vector<128x1xf32>
    %16 = arith.addf %14, %15 : vector<128x1xf32>
    %cst_22 = arith.constant 0.000000e+00 : f32
    %17 = vector.broadcast %cst_22 : f32 to vector<128x1xf32>
    %18 = arith.maximumf %16, %17 : vector<128x1xf32>
    %c0_23 = arith.constant 0 : index
    %c0_24 = arith.constant 0 : index
    %19 = vector.load %arg5[%c0_23, %c0_24] : memref<32x128xf32, #tpu.memory_space<vmem>>, vector<32x128xf32>
    %cst_25 = arith.constant dense<0.000000e+00> : vector<32x1xf32>
    %20 = tpu.matmul %19, %18, %cst_25 {dimension_numbers = #tpu.dot_dimension_numbers<[1], [0], [0], [1], [0, 0, 1, 1], [], []>} : vector<32x128xf32>, vector<128x1xf32>, vector<32x1xf32> -> vector<32x1xf32>
    %c0_26 = arith.constant 0 : index
    %c0_27 = arith.constant 0 : index
    %21 = vector.load %arg6[%c0_26, %c0_27] : memref<32x1xf32, #tpu.memory_space<vmem>>, vector<32x1xf32>
    %22 = arith.addf %20, %21 : vector<32x1xf32>
    %c0_28 = arith.constant 0 : index
    %c0_29 = arith.constant 0 : index
    %c0_30 = arith.constant 0 : index
    %23 = vector.load %arg2[%c0_28, %c0_29, %c0_30] : memref<1x1x256xf32, #tpu.memory_space<vmem>>, vector<1x1x256xf32>
    %24 = vector.shape_cast %23 : vector<1x1x256xf32> to vector<1x256xf32>
    %25 = arith.truncf %24 : vector<1x256xf32> to vector<1x256xbf16>
    %c0_31 = arith.constant 0 : index
    %c0_32 = arith.constant 0 : index
    %c0_33 = arith.constant 0 : index
    %26 = vector.load %arg8[%c0_31, %c0_32, %c0_33] : memref<9x256x64xbf16, #tpu.memory_space<vmem>>, vector<1x256x64xbf16>
    %27 = vector.shape_cast %26 : vector<1x256x64xbf16> to vector<256x64xbf16>
    %cst_34 = arith.constant dense<0.000000e+00> : vector<1x64xf32>
    %28 = tpu.matmul %25, %27, %cst_34 {dimension_numbers = #tpu.dot_dimension_numbers<[1], [0], [0], [1], [0, 0, 1, 1], [], []>} : vector<1x256xbf16>, vector<256x64xbf16>, vector<1x64xf32> -> vector<1x64xf32>
    %c1 = arith.constant 1 : index
    %c0_35 = arith.constant 0 : index
    %c0_36 = arith.constant 0 : index
    %29 = vector.load %arg8[%c1, %c0_35, %c0_36] : memref<9x256x64xbf16, #tpu.memory_space<vmem>>, vector<1x256x64xbf16>
    %30 = vector.shape_cast %29 : vector<1x256x64xbf16> to vector<256x64xbf16>
    %cst_37 = arith.constant dense<0.000000e+00> : vector<1x64xf32>
    %31 = tpu.matmul %25, %30, %cst_37 {dimension_numbers = #tpu.dot_dimension_numbers<[1], [0], [0], [1], [0, 0, 1, 1], [], []>} : vector<1x256xbf16>, vector<256x64xbf16>, vector<1x64xf32> -> vector<1x64xf32>
    %c2 = arith.constant 2 : index
    %c0_38 = arith.constant 0 : index
    %c0_39 = arith.constant 0 : index
    %32 = vector.load %arg8[%c2, %c0_38, %c0_39] : memref<9x256x64xbf16, #tpu.memory_space<vmem>>, vector<1x256x64xbf16>
    %33 = vector.shape_cast %32 : vector<1x256x64xbf16> to vector<256x64xbf16>
    %cst_40 = arith.constant dense<0.000000e+00> : vector<1x64xf32>
    %34 = tpu.matmul %25, %33, %cst_40 {dimension_numbers = #tpu.dot_dimension_numbers<[1], [0], [0], [1], [0, 0, 1, 1], [], []>} : vector<1x256xbf16>, vector<256x64xbf16>, vector<1x64xf32> -> vector<1x64xf32>
    %c3 = arith.constant 3 : index
    %c0_41 = arith.constant 0 : index
    %c0_42 = arith.constant 0 : index
    %35 = vector.load %arg8[%c3, %c0_41, %c0_42] : memref<9x256x64xbf16, #tpu.memory_space<vmem>>, vector<1x256x64xbf16>
    %36 = vector.shape_cast %35 : vector<1x256x64xbf16> to vector<256x64xbf16>
    %cst_43 = arith.constant dense<0.000000e+00> : vector<1x64xf32>
    %37 = tpu.matmul %25, %36, %cst_43 {dimension_numbers = #tpu.dot_dimension_numbers<[1], [0], [0], [1], [0, 0, 1, 1], [], []>} : vector<1x256xbf16>, vector<256x64xbf16>, vector<1x64xf32> -> vector<1x64xf32>
    %c4 = arith.constant 4 : index
    %c0_44 = arith.constant 0 : index
    %c0_45 = arith.constant 0 : index
    %38 = vector.load %arg8[%c4, %c0_44, %c0_45] : memref<9x256x64xbf16, #tpu.memory_space<vmem>>, vector<1x256x64xbf16>
    %39 = vector.shape_cast %38 : vector<1x256x64xbf16> to vector<256x64xbf16>
    %cst_46 = arith.constant dense<0.000000e+00> : vector<1x64xf32>
    %40 = tpu.matmul %25, %39, %cst_46 {dimension_numbers = #tpu.dot_dimension_numbers<[1], [0], [0], [1], [0, 0, 1, 1], [], []>} : vector<1x256xbf16>, vector<256x64xbf16>, vector<1x64xf32> -> vector<1x64xf32>
    %c5 = arith.constant 5 : index
    %c0_47 = arith.constant 0 : index
    %c0_48 = arith.constant 0 : index
    %41 = vector.load %arg8[%c5, %c0_47, %c0_48] : memref<9x256x64xbf16, #tpu.memory_space<vmem>>, vector<1x256x64xbf16>
    %42 = vector.shape_cast %41 : vector<1x256x64xbf16> to vector<256x64xbf16>
    %cst_49 = arith.constant dense<0.000000e+00> : vector<1x64xf32>
    %43 = tpu.matmul %25, %42, %cst_49 {dimension_numbers = #tpu.dot_dimension_numbers<[1], [0], [0], [1], [0, 0, 1, 1], [], []>} : vector<1x256xbf16>, vector<256x64xbf16>, vector<1x64xf32> -> vector<1x64xf32>
    %c6 = arith.constant 6 : index
    %c0_50 = arith.constant 0 : index
    %c0_51 = arith.constant 0 : index
    %44 = vector.load %arg8[%c6, %c0_50, %c0_51] : memref<9x256x64xbf16, #tpu.memory_space<vmem>>, vector<1x256x64xbf16>
    %45 = vector.shape_cast %44 : vector<1x256x64xbf16> to vector<256x64xbf16>
    %cst_52 = arith.constant dense<0.000000e+00> : vector<1x64xf32>
    %46 = tpu.matmul %25, %45, %cst_52 {dimension_numbers = #tpu.dot_dimension_numbers<[1], [0], [0], [1], [0, 0, 1, 1], [], []>} : vector<1x256xbf16>, vector<256x64xbf16>, vector<1x64xf32> -> vector<1x64xf32>
    %c7 = arith.constant 7 : index
    %c0_53 = arith.constant 0 : index
    %c0_54 = arith.constant 0 : index
    %47 = vector.load %arg8[%c7, %c0_53, %c0_54] : memref<9x256x64xbf16, #tpu.memory_space<vmem>>, vector<1x256x64xbf16>
    %48 = vector.shape_cast %47 : vector<1x256x64xbf16> to vector<256x64xbf16>
    %cst_55 = arith.constant dense<0.000000e+00> : vector<1x64xf32>
    %49 = tpu.matmul %25, %48, %cst_55 {dimension_numbers = #tpu.dot_dimension_numbers<[1], [0], [0], [1], [0, 0, 1, 1], [], []>} : vector<1x256xbf16>, vector<256x64xbf16>, vector<1x64xf32> -> vector<1x64xf32>
    %c8 = arith.constant 8 : index
    %c0_56 = arith.constant 0 : index
    %c0_57 = arith.constant 0 : index
    %50 = vector.load %arg8[%c8, %c0_56, %c0_57] : memref<9x256x64xbf16, #tpu.memory_space<vmem>>, vector<1x256x64xbf16>
    %51 = vector.shape_cast %50 : vector<1x256x64xbf16> to vector<256x64xbf16>
    %cst_58 = arith.constant dense<0.000000e+00> : vector<1x64xf32>
    %52 = tpu.matmul %25, %51, %cst_58 {dimension_numbers = #tpu.dot_dimension_numbers<[1], [0], [0], [1], [0, 0, 1, 1], [], []>} : vector<1x256xbf16>, vector<256x64xbf16>, vector<1x64xf32> -> vector<1x64xf32>
    %53 = tpu.concatenate %28, %31, %34, %37, %40, %43, %46, %49, %52 in 0 : vector<1x64xf32>, vector<1x64xf32>, vector<1x64xf32>, vector<1x64xf32>, vector<1x64xf32>, vector<1x64xf32>, vector<1x64xf32>, vector<1x64xf32>, vector<1x64xf32> -> vector<9x64xf32>
    %54 = arith.truncf %53 : vector<9x64xf32> to vector<9x64xbf16>
    %cst_59 = arith.constant dense<0.000000e+00> : vector<32x64xf32>
    %55 = tpu.matmul %0, %54, %cst_59 {dimension_numbers = #tpu.dot_dimension_numbers<[1], [0], [0], [1], [0, 0, 1, 1], [], []>} : vector<32x9xbf16>, vector<9x64xbf16>, vector<32x64xf32> -> vector<32x64xf32>
    %56 = vector.broadcast %4 : vector<32x1xf32> to vector<32x64xf32>
    %57 = arith.addf %55, %56 : vector<32x64xf32>
    %cst_60 = arith.constant 0.000000e+00 : f32
    %58 = vector.broadcast %cst_60 : f32 to vector<32x64xf32>
    %59 = arith.maximumf %57, %58 : vector<32x64xf32>
    %60 = vector.broadcast %22 : vector<32x1xf32> to vector<32x64xf32>
    %61 = arith.addf %59, %60 : vector<32x64xf32>
    %62 = arith.truncf %61 : vector<32x64xf32> to vector<32x64xbf16>
    %c0_61 = arith.constant 0 : index
    %c0_62 = arith.constant 0 : index
    %c0_63 = arith.constant 0 : index
    %63 = vector.load %arg11[%c0_61, %c0_62, %c0_63] : memref<9x64x16xbf16, #tpu.memory_space<vmem>>, vector<1x64x16xbf16>
    %64 = vector.shape_cast %63 : vector<1x64x16xbf16> to vector<64x16xbf16>
    %cst_64 = arith.constant dense<0.000000e+00> : vector<32x16xf32>
    %65 = tpu.matmul %62, %64, %cst_64 {dimension_numbers = #tpu.dot_dimension_numbers<[1], [0], [0], [1], [0, 0, 1, 1], [], []>} : vector<32x64xbf16>, vector<64x16xbf16>, vector<32x16xf32> -> vector<32x16xf32>
    %c1_65 = arith.constant 1 : index
    %c0_66 = arith.constant 0 : index
    %c0_67 = arith.constant 0 : index
    %66 = vector.load %arg11[%c1_65, %c0_66, %c0_67] : memref<9x64x16xbf16, #tpu.memory_space<vmem>>, vector<1x64x16xbf16>
    %67 = vector.shape_cast %66 : vector<1x64x16xbf16> to vector<64x16xbf16>
    %cst_68 = arith.constant dense<0.000000e+00> : vector<32x16xf32>
    %68 = tpu.matmul %62, %67, %cst_68 {dimension_numbers = #tpu.dot_dimension_numbers<[1], [0], [0], [1], [0, 0, 1, 1], [], []>} : vector<32x64xbf16>, vector<64x16xbf16>, vector<32x16xf32> -> vector<32x16xf32>
    %c2_69 = arith.constant 2 : index
    %c0_70 = arith.constant 0 : index
    %c0_71 = arith.constant 0 : index
    %69 = vector.load %arg11[%c2_69, %c0_70, %c0_71] : memref<9x64x16xbf16, #tpu.memory_space<vmem>>, vector<1x64x16xbf16>
    %70 = vector.shape_cast %69 : vector<1x64x16xbf16> to vector<64x16xbf16>
    %cst_72 = arith.constant dense<0.000000e+00> : vector<32x16xf32>
    %71 = tpu.matmul %62, %70, %cst_72 {dimension_numbers = #tpu.dot_dimension_numbers<[1], [0], [0], [1], [0, 0, 1, 1], [], []>} : vector<32x64xbf16>, vector<64x16xbf16>, vector<32x16xf32> -> vector<32x16xf32>
    %c3_73 = arith.constant 3 : index
    %c0_74 = arith.constant 0 : index
    %c0_75 = arith.constant 0 : index
    %72 = vector.load %arg11[%c3_73, %c0_74, %c0_75] : memref<9x64x16xbf16, #tpu.memory_space<vmem>>, vector<1x64x16xbf16>
    %73 = vector.shape_cast %72 : vector<1x64x16xbf16> to vector<64x16xbf16>
    %cst_76 = arith.constant dense<0.000000e+00> : vector<32x16xf32>
    %74 = tpu.matmul %62, %73, %cst_76 {dimension_numbers = #tpu.dot_dimension_numbers<[1], [0], [0], [1], [0, 0, 1, 1], [], []>} : vector<32x64xbf16>, vector<64x16xbf16>, vector<32x16xf32> -> vector<32x16xf32>
    %c4_77 = arith.constant 4 : index
    %c0_78 = arith.constant 0 : index
    %c0_79 = arith.constant 0 : index
    %75 = vector.load %arg11[%c4_77, %c0_78, %c0_79] : memref<9x64x16xbf16, #tpu.memory_space<vmem>>, vector<1x64x16xbf16>
    %76 = vector.shape_cast %75 : vector<1x64x16xbf16> to vector<64x16xbf16>
    %cst_80 = arith.constant dense<0.000000e+00> : vector<32x16xf32>
    %77 = tpu.matmul %62, %76, %cst_80 {dimension_numbers = #tpu.dot_dimension_numbers<[1], [0], [0], [1], [0, 0, 1, 1], [], []>} : vector<32x64xbf16>, vector<64x16xbf16>, vector<32x16xf32> -> vector<32x16xf32>
    %c5_81 = arith.constant 5 : index
    %c0_82 = arith.constant 0 : index
    %c0_83 = arith.constant 0 : index
    %78 = vector.load %arg11[%c5_81, %c0_82, %c0_83] : memref<9x64x16xbf16, #tpu.memory_space<vmem>>, vector<1x64x16xbf16>
    %79 = vector.shape_cast %78 : vector<1x64x16xbf16> to vector<64x16xbf16>
    %cst_84 = arith.constant dense<0.000000e+00> : vector<32x16xf32>
    %80 = tpu.matmul %62, %79, %cst_84 {dimension_numbers = #tpu.dot_dimension_numbers<[1], [0], [0], [1], [0, 0, 1, 1], [], []>} : vector<32x64xbf16>, vector<64x16xbf16>, vector<32x16xf32> -> vector<32x16xf32>
    %c6_85 = arith.constant 6 : index
    %c0_86 = arith.constant 0 : index
    %c0_87 = arith.constant 0 : index
    %81 = vector.load %arg11[%c6_85, %c0_86, %c0_87] : memref<9x64x16xbf16, #tpu.memory_space<vmem>>, vector<1x64x16xbf16>
    %82 = vector.shape_cast %81 : vector<1x64x16xbf16> to vector<64x16xbf16>
    %cst_88 = arith.constant dense<0.000000e+00> : vector<32x16xf32>
    %83 = tpu.matmul %62, %82, %cst_88 {dimension_numbers = #tpu.dot_dimension_numbers<[1], [0], [0], [1], [0, 0, 1, 1], [], []>} : vector<32x64xbf16>, vector<64x16xbf16>, vector<32x16xf32> -> vector<32x16xf32>
    %c7_89 = arith.constant 7 : index
    %c0_90 = arith.constant 0 : index
    %c0_91 = arith.constant 0 : index
    %84 = vector.load %arg11[%c7_89, %c0_90, %c0_91] : memref<9x64x16xbf16, #tpu.memory_space<vmem>>, vector<1x64x16xbf16>
    %85 = vector.shape_cast %84 : vector<1x64x16xbf16> to vector<64x16xbf16>
    %cst_92 = arith.constant dense<0.000000e+00> : vector<32x16xf32>
    %86 = tpu.matmul %62, %85, %cst_92 {dimension_numbers = #tpu.dot_dimension_numbers<[1], [0], [0], [1], [0, 0, 1, 1], [], []>} : vector<32x64xbf16>, vector<64x16xbf16>, vector<32x16xf32> -> vector<32x16xf32>
    %c8_93 = arith.constant 8 : index
    %c0_94 = arith.constant 0 : index
    %c0_95 = arith.constant 0 : index
    %87 = vector.load %arg11[%c8_93, %c0_94, %c0_95] : memref<9x64x16xbf16, #tpu.memory_space<vmem>>, vector<1x64x16xbf16>
    %88 = vector.shape_cast %87 : vector<1x64x16xbf16> to vector<64x16xbf16>
    %cst_96 = arith.constant dense<0.000000e+00> : vector<32x16xf32>
    %89 = tpu.matmul %62, %88, %cst_96 {dimension_numbers = #tpu.dot_dimension_numbers<[1], [0], [0], [1], [0, 0, 1, 1], [], []>} : vector<32x64xbf16>, vector<64x16xbf16>, vector<32x16xf32> -> vector<32x16xf32>
    %90 = tpu.concatenate %65, %68, %71, %74, %77, %80, %83, %86, %89 in 0 : vector<32x16xf32>, vector<32x16xf32>, vector<32x16xf32>, vector<32x16xf32>, vector<32x16xf32>, vector<32x16xf32>, vector<32x16xf32>, vector<32x16xf32>, vector<32x16xf32> -> vector<288x16xf32>
    %91 = arith.truncf %90 : vector<288x16xf32> to vector<288x16xbf16>
    %cst_97 = arith.constant dense<0.000000e+00> : vector<64x16xf32>
    %92 = tpu.matmul %1, %91, %cst_97 {dimension_numbers = #tpu.dot_dimension_numbers<[1], [0], [0], [1], [0, 0, 1, 1], [], []>} : vector<64x288xbf16>, vector<288x16xbf16>, vector<64x16xf32> -> vector<64x16xf32>
    %93 = vector.broadcast %5 : vector<64x1xf32> to vector<64x16xf32>
    %94 = arith.addf %92, %93 : vector<64x16xf32>
    %cst_98 = arith.constant 0.000000e+00 : f32
    %95 = vector.broadcast %cst_98 : f32 to vector<64x16xf32>
    %96 = arith.maximumf %94, %95 : vector<64x16xf32>
    %97 = arith.truncf %96 : vector<64x16xf32> to vector<64x16xbf16>
    %cst_99 = arith.constant dense<0.000000e+00> : vector<512x16xf32>
    %98 = tpu.matmul %2, %97, %cst_99 {dimension_numbers = #tpu.dot_dimension_numbers<[1], [0], [0], [1], [0, 0, 1, 1], [], []>} : vector<512x64xbf16>, vector<64x16xbf16>, vector<512x16xf32> -> vector<512x16xf32>
    %99 = vector.extract_strided_slice %98 {offsets = [0, 0], sizes = [32, 16], strides = [1, 1]} : vector<512x16xf32> to vector<32x16xf32>
    %100 = arith.truncf %99 : vector<32x16xf32> to vector<32x16xbf16>
    %c0_100 = arith.constant 0 : index
    %c0_101 = arith.constant 0 : index
    %c0_102 = arith.constant 0 : index
    %101 = vector.load %arg14[%c0_100, %c0_101, %c0_102] : memref<16x16x64xbf16, #tpu.memory_space<vmem>>, vector<1x16x64xbf16>
    %102 = vector.shape_cast %101 : vector<1x16x64xbf16> to vector<16x64xbf16>
    %cst_103 = arith.constant dense<0.000000e+00> : vector<32x64xf32>
    %103 = tpu.matmul %100, %102, %cst_103 {dimension_numbers = #tpu.dot_dimension_numbers<[1], [0], [0], [1], [0, 0, 1, 1], [], []>} : vector<32x16xbf16>, vector<16x64xbf16>, vector<32x64xf32> -> vector<32x64xf32>
    %104 = vector.extract_strided_slice %98 {offsets = [32, 0], sizes = [32, 16], strides = [1, 1]} : vector<512x16xf32> to vector<32x16xf32>
    %105 = arith.truncf %104 : vector<32x16xf32> to vector<32x16xbf16>
    %c1_104 = arith.constant 1 : index
    %c0_105 = arith.constant 0 : index
    %c0_106 = arith.constant 0 : index
    %106 = vector.load %arg14[%c1_104, %c0_105, %c0_106] : memref<16x16x64xbf16, #tpu.memory_space<vmem>>, vector<1x16x64xbf16>
    %107 = vector.shape_cast %106 : vector<1x16x64xbf16> to vector<16x64xbf16>
    %cst_107 = arith.constant dense<0.000000e+00> : vector<32x64xf32>
    %108 = tpu.matmul %105, %107, %cst_107 {dimension_numbers = #tpu.dot_dimension_numbers<[1], [0], [0], [1], [0, 0, 1, 1], [], []>} : vector<32x16xbf16>, vector<16x64xbf16>, vector<32x64xf32> -> vector<32x64xf32>
    %109 = arith.addf %103, %108 : vector<32x64xf32>
    %110 = vector.extract_strided_slice %98 {offsets = [64, 0], sizes = [32, 16], strides = [1, 1]} : vector<512x16xf32> to vector<32x16xf32>
    %111 = arith.truncf %110 : vector<32x16xf32> to vector<32x16xbf16>
    %c2_108 = arith.constant 2 : index
    %c0_109 = arith.constant 0 : index
    %c0_110 = arith.constant 0 : index
    %112 = vector.load %arg14[%c2_108, %c0_109, %c0_110] : memref<16x16x64xbf16, #tpu.memory_space<vmem>>, vector<1x16x64xbf16>
    %113 = vector.shape_cast %112 : vector<1x16x64xbf16> to vector<16x64xbf16>
    %cst_111 = arith.constant dense<0.000000e+00> : vector<32x64xf32>
    %114 = tpu.matmul %111, %113, %cst_111 {dimension_numbers = #tpu.dot_dimension_numbers<[1], [0], [0], [1], [0, 0, 1, 1], [], []>} : vector<32x16xbf16>, vector<16x64xbf16>, vector<32x64xf32> -> vector<32x64xf32>
    %115 = arith.addf %109, %114 : vector<32x64xf32>
    %116 = vector.extract_strided_slice %98 {offsets = [96, 0], sizes = [32, 16], strides = [1, 1]} : vector<512x16xf32> to vector<32x16xf32>
    %117 = arith.truncf %116 : vector<32x16xf32> to vector<32x16xbf16>
    %c3_112 = arith.constant 3 : index
    %c0_113 = arith.constant 0 : index
    %c0_114 = arith.constant 0 : index
    %118 = vector.load %arg14[%c3_112, %c0_113, %c0_114] : memref<16x16x64xbf16, #tpu.memory_space<vmem>>, vector<1x16x64xbf16>
    %119 = vector.shape_cast %118 : vector<1x16x64xbf16> to vector<16x64xbf16>
    %cst_115 = arith.constant dense<0.000000e+00> : vector<32x64xf32>
    %120 = tpu.matmul %117, %119, %cst_115 {dimension_numbers = #tpu.dot_dimension_numbers<[1], [0], [0], [1], [0, 0, 1, 1], [], []>} : vector<32x16xbf16>, vector<16x64xbf16>, vector<32x64xf32> -> vector<32x64xf32>
    %121 = arith.addf %115, %120 : vector<32x64xf32>
    %122 = vector.extract_strided_slice %98 {offsets = [128, 0], sizes = [32, 16], strides = [1, 1]} : vector<512x16xf32> to vector<32x16xf32>
    %123 = arith.truncf %122 : vector<32x16xf32> to vector<32x16xbf16>
    %c4_116 = arith.constant 4 : index
    %c0_117 = arith.constant 0 : index
    %c0_118 = arith.constant 0 : index
    %124 = vector.load %arg14[%c4_116, %c0_117, %c0_118] : memref<16x16x64xbf16, #tpu.memory_space<vmem>>, vector<1x16x64xbf16>
    %125 = vector.shape_cast %124 : vector<1x16x64xbf16> to vector<16x64xbf16>
    %cst_119 = arith.constant dense<0.000000e+00> : vector<32x64xf32>
    %126 = tpu.matmul %123, %125, %cst_119 {dimension_numbers = #tpu.dot_dimension_numbers<[1], [0], [0], [1], [0, 0, 1, 1], [], []>} : vector<32x16xbf16>, vector<16x64xbf16>, vector<32x64xf32> -> vector<32x64xf32>
    %127 = arith.addf %121, %126 : vector<32x64xf32>
    %128 = vector.extract_strided_slice %98 {offsets = [160, 0], sizes = [32, 16], strides = [1, 1]} : vector<512x16xf32> to vector<32x16xf32>
    %129 = arith.truncf %128 : vector<32x16xf32> to vector<32x16xbf16>
    %c5_120 = arith.constant 5 : index
    %c0_121 = arith.constant 0 : index
    %c0_122 = arith.constant 0 : index
    %130 = vector.load %arg14[%c5_120, %c0_121, %c0_122] : memref<16x16x64xbf16, #tpu.memory_space<vmem>>, vector<1x16x64xbf16>
    %131 = vector.shape_cast %130 : vector<1x16x64xbf16> to vector<16x64xbf16>
    %cst_123 = arith.constant dense<0.000000e+00> : vector<32x64xf32>
    %132 = tpu.matmul %129, %131, %cst_123 {dimension_numbers = #tpu.dot_dimension_numbers<[1], [0], [0], [1], [0, 0, 1, 1], [], []>} : vector<32x16xbf16>, vector<16x64xbf16>, vector<32x64xf32> -> vector<32x64xf32>
    %133 = arith.addf %127, %132 : vector<32x64xf32>
    %134 = vector.extract_strided_slice %98 {offsets = [192, 0], sizes = [32, 16], strides = [1, 1]} : vector<512x16xf32> to vector<32x16xf32>
    %135 = arith.truncf %134 : vector<32x16xf32> to vector<32x16xbf16>
    %c6_124 = arith.constant 6 : index
    %c0_125 = arith.constant 0 : index
    %c0_126 = arith.constant 0 : index
    %136 = vector.load %arg14[%c6_124, %c0_125, %c0_126] : memref<16x16x64xbf16, #tpu.memory_space<vmem>>, vector<1x16x64xbf16>
    %137 = vector.shape_cast %136 : vector<1x16x64xbf16> to vector<16x64xbf16>
    %cst_127 = arith.constant dense<0.000000e+00> : vector<32x64xf32>
    %138 = tpu.matmul %135, %137, %cst_127 {dimension_numbers = #tpu.dot_dimension_numbers<[1], [0], [0], [1], [0, 0, 1, 1], [], []>} : vector<32x16xbf16>, vector<16x64xbf16>, vector<32x64xf32> -> vector<32x64xf32>
    %139 = arith.addf %133, %138 : vector<32x64xf32>
    %140 = vector.extract_strided_slice %98 {offsets = [224, 0], sizes = [32, 16], strides = [1, 1]} : vector<512x16xf32> to vector<32x16xf32>
    %141 = arith.truncf %140 : vector<32x16xf32> to vector<32x16xbf16>
    %c7_128 = arith.constant 7 : index
    %c0_129 = arith.constant 0 : index
    %c0_130 = arith.constant 0 : index
    %142 = vector.load %arg14[%c7_128, %c0_129, %c0_130] : memref<16x16x64xbf16, #tpu.memory_space<vmem>>, vector<1x16x64xbf16>
    %143 = vector.shape_cast %142 : vector<1x16x64xbf16> to vector<16x64xbf16>
    %cst_131 = arith.constant dense<0.000000e+00> : vector<32x64xf32>
    %144 = tpu.matmul %141, %143, %cst_131 {dimension_numbers = #tpu.dot_dimension_numbers<[1], [0], [0], [1], [0, 0, 1, 1], [], []>} : vector<32x16xbf16>, vector<16x64xbf16>, vector<32x64xf32> -> vector<32x64xf32>
    %145 = arith.addf %139, %144 : vector<32x64xf32>
    %146 = vector.extract_strided_slice %98 {offsets = [256, 0], sizes = [32, 16], strides = [1, 1]} : vector<512x16xf32> to vector<32x16xf32>
    %147 = arith.truncf %146 : vector<32x16xf32> to vector<32x16xbf16>
    %c8_132 = arith.constant 8 : index
    %c0_133 = arith.constant 0 : index
    %c0_134 = arith.constant 0 : index
    %148 = vector.load %arg14[%c8_132, %c0_133, %c0_134] : memref<16x16x64xbf16, #tpu.memory_space<vmem>>, vector<1x16x64xbf16>
    %149 = vector.shape_cast %148 : vector<1x16x64xbf16> to vector<16x64xbf16>
    %cst_135 = arith.constant dense<0.000000e+00> : vector<32x64xf32>
    %150 = tpu.matmul %147, %149, %cst_135 {dimension_numbers = #tpu.dot_dimension_numbers<[1], [0], [0], [1], [0, 0, 1, 1], [], []>} : vector<32x16xbf16>, vector<16x64xbf16>, vector<32x64xf32> -> vector<32x64xf32>
    %151 = arith.addf %145, %150 : vector<32x64xf32>
    %152 = vector.extract_strided_slice %98 {offsets = [288, 0], sizes = [32, 16], strides = [1, 1]} : vector<512x16xf32> to vector<32x16xf32>
    %153 = arith.truncf %152 : vector<32x16xf32> to vector<32x16xbf16>
    %c9 = arith.constant 9 : index
    %c0_136 = arith.constant 0 : index
    %c0_137 = arith.constant 0 : index
    %154 = vector.load %arg14[%c9, %c0_136, %c0_137] : memref<16x16x64xbf16, #tpu.memory_space<vmem>>, vector<1x16x64xbf16>
    %155 = vector.shape_cast %154 : vector<1x16x64xbf16> to vector<16x64xbf16>
    %cst_138 = arith.constant dense<0.000000e+00> : vector<32x64xf32>
    %156 = tpu.matmul %153, %155, %cst_138 {dimension_numbers = #tpu.dot_dimension_numbers<[1], [0], [0], [1], [0, 0, 1, 1], [], []>} : vector<32x16xbf16>, vector<16x64xbf16>, vector<32x64xf32> -> vector<32x64xf32>
    %157 = arith.addf %151, %156 : vector<32x64xf32>
    %158 = vector.extract_strided_slice %98 {offsets = [320, 0], sizes = [32, 16], strides = [1, 1]} : vector<512x16xf32> to vector<32x16xf32>
    %159 = arith.truncf %158 : vector<32x16xf32> to vector<32x16xbf16>
    %c10 = arith.constant 10 : index
    %c0_139 = arith.constant 0 : index
    %c0_140 = arith.constant 0 : index
    %160 = vector.load %arg14[%c10, %c0_139, %c0_140] : memref<16x16x64xbf16, #tpu.memory_space<vmem>>, vector<1x16x64xbf16>
    %161 = vector.shape_cast %160 : vector<1x16x64xbf16> to vector<16x64xbf16>
    %cst_141 = arith.constant dense<0.000000e+00> : vector<32x64xf32>
    %162 = tpu.matmul %159, %161, %cst_141 {dimension_numbers = #tpu.dot_dimension_numbers<[1], [0], [0], [1], [0, 0, 1, 1], [], []>} : vector<32x16xbf16>, vector<16x64xbf16>, vector<32x64xf32> -> vector<32x64xf32>
    %163 = arith.addf %157, %162 : vector<32x64xf32>
    %164 = vector.extract_strided_slice %98 {offsets = [352, 0], sizes = [32, 16], strides = [1, 1]} : vector<512x16xf32> to vector<32x16xf32>
    %165 = arith.truncf %164 : vector<32x16xf32> to vector<32x16xbf16>
    %c11 = arith.constant 11 : index
    %c0_142 = arith.constant 0 : index
    %c0_143 = arith.constant 0 : index
    %166 = vector.load %arg14[%c11, %c0_142, %c0_143] : memref<16x16x64xbf16, #tpu.memory_space<vmem>>, vector<1x16x64xbf16>
    %167 = vector.shape_cast %166 : vector<1x16x64xbf16> to vector<16x64xbf16>
    %cst_144 = arith.constant dense<0.000000e+00> : vector<32x64xf32>
    %168 = tpu.matmul %165, %167, %cst_144 {dimension_numbers = #tpu.dot_dimension_numbers<[1], [0], [0], [1], [0, 0, 1, 1], [], []>} : vector<32x16xbf16>, vector<16x64xbf16>, vector<32x64xf32> -> vector<32x64xf32>
    %169 = arith.addf %163, %168 : vector<32x64xf32>
    %170 = vector.extract_strided_slice %98 {offsets = [384, 0], sizes = [32, 16], strides = [1, 1]} : vector<512x16xf32> to vector<32x16xf32>
    %171 = arith.truncf %170 : vector<32x16xf32> to vector<32x16xbf16>
    %c12 = arith.constant 12 : index
    %c0_145 = arith.constant 0 : index
    %c0_146 = arith.constant 0 : index
    %172 = vector.load %arg14[%c12, %c0_145, %c0_146] : memref<16x16x64xbf16, #tpu.memory_space<vmem>>, vector<1x16x64xbf16>
    %173 = vector.shape_cast %172 : vector<1x16x64xbf16> to vector<16x64xbf16>
    %cst_147 = arith.constant dense<0.000000e+00> : vector<32x64xf32>
    %174 = tpu.matmul %171, %173, %cst_147 {dimension_numbers = #tpu.dot_dimension_numbers<[1], [0], [0], [1], [0, 0, 1, 1], [], []>} : vector<32x16xbf16>, vector<16x64xbf16>, vector<32x64xf32> -> vector<32x64xf32>
    %175 = arith.addf %169, %174 : vector<32x64xf32>
    %176 = vector.extract_strided_slice %98 {offsets = [416, 0], sizes = [32, 16], strides = [1, 1]} : vector<512x16xf32> to vector<32x16xf32>
    %177 = arith.truncf %176 : vector<32x16xf32> to vector<32x16xbf16>
    %c13 = arith.constant 13 : index
    %c0_148 = arith.constant 0 : index
    %c0_149 = arith.constant 0 : index
    %178 = vector.load %arg14[%c13, %c0_148, %c0_149] : memref<16x16x64xbf16, #tpu.memory_space<vmem>>, vector<1x16x64xbf16>
    %179 = vector.shape_cast %178 : vector<1x16x64xbf16> to vector<16x64xbf16>
    %cst_150 = arith.constant dense<0.000000e+00> : vector<32x64xf32>
    %180 = tpu.matmul %177, %179, %cst_150 {dimension_numbers = #tpu.dot_dimension_numbers<[1], [0], [0], [1], [0, 0, 1, 1], [], []>} : vector<32x16xbf16>, vector<16x64xbf16>, vector<32x64xf32> -> vector<32x64xf32>
    %181 = arith.addf %175, %180 : vector<32x64xf32>
    %182 = vector.extract_strided_slice %98 {offsets = [448, 0], sizes = [32, 16], strides = [1, 1]} : vector<512x16xf32> to vector<32x16xf32>
    %183 = arith.truncf %182 : vector<32x16xf32> to vector<32x16xbf16>
    %c14 = arith.constant 14 : index
    %c0_151 = arith.constant 0 : index
    %c0_152 = arith.constant 0 : index
    %184 = vector.load %arg14[%c14, %c0_151, %c0_152] : memref<16x16x64xbf16, #tpu.memory_space<vmem>>, vector<1x16x64xbf16>
    %185 = vector.shape_cast %184 : vector<1x16x64xbf16> to vector<16x64xbf16>
    %cst_153 = arith.constant dense<0.000000e+00> : vector<32x64xf32>
    %186 = tpu.matmul %183, %185, %cst_153 {dimension_numbers = #tpu.dot_dimension_numbers<[1], [0], [0], [1], [0, 0, 1, 1], [], []>} : vector<32x16xbf16>, vector<16x64xbf16>, vector<32x64xf32> -> vector<32x64xf32>
    %187 = arith.addf %181, %186 : vector<32x64xf32>
    %188 = vector.extract_strided_slice %98 {offsets = [480, 0], sizes = [32, 16], strides = [1, 1]} : vector<512x16xf32> to vector<32x16xf32>
    %189 = arith.truncf %188 : vector<32x16xf32> to vector<32x16xbf16>
    %c15 = arith.constant 15 : index
    %c0_154 = arith.constant 0 : index
    %c0_155 = arith.constant 0 : index
    %190 = vector.load %arg14[%c15, %c0_154, %c0_155] : memref<16x16x64xbf16, #tpu.memory_space<vmem>>, vector<1x16x64xbf16>
    %191 = vector.shape_cast %190 : vector<1x16x64xbf16> to vector<16x64xbf16>
    %cst_156 = arith.constant dense<0.000000e+00> : vector<32x64xf32>
    %192 = tpu.matmul %189, %191, %cst_156 {dimension_numbers = #tpu.dot_dimension_numbers<[1], [0], [0], [1], [0, 0, 1, 1], [], []>} : vector<32x16xbf16>, vector<16x64xbf16>, vector<32x64xf32> -> vector<32x64xf32>
    %193 = arith.addf %187, %192 : vector<32x64xf32>
    %194 = vector.broadcast %6 : vector<32x1xf32> to vector<32x64xf32>
    %195 = arith.addf %193, %194 : vector<32x64xf32>
    %cst_157 = arith.constant 0.000000e+00 : f32
    %196 = vector.broadcast %cst_157 : f32 to vector<32x64xf32>
    %197 = arith.maximumf %195, %196 : vector<32x64xf32>
    %198 = arith.addf %197, %61 : vector<32x64xf32>
    %199 = arith.truncf %198 : vector<32x64xf32> to vector<32x64xbf16>
    %cst_158 = arith.constant dense<0.000000e+00> : vector<16x64xf32>
    %200 = tpu.matmul %3, %199, %cst_158 {dimension_numbers = #tpu.dot_dimension_numbers<[1], [0], [0], [1], [0, 0, 1, 1], [], []>} : vector<16x32xbf16>, vector<32x64xbf16>, vector<16x64xf32> -> vector<16x64xf32>
    %201 = vector.extract_strided_slice %200 {offsets = [0, 0], sizes = [1, 64], strides = [1, 1]} : vector<16x64xf32> to vector<1x64xf32>
    %202 = arith.truncf %201 : vector<1x64xf32> to vector<1x64xbf16>
    %c0_159 = arith.constant 0 : index
    %c0_160 = arith.constant 0 : index
    %c0_161 = arith.constant 0 : index
    %203 = vector.load %arg17[%c0_159, %c0_160, %c0_161] : memref<16x64x256xbf16, #tpu.memory_space<vmem>>, vector<1x64x256xbf16>
    %204 = vector.shape_cast %203 : vector<1x64x256xbf16> to vector<64x256xbf16>
    %cst_162 = arith.constant dense<0.000000e+00> : vector<1x256xf32>
    %205 = tpu.matmul %202, %204, %cst_162 {dimension_numbers = #tpu.dot_dimension_numbers<[1], [0], [0], [1], [0, 0, 1, 1], [], []>} : vector<1x64xbf16>, vector<64x256xbf16>, vector<1x256xf32> -> vector<1x256xf32>
    %206 = vector.extract_strided_slice %200 {offsets = [1, 0], sizes = [1, 64], strides = [1, 1]} : vector<16x64xf32> to vector<1x64xf32>
    %207 = arith.truncf %206 : vector<1x64xf32> to vector<1x64xbf16>
    %c1_163 = arith.constant 1 : index
    %c0_164 = arith.constant 0 : index
    %c0_165 = arith.constant 0 : index
    %208 = vector.load %arg17[%c1_163, %c0_164, %c0_165] : memref<16x64x256xbf16, #tpu.memory_space<vmem>>, vector<1x64x256xbf16>
    %209 = vector.shape_cast %208 : vector<1x64x256xbf16> to vector<64x256xbf16>
    %cst_166 = arith.constant dense<0.000000e+00> : vector<1x256xf32>
    %210 = tpu.matmul %207, %209, %cst_166 {dimension_numbers = #tpu.dot_dimension_numbers<[1], [0], [0], [1], [0, 0, 1, 1], [], []>} : vector<1x64xbf16>, vector<64x256xbf16>, vector<1x256xf32> -> vector<1x256xf32>
    %211 = arith.addf %205, %210 : vector<1x256xf32>
    %212 = vector.extract_strided_slice %200 {offsets = [2, 0], sizes = [1, 64], strides = [1, 1]} : vector<16x64xf32> to vector<1x64xf32>
    %213 = arith.truncf %212 : vector<1x64xf32> to vector<1x64xbf16>
    %c2_167 = arith.constant 2 : index
    %c0_168 = arith.constant 0 : index
    %c0_169 = arith.constant 0 : index
    %214 = vector.load %arg17[%c2_167, %c0_168, %c0_169] : memref<16x64x256xbf16, #tpu.memory_space<vmem>>, vector<1x64x256xbf16>
    %215 = vector.shape_cast %214 : vector<1x64x256xbf16> to vector<64x256xbf16>
    %cst_170 = arith.constant dense<0.000000e+00> : vector<1x256xf32>
    %216 = tpu.matmul %213, %215, %cst_170 {dimension_numbers = #tpu.dot_dimension_numbers<[1], [0], [0], [1], [0, 0, 1, 1], [], []>} : vector<1x64xbf16>, vector<64x256xbf16>, vector<1x256xf32> -> vector<1x256xf32>
    %217 = arith.addf %211, %216 : vector<1x256xf32>
    %218 = vector.extract_strided_slice %200 {offsets = [3, 0], sizes = [1, 64], strides = [1, 1]} : vector<16x64xf32> to vector<1x64xf32>
    %219 = arith.truncf %218 : vector<1x64xf32> to vector<1x64xbf16>
    %c3_171 = arith.constant 3 : index
    %c0_172 = arith.constant 0 : index
    %c0_173 = arith.constant 0 : index
    %220 = vector.load %arg17[%c3_171, %c0_172, %c0_173] : memref<16x64x256xbf16, #tpu.memory_space<vmem>>, vector<1x64x256xbf16>
    %221 = vector.shape_cast %220 : vector<1x64x256xbf16> to vector<64x256xbf16>
    %cst_174 = arith.constant dense<0.000000e+00> : vector<1x256xf32>
    %222 = tpu.matmul %219, %221, %cst_174 {dimension_numbers = #tpu.dot_dimension_numbers<[1], [0], [0], [1], [0, 0, 1, 1], [], []>} : vector<1x64xbf16>, vector<64x256xbf16>, vector<1x256xf32> -> vector<1x256xf32>
    %223 = arith.addf %217, %222 : vector<1x256xf32>
    %224 = vector.extract_strided_slice %200 {offsets = [4, 0], sizes = [1, 64], strides = [1, 1]} : vector<16x64xf32> to vector<1x64xf32>
    %225 = arith.truncf %224 : vector<1x64xf32> to vector<1x64xbf16>
    %c4_175 = arith.constant 4 : index
    %c0_176 = arith.constant 0 : index
    %c0_177 = arith.constant 0 : index
    %226 = vector.load %arg17[%c4_175, %c0_176, %c0_177] : memref<16x64x256xbf16, #tpu.memory_space<vmem>>, vector<1x64x256xbf16>
    %227 = vector.shape_cast %226 : vector<1x64x256xbf16> to vector<64x256xbf16>
    %cst_178 = arith.constant dense<0.000000e+00> : vector<1x256xf32>
    %228 = tpu.matmul %225, %227, %cst_178 {dimension_numbers = #tpu.dot_dimension_numbers<[1], [0], [0], [1], [0, 0, 1, 1], [], []>} : vector<1x64xbf16>, vector<64x256xbf16>, vector<1x256xf32> -> vector<1x256xf32>
    %229 = arith.addf %223, %228 : vector<1x256xf32>
    %230 = vector.extract_strided_slice %200 {offsets = [5, 0], sizes = [1, 64], strides = [1, 1]} : vector<16x64xf32> to vector<1x64xf32>
    %231 = arith.truncf %230 : vector<1x64xf32> to vector<1x64xbf16>
    %c5_179 = arith.constant 5 : index
    %c0_180 = arith.constant 0 : index
    %c0_181 = arith.constant 0 : index
    %232 = vector.load %arg17[%c5_179, %c0_180, %c0_181] : memref<16x64x256xbf16, #tpu.memory_space<vmem>>, vector<1x64x256xbf16>
    %233 = vector.shape_cast %232 : vector<1x64x256xbf16> to vector<64x256xbf16>
    %cst_182 = arith.constant dense<0.000000e+00> : vector<1x256xf32>
    %234 = tpu.matmul %231, %233, %cst_182 {dimension_numbers = #tpu.dot_dimension_numbers<[1], [0], [0], [1], [0, 0, 1, 1], [], []>} : vector<1x64xbf16>, vector<64x256xbf16>, vector<1x256xf32> -> vector<1x256xf32>
    %235 = arith.addf %229, %234 : vector<1x256xf32>
    %236 = vector.extract_strided_slice %200 {offsets = [6, 0], sizes = [1, 64], strides = [1, 1]} : vector<16x64xf32> to vector<1x64xf32>
    %237 = arith.truncf %236 : vector<1x64xf32> to vector<1x64xbf16>
    %c6_183 = arith.constant 6 : index
    %c0_184 = arith.constant 0 : index
    %c0_185 = arith.constant 0 : index
    %238 = vector.load %arg17[%c6_183, %c0_184, %c0_185] : memref<16x64x256xbf16, #tpu.memory_space<vmem>>, vector<1x64x256xbf16>
    %239 = vector.shape_cast %238 : vector<1x64x256xbf16> to vector<64x256xbf16>
    %cst_186 = arith.constant dense<0.000000e+00> : vector<1x256xf32>
    %240 = tpu.matmul %237, %239, %cst_186 {dimension_numbers = #tpu.dot_dimension_numbers<[1], [0], [0], [1], [0, 0, 1, 1], [], []>} : vector<1x64xbf16>, vector<64x256xbf16>, vector<1x256xf32> -> vector<1x256xf32>
    %241 = arith.addf %235, %240 : vector<1x256xf32>
    %242 = vector.extract_strided_slice %200 {offsets = [7, 0], sizes = [1, 64], strides = [1, 1]} : vector<16x64xf32> to vector<1x64xf32>
    %243 = arith.truncf %242 : vector<1x64xf32> to vector<1x64xbf16>
    %c7_187 = arith.constant 7 : index
    %c0_188 = arith.constant 0 : index
    %c0_189 = arith.constant 0 : index
    %244 = vector.load %arg17[%c7_187, %c0_188, %c0_189] : memref<16x64x256xbf16, #tpu.memory_space<vmem>>, vector<1x64x256xbf16>
    %245 = vector.shape_cast %244 : vector<1x64x256xbf16> to vector<64x256xbf16>
    %cst_190 = arith.constant dense<0.000000e+00> : vector<1x256xf32>
    %246 = tpu.matmul %243, %245, %cst_190 {dimension_numbers = #tpu.dot_dimension_numbers<[1], [0], [0], [1], [0, 0, 1, 1], [], []>} : vector<1x64xbf16>, vector<64x256xbf16>, vector<1x256xf32> -> vector<1x256xf32>
    %247 = arith.addf %241, %246 : vector<1x256xf32>
    %248 = vector.extract_strided_slice %200 {offsets = [8, 0], sizes = [1, 64], strides = [1, 1]} : vector<16x64xf32> to vector<1x64xf32>
    %249 = arith.truncf %248 : vector<1x64xf32> to vector<1x64xbf16>
    %c8_191 = arith.constant 8 : index
    %c0_192 = arith.constant 0 : index
    %c0_193 = arith.constant 0 : index
    %250 = vector.load %arg17[%c8_191, %c0_192, %c0_193] : memref<16x64x256xbf16, #tpu.memory_space<vmem>>, vector<1x64x256xbf16>
    %251 = vector.shape_cast %250 : vector<1x64x256xbf16> to vector<64x256xbf16>
    %cst_194 = arith.constant dense<0.000000e+00> : vector<1x256xf32>
    %252 = tpu.matmul %249, %251, %cst_194 {dimension_numbers = #tpu.dot_dimension_numbers<[1], [0], [0], [1], [0, 0, 1, 1], [], []>} : vector<1x64xbf16>, vector<64x256xbf16>, vector<1x256xf32> -> vector<1x256xf32>
    %253 = arith.addf %247, %252 : vector<1x256xf32>
    %254 = vector.extract_strided_slice %200 {offsets = [9, 0], sizes = [1, 64], strides = [1, 1]} : vector<16x64xf32> to vector<1x64xf32>
    %255 = arith.truncf %254 : vector<1x64xf32> to vector<1x64xbf16>
    %c9_195 = arith.constant 9 : index
    %c0_196 = arith.constant 0 : index
    %c0_197 = arith.constant 0 : index
    %256 = vector.load %arg17[%c9_195, %c0_196, %c0_197] : memref<16x64x256xbf16, #tpu.memory_space<vmem>>, vector<1x64x256xbf16>
    %257 = vector.shape_cast %256 : vector<1x64x256xbf16> to vector<64x256xbf16>
    %cst_198 = arith.constant dense<0.000000e+00> : vector<1x256xf32>
    %258 = tpu.matmul %255, %257, %cst_198 {dimension_numbers = #tpu.dot_dimension_numbers<[1], [0], [0], [1], [0, 0, 1, 1], [], []>} : vector<1x64xbf16>, vector<64x256xbf16>, vector<1x256xf32> -> vector<1x256xf32>
    %259 = arith.addf %253, %258 : vector<1x256xf32>
    %260 = vector.extract_strided_slice %200 {offsets = [10, 0], sizes = [1, 64], strides = [1, 1]} : vector<16x64xf32> to vector<1x64xf32>
    %261 = arith.truncf %260 : vector<1x64xf32> to vector<1x64xbf16>
    %c10_199 = arith.constant 10 : index
    %c0_200 = arith.constant 0 : index
    %c0_201 = arith.constant 0 : index
    %262 = vector.load %arg17[%c10_199, %c0_200, %c0_201] : memref<16x64x256xbf16, #tpu.memory_space<vmem>>, vector<1x64x256xbf16>
    %263 = vector.shape_cast %262 : vector<1x64x256xbf16> to vector<64x256xbf16>
    %cst_202 = arith.constant dense<0.000000e+00> : vector<1x256xf32>
    %264 = tpu.matmul %261, %263, %cst_202 {dimension_numbers = #tpu.dot_dimension_numbers<[1], [0], [0], [1], [0, 0, 1, 1], [], []>} : vector<1x64xbf16>, vector<64x256xbf16>, vector<1x256xf32> -> vector<1x256xf32>
    %265 = arith.addf %259, %264 : vector<1x256xf32>
    %266 = vector.extract_strided_slice %200 {offsets = [11, 0], sizes = [1, 64], strides = [1, 1]} : vector<16x64xf32> to vector<1x64xf32>
    %267 = arith.truncf %266 : vector<1x64xf32> to vector<1x64xbf16>
    %c11_203 = arith.constant 11 : index
    %c0_204 = arith.constant 0 : index
    %c0_205 = arith.constant 0 : index
    %268 = vector.load %arg17[%c11_203, %c0_204, %c0_205] : memref<16x64x256xbf16, #tpu.memory_space<vmem>>, vector<1x64x256xbf16>
    %269 = vector.shape_cast %268 : vector<1x64x256xbf16> to vector<64x256xbf16>
    %cst_206 = arith.constant dense<0.000000e+00> : vector<1x256xf32>
    %270 = tpu.matmul %267, %269, %cst_206 {dimension_numbers = #tpu.dot_dimension_numbers<[1], [0], [0], [1], [0, 0, 1, 1], [], []>} : vector<1x64xbf16>, vector<64x256xbf16>, vector<1x256xf32> -> vector<1x256xf32>
    %271 = arith.addf %265, %270 : vector<1x256xf32>
    %272 = vector.extract_strided_slice %200 {offsets = [12, 0], sizes = [1, 64], strides = [1, 1]} : vector<16x64xf32> to vector<1x64xf32>
    %273 = arith.truncf %272 : vector<1x64xf32> to vector<1x64xbf16>
    %c12_207 = arith.constant 12 : index
    %c0_208 = arith.constant 0 : index
    %c0_209 = arith.constant 0 : index
    %274 = vector.load %arg17[%c12_207, %c0_208, %c0_209] : memref<16x64x256xbf16, #tpu.memory_space<vmem>>, vector<1x64x256xbf16>
    %275 = vector.shape_cast %274 : vector<1x64x256xbf16> to vector<64x256xbf16>
    %cst_210 = arith.constant dense<0.000000e+00> : vector<1x256xf32>
    %276 = tpu.matmul %273, %275, %cst_210 {dimension_numbers = #tpu.dot_dimension_numbers<[1], [0], [0], [1], [0, 0, 1, 1], [], []>} : vector<1x64xbf16>, vector<64x256xbf16>, vector<1x256xf32> -> vector<1x256xf32>
    %277 = arith.addf %271, %276 : vector<1x256xf32>
    %278 = vector.extract_strided_slice %200 {offsets = [13, 0], sizes = [1, 64], strides = [1, 1]} : vector<16x64xf32> to vector<1x64xf32>
    %279 = arith.truncf %278 : vector<1x64xf32> to vector<1x64xbf16>
    %c13_211 = arith.constant 13 : index
    %c0_212 = arith.constant 0 : index
    %c0_213 = arith.constant 0 : index
    %280 = vector.load %arg17[%c13_211, %c0_212, %c0_213] : memref<16x64x256xbf16, #tpu.memory_space<vmem>>, vector<1x64x256xbf16>
    %281 = vector.shape_cast %280 : vector<1x64x256xbf16> to vector<64x256xbf16>
    %cst_214 = arith.constant dense<0.000000e+00> : vector<1x256xf32>
    %282 = tpu.matmul %279, %281, %cst_214 {dimension_numbers = #tpu.dot_dimension_numbers<[1], [0], [0], [1], [0, 0, 1, 1], [], []>} : vector<1x64xbf16>, vector<64x256xbf16>, vector<1x256xf32> -> vector<1x256xf32>
    %283 = arith.addf %277, %282 : vector<1x256xf32>
    %284 = vector.extract_strided_slice %200 {offsets = [14, 0], sizes = [1, 64], strides = [1, 1]} : vector<16x64xf32> to vector<1x64xf32>
    %285 = arith.truncf %284 : vector<1x64xf32> to vector<1x64xbf16>
    %c14_215 = arith.constant 14 : index
    %c0_216 = arith.constant 0 : index
    %c0_217 = arith.constant 0 : index
    %286 = vector.load %arg17[%c14_215, %c0_216, %c0_217] : memref<16x64x256xbf16, #tpu.memory_space<vmem>>, vector<1x64x256xbf16>
    %287 = vector.shape_cast %286 : vector<1x64x256xbf16> to vector<64x256xbf16>
    %cst_218 = arith.constant dense<0.000000e+00> : vector<1x256xf32>
    %288 = tpu.matmul %285, %287, %cst_218 {dimension_numbers = #tpu.dot_dimension_numbers<[1], [0], [0], [1], [0, 0, 1, 1], [], []>} : vector<1x64xbf16>, vector<64x256xbf16>, vector<1x256xf32> -> vector<1x256xf32>
    %289 = arith.addf %283, %288 : vector<1x256xf32>
    %290 = vector.extract_strided_slice %200 {offsets = [15, 0], sizes = [1, 64], strides = [1, 1]} : vector<16x64xf32> to vector<1x64xf32>
    %291 = arith.truncf %290 : vector<1x64xf32> to vector<1x64xbf16>
    %c15_219 = arith.constant 15 : index
    %c0_220 = arith.constant 0 : index
    %c0_221 = arith.constant 0 : index
    %292 = vector.load %arg17[%c15_219, %c0_220, %c0_221] : memref<16x64x256xbf16, #tpu.memory_space<vmem>>, vector<1x64x256xbf16>
    %293 = vector.shape_cast %292 : vector<1x64x256xbf16> to vector<64x256xbf16>
    %cst_222 = arith.constant dense<0.000000e+00> : vector<1x256xf32>
    %294 = tpu.matmul %291, %293, %cst_222 {dimension_numbers = #tpu.dot_dimension_numbers<[1], [0], [0], [1], [0, 0, 1, 1], [], []>} : vector<1x64xbf16>, vector<64x256xbf16>, vector<1x256xf32> -> vector<1x256xf32>
    %295 = arith.addf %289, %294 : vector<1x256xf32>
    %296 = vector.broadcast %7 : vector<1x1xf32> to vector<1x256xf32>
    %297 = arith.addf %295, %296 : vector<1x256xf32>
    %c0_223 = arith.constant 0 : index
    %c0_224 = arith.constant 0 : index
    %c0_225 = arith.constant 0 : index
    %298 = vector.load %arg19[%c0_223, %c0_224, %c0_225] : memref<1x1x256xf32, #tpu.memory_space<vmem>>, vector<1x1x256xf32>
    %299 = vector.shape_cast %298 : vector<1x1x256xf32> to vector<1x256xf32>
    %300 = vector.shape_cast %297 : vector<1x256xf32> to vector<1x1x256xf32>
    tpu.vector_store %arg19[%c0_223, %c0_224, %c0_225], %300 {strides = array<i32>} : memref<1x1x256xf32, #tpu.memory_space<vmem>>, vector<1x1x256xf32>,
    return
  }
  func.func @transform_0(%arg0: i32) -> (i32, i32, i32) {
    %c0_i32 = arith.constant 0 : i32
    %c0_i32_0 = arith.constant 0 : i32
    %c0_i32_1 = arith.constant 0 : i32
    return %arg0, %c0_i32, %c0_i32_0 : i32, i32, i32
  }
  func.func @transform_1(%arg0: i32) -> (i32, i32, i32) {
    %c0_i32 = arith.constant 0 : i32
    %c0_i32_0 = arith.constant 0 : i32
    %c0_i32_1 = arith.constant 0 : i32
    return %arg0, %c0_i32, %c0_i32_0 : i32, i32, i32
  }
  func.func @transform_2(%arg0: i32) -> (i32, i32) {
    %c0_i32 = arith.constant 0 : i32
    %c0_i32_0 = arith.constant 0 : i32
    %c0_i32_1 = arith.constant 0 : i32
    return %c0_i32, %c0_i32_0 : i32, i32
  }
  func.func @transform_3(%arg0: i32) -> (i32, i32) {
    %c0_i32 = arith.constant 0 : i32
    %c0_i32_0 = arith.constant 0 : i32
    %c0_i32_1 = arith.constant 0 : i32
    return %c0_i32, %c0_i32_0 : i32, i32
  }
  func.func @transform_4(%arg0: i32) -> (i32, i32) {
    %c0_i32 = arith.constant 0 : i32
    %c0_i32_0 = arith.constant 0 : i32
    %c0_i32_1 = arith.constant 0 : i32
    return %c0_i32, %c0_i32_0 : i32, i32
  }
  func.func @transform_5(%arg0: i32) -> (i32, i32) {
    %c0_i32 = arith.constant 0 : i32
    %c0_i32_0 = arith.constant 0 : i32
    %c0_i32_1 = arith.constant 0 : i32
    return %c0_i32, %c0_i32_0 : i32, i32
  }
  func.func @transform_6(%arg0: i32) -> (i32, i32) {
    %c0_i32 = arith.constant 0 : i32
    %c0_i32_0 = arith.constant 0 : i32
    %c0_i32_1 = arith.constant 0 : i32
    return %c0_i32, %c0_i32_0 : i32, i32
  }
  func.func @transform_7(%arg0: i32) -> (i32, i32, i32) {
    %c0_i32 = arith.constant 0 : i32
    %c0_i32_0 = arith.constant 0 : i32
    %c0_i32_1 = arith.constant 0 : i32
    %c0_i32_2 = arith.constant 0 : i32
    return %c0_i32, %c0_i32_0, %c0_i32_1 : i32, i32, i32
  }
  func.func @transform_8(%arg0: i32) -> (i32, i32) {
    %c0_i32 = arith.constant 0 : i32
    %c0_i32_0 = arith.constant 0 : i32
    %c0_i32_1 = arith.constant 0 : i32
    return %c0_i32, %c0_i32_0 : i32, i32
  }
  func.func @transform_9(%arg0: i32) -> (i32, i32) {
    %c0_i32 = arith.constant 0 : i32
    %c0_i32_0 = arith.constant 0 : i32
    %c0_i32_1 = arith.constant 0 : i32
    return %c0_i32, %c0_i32_0 : i32, i32
  }
  func.func @transform_10(%arg0: i32) -> (i32, i32, i32) {
    %c0_i32 = arith.constant 0 : i32
    %c0_i32_0 = arith.constant 0 : i32
    %c0_i32_1 = arith.constant 0 : i32
    %c0_i32_2 = arith.constant 0 : i32
    return %c0_i32, %c0_i32_0, %c0_i32_1 : i32, i32, i32
  }
  func.func @transform_11(%arg0: i32) -> (i32, i32) {
    %c0_i32 = arith.constant 0 : i32
    %c0_i32_0 = arith.constant 0 : i32
    %c0_i32_1 = arith.constant 0 : i32
    return %c0_i32, %c0_i32_0 : i32, i32
  }
  func.func @transform_12(%arg0: i32) -> (i32, i32) {
    %c0_i32 = arith.constant 0 : i32
    %c0_i32_0 = arith.constant 0 : i32
    %c0_i32_1 = arith.constant 0 : i32
    return %c0_i32, %c0_i32_0 : i32, i32
  }
  func.func @transform_13(%arg0: i32) -> (i32, i32, i32) {
    %c0_i32 = arith.constant 0 : i32
    %c0_i32_0 = arith.constant 0 : i32
    %c0_i32_1 = arith.constant 0 : i32
    %c0_i32_2 = arith.constant 0 : i32
    return %c0_i32, %c0_i32_0, %c0_i32_1 : i32, i32, i32
  }
  func.func @transform_14(%arg0: i32) -> (i32, i32) {
    %c0_i32 = arith.constant 0 : i32
    %c0_i32_0 = arith.constant 0 : i32
    %c0_i32_1 = arith.constant 0 : i32
    return %c0_i32, %c0_i32_0 : i32, i32
  }
  func.func @transform_15(%arg0: i32) -> (i32, i32) {
    %c0_i32 = arith.constant 0 : i32
    %c0_i32_0 = arith.constant 0 : i32
    %c0_i32_1 = arith.constant 0 : i32
    return %c0_i32, %c0_i32_0 : i32, i32
  }
  func.func @transform_16(%arg0: i32) -> (i32, i32, i32) {
    %c0_i32 = arith.constant 0 : i32
    %c0_i32_0 = arith.constant 0 : i32
    %c0_i32_1 = arith.constant 0 : i32
    %c0_i32_2 = arith.constant 0 : i32
    return %c0_i32, %c0_i32_0, %c0_i32_1 : i32, i32, i32
  }
  func.func @transform_17(%arg0: i32) -> (i32, i32) {
    %c0_i32 = arith.constant 0 : i32
    %c0_i32_0 = arith.constant 0 : i32
    %c0_i32_1 = arith.constant 0 : i32
    return %c0_i32, %c0_i32_0 : i32, i32
  }
  func.func @transform_18(%arg0: i32) -> (i32, i32, i32) {
    %c0_i32 = arith.constant 0 : i32
    %c0_i32_0 = arith.constant 0 : i32
    %c0_i32_1 = arith.constant 0 : i32
    return %arg0, %c0_i32, %c0_i32_0 : i32, i32, i32
  }
}

</mosaic_0001>

<bundles_post_ra>
// kernel: cnn_forward.1
= control target key start
LH: loop header
LB: loop body
LE: loop exit
PB: predicated region body
PF: predicated region fallthrough
CT: control target
= control target key end

     0   :  { %s9311_s29 = smov 0   ;;  %s10867_s0 = inlined_call_operand.vmem [shape: f32[2,1,1], index: 0, kind: input, shape index: {}]   ;;  %s10868_s1 = inlined_call_operand.vmem [shape: f32[2,1,256], index: 1, kind: input, shape index: {}]   ;;  %s10869_s2 = inlined_call_operand.vmem [shape: f32[128,1], index: 2, kind: input, shape index: {}]   ;;  %s10870_s3 = inlined_call_operand.vmem [shape: f32[128,1], index: 3, kind: input, shape index: {}]   ;;  %s10871_s4 = inlined_call_operand.vmem [shape: f32[32,128], index: 4, kind: input, shape index: {}]   ;;  %s10872_s5 = inlined_call_operand.vmem [shape: f32[32,1], index: 5, kind: input, shape index: {}]   ;;  %s10873_s6 = inlined_call_operand.vmem [shape: bf16[32,9], index: 6, kind: input, shape index: {}]   ;;  %s10874_s7 = inlined_call_operand.vmem [shape: bf16[9,256,64], index: 7, kind: input, shape index: {}]   ;;  %s10875_s8 = inlined_call_operand.vmem [shape: f32[32,1], index: 8, kind: input, shape index: {}]   ;;  %s10876_s9 = inlined_call_operand.vmem [shape: bf16[64,288], index: 9, kind: input, shape index: {}]   ;;  %s10877_s10 = inlined_call_operand.vmem [shape: bf16[9,64,16], index: 10, kind: input, shape index: {}]   ;;  %s10878_s11 = inlined_call_operand.vmem [shape: f32[64,1], index: 11, kind: input, shape index: {}]   ;;  %s10879_s12 = inlined_call_operand.vmem [shape: bf16[512,64], index: 12, kind: input, shape index: {}]   ;;  %s10880_s13 = inlined_call_operand.vmem [shape: bf16[16,16,64], index: 13, kind: input, shape index: {}]   ;;  %s10881_s14 = inlined_call_operand.vmem [shape: f32[32,1], index: 14, kind: input, shape index: {}]   ;;  %s10882_s15 = inlined_call_operand.vmem [shape: bf16[16,32], index: 15, kind: input, shape index: {}]   ;;  %s10883_s16 = inlined_call_operand.vmem [shape: bf16[16,64,256], index: 16, kind: input, shape index: {}]   ;;  %s10884_s17 = inlined_call_operand.<no memory space> [shape: f32[1,1], index: 17, kind: input, shape index: {}]   ;;  %s10885_s18 = inlined_call_operand.vmem [shape: f32[2,1,256], index: 18, kind: output, shape index: {}]  }
   0x1   :  { %10887 = sst [smem:[#allocation3_spill]] %s10867_s0  ;;  %v23_v0 = vstv %s10884_s17 }
   0x2   :  { %10888 = sst [smem:[#allocation4_spill]] %s10868_s1  ;;  %24 = vst [vmem:[#allocation2] sm:$0x1] %v23_v0 }
   0x3   :  { %10889 = sst [smem:[#allocation5_spill]] %s10869_s2 }
   0x4 LB: > { %s6951_s30 = sadd.s32 4294967295, %s9206_s29   ;;  %p6955_p0 = scmp.ge.s32.totalorder %s9206_s29, 1  ;;  %s9206_s29 = sphi %s9311_s29, %s30_s29  }
   0x5   : > { %p521_p1 = scmp.lt.s32.totalorder %s9206_s29, 3 }
   0x7   : > { %p522_p2 = pnand %p6955_p0, %p521_p1 }
   0x8   : > { %p576_p3 = scmp.lt.s32.totalorder (!%p522_p2), %s6951_s30, 1  ;;  %v710_v1 = vlaneseq (!%p522_p2)  ;;  %v8761_v3 = vld [vmem:[%s10874_s7 + $0x40] sm:$0xff] (!%p522_p2)   ;;  %s10890_s22 = sld [smem:[#allocation3_spill]] (!%p522_p2)  ;;  %v8763_v11 = vld [vmem:[%s10874_s7 + $0x48] sm:$0xff] (!%p522_p2)   ;;  %v733_v15 = vld [vmem:[%s10870_s3 + $0x10] sm:$0xff] (!%p522_p2)  ;;  %vm2472_vm0 = vcmask (!%p522_p2), 72704  }
   0x9   : > { %525 = sbr.rel (%p522_p2) target bundleno = 2379 (0x94b), region = 92  ;;  %v8762_v4 = vld [vmem:[%s10874_s7] sm:$0xff] (!%p522_p2)   ;;  %7926 = vmatprep.subr.bf16.mxu1 (!%p522_p2), %v8761_v3  ;;  %s10891_s25 = sld [smem:[#allocation5_spill]] (!%p522_p2)  ;;  %v732_v14 = vld [vmem:[%s10870_s3 + $0x8] sm:$0xff] (!%p522_p2)  ;;  %v734_v16 = vld [vmem:[%s10870_s3 + $0x18] sm:$0xff] (!%p522_p2)  ;;  %vm2427_vm1 = vcmask (!%p522_p2), 1040384  }
   0xa   : > { %v9322_v2 = vshrl.u32 (!%p522_p2), %v710_v1, 7  ;;  %7927 = vmatpush3.bf16.msra.mxu1 (!%p522_p2), %v8762_v4  ;;  %v731_v13 = vld [vmem:[%s10870_s3] sm:$0xff] (!%p522_p2)  ;;  %v8764_v17 = vld [vmem:[%s10874_s7 + $0x8] sm:$0xff] (!%p522_p2)   ;;  %v8765_v23 = vld [vmem:[%s10874_s7 + $0x50] sm:$0xff] (!%p522_p2)   ;;  %s10892_s20 = sld [smem:[#allocation4_spill]] (!%p522_p2)  ;;  %vm2429_vm2 = vcmask (!%p522_p2), 1041408  }
   0xb   : > { %7928 = vmatprep.subr.bf16.mxu1 (!%p522_p2), %v8763_v11  ;;  %v735_v21 = vld [vmem:[%s10870_s3 + $0x20] sm:$0xff] (!%p522_p2)  ;;  %v736_v22 = vld [vmem:[%s10870_s3 + $0x28] sm:$0xff] (!%p522_p2)  ;;  %v8766_v28 = vld [vmem:[%s10874_s7 + $0x10] sm:$0xff] (!%p522_p2)   ;;  %vm2431_vm3 = vcmask (!%p522_p2), 1042432   ;;  %vm2433_vm4 = vcmask (!%p522_p2), 1043456   ;;  %vm2435_vm5 = vcmask (!%p522_p2), 1044480  }
   0xc   : > { %v9335_v5 = vsub.s32 (!%p522_p2), 0, %v9322_v2  ;;  %v737_v34 = vld [vmem:[%s10870_s3 + $0x30] sm:$0xff] (!%p522_p2)  ;;  %v738_v35 = vld [vmem:[%s10870_s3 + $0x38] sm:$0xff] (!%p522_p2)  ;;  %v739_v55 = vld [vmem:[%s10870_s3 + $0x40] sm:$0xff] (!%p522_p2)  ;;  %vm2437_vm6 = vcmask (!%p522_p2), 1045504   ;;  %vm2439_vm7 = vcmask (!%p522_p2), 1046528  }
   0xd   : > { %v8767_v40 = vld [vmem:[%s10874_s7 + $0x58] sm:$0xff] (!%p522_p2)   ;;  %v740_v56 = vld [vmem:[%s10870_s3 + $0x48] sm:$0xff] (!%p522_p2)  ;;  %v8769_v57 = vld [vmem:[%s10874_s7 + $0x60] sm:$0xff] (!%p522_p2)   ;;  %vm2595_vm8 = vcmask (!%p522_p2), 523264   ;;  %vm3425_vm9 = vcmask (!%p522_p2), 261120   ;;  %vm4140_vm10 = vcmask (!%p522_p2), 130048  }
   0xe   : > { %7929 = vmatpush3.bf16.msra.mxu1 (!%p522_p2), %v8764_v17  ;;  %v8768_v44 = vld [vmem:[%s10874_s7 + $0x18] sm:$0xff] (!%p522_p2)   ;;  %v8770_v62 = vld [vmem:[%s10874_s7 + $0x20] sm:$0xff] (!%p522_p2)   ;;  %v741_v4 = vld [vmem:[%s10870_s3 + $0x50] sm:$0xff] (!%p522_p2)  ;;  %vm9211_vm11 = vmmov (!%p522_p2), 0   ;;  %vm6886_vm12 = vcmp.lt.s32.totalorder (!%p522_p2), %v710_v1, 256 }
   0xf   : > { %v693_v7 = vld [vmem:[%s10891_s25] sm:$0xff] (!%p522_p2)  ;;  %v694_v8 = vld [vmem:[%s10891_s25 + $0x8] sm:$0xff] (!%p522_p2)  ;;  %v695_v9 = vld [vmem:[%s10891_s25 + $0x10] sm:$0xff] (!%p522_p2)  ;;  %7930 = vmatprep.subr.bf16.mxu1 (!%p522_p2), %v8765_v23 }
  0x10   : > { %s10894_s30 = smov (!%p576_p3, %s6951_s30), 1  ;;  %v696_v10 = vld [vmem:[%s10891_s25 + $0x18] sm:$0xff]  ;;  %v697_v18 = vld [vmem:[%s10891_s25 + $0x20] sm:$0xff]  ;;  %v698_v19 = vld [vmem:[%s10891_s25 + $0x28] sm:$0xff] }
  0x11   : > { %s578_s2 = scalar_lea.vmem %s10890_s22, %s10894_s30  ;;  %v699_v29 = vld [vmem:[%s10891_s25 + $0x30] sm:$0xff]  ;;  %v700_v32 = vld [vmem:[%s10891_s25 + $0x38] sm:$0xff]  ;;  %v701_v49 = vld [vmem:[%s10891_s25 + $0x40] sm:$0xff]  ;;  %s6956_s23 = sshll.u32 %s10894_s30, 1 }
  0x12   : > { %v691_v6 = vld [vmem:[%s578_s2] sm:$0x1]  ;;  %7931 = vmatpush3.bf16.msra.mxu1 %v8766_v28  ;;  %v702_v50 = vld [vmem:[%s10891_s25 + $0x48] sm:$0xff]  ;;  %v703_v63 = vld [vmem:[%s10891_s25 + $0x50] sm:$0xff]  ;;  %s582_s21 = scalar_lea.vmem %s10892_s20, %s6956_s23 }
  0x13   : > { %v692_v12 = vmul.f32 0.001, %v691_v6  ;;  %7932 = vmatprep.subr.bf16.mxu1 %v8767_v40  ;;  %v704_v0 = vld [vmem:[%s10891_s25 + $0x58] sm:$0xff]  ;;  %v745_v40 = vld [vmem:[%s10870_s3 + $0x70] sm:$0xff] }
  0x15   : > { %v9374_v20 = vrot.slane %v692_v12, %v9335_v5 }
  0x16   : > { %7933 = vmatpush3.bf16.msra.mxu1 %v8768_v44  ;;  %v8776_v44 = vld [vmem:[%s10874_s7 + $0x38] sm:$0xff]  }
  0x17   : > { %v715_v24 = vmul.f32 %v9374_v20, %v693_v7  ;;  %v716_v25 = vmul.f32 %v9374_v20, %v694_v8  ;;  %v717_v26 = vmul.f32 %v9374_v20, %v695_v9  ;;  %v718_v27 = vmul.f32 %v9374_v20, %v696_v10  ;;  %7934 = vmatprep.subr.bf16.mxu1 %v8769_v57  ;;  %v8771_v8 = vld [vmem:[%s10874_s7 + $0x68] sm:$0xff]  }
  0x18   : > { %v719_v30 = vmul.f32 %v9374_v20, %v697_v18  ;;  %v720_v31 = vmul.f32 %v9374_v20, %v698_v19  ;;  %v721_v33 = vmul.f32 %v9374_v20, %v699_v29  ;;  %v722_v43 = vmul.f32 %v9374_v20, %v700_v32  ;;  %v8774_v29 = vld [vmem:[%s10874_s7 + $0x30] sm:$0xff]  }
  0x19   : > { %v747_v36 = vadd.f32 %v731_v13, %v715_v24  ;;  %v748_v37 = vadd.f32 %v732_v14, %v716_v25  ;;  %v749_v38 = vadd.f32 %v733_v15, %v717_v26  ;;  %v750_v39 = vadd.f32 %v734_v16, %v718_v27  ;;  %v742_v13 = vld [vmem:[%s10870_s3 + $0x58] sm:$0xff]  ;;  %v8772_v14 = vld [vmem:[%s10874_s7 + $0x28] sm:$0xff]   ;;  %v705_v15 = vld [vmem:[%s10891_s25 + $0x60] sm:$0xff] }
  0x1a   : > { %v751_v41 = vadd.f32 %v735_v21, %v719_v30  ;;  %v752_v42 = vadd.f32 %v736_v22, %v720_v31  ;;  %v753_v53 = vadd.f32 %v737_v34, %v721_v33  ;;  %v754_v54 = vadd.f32 %v738_v35, %v722_v43  ;;  %7935 = vmatpush3.bf16.msra.mxu1 %v8770_v62  ;;  %v706_v16 = vld [vmem:[%s10891_s25 + $0x68] sm:$0xff]  ;;  %v743_v21 = vld [vmem:[%s10870_s3 + $0x60] sm:$0xff]  ;;  %v8773_v24 = vld [vmem:[%s10874_s7 + $0x70] sm:$0xff]  }
  0x1b   : > { %v763_v45 = vmax.f32 %v747_v36, 0.0  ;;  %v764_v46 = vmax.f32 %v748_v37, 0.0  ;;  %v765_v47 = vmax.f32 %v749_v38, 0.0  ;;  %v766_v48 = vmax.f32 %v750_v39, 0.0  ;;  %7936 = vmatprep.subr.bf16.mxu1 %v8771_v8  ;;  %v744_v22 = vld [vmem:[%s10870_s3 + $0x68] sm:$0xff]  ;;  %v707_v30 = vld [vmem:[%s10891_s25 + $0x70] sm:$0xff] }
  0x1c   : > { %v767_v51 = vmax.f32 %v751_v41, 0.0  ;;  %v768_v52 = vmax.f32 %v752_v42, 0.0  ;;  %v723_v60 = vmul.f32 %v9374_v20, %v701_v49  ;;  %v724_v61 = vmul.f32 %v9374_v20, %v702_v50  ;;  %v708_v31 = vld [vmem:[%s10891_s25 + $0x78] sm:$0xff]  ;;  %v779_v42 = vld [vmem:[%s10871_s4] sm:$0xff]  ;;  %v8788_v62 = vld [vmem:[%s10874_s7 + $0x110] sm:$0xff]  }
  0x1d   : > { %v8654_v58 = vpack.c.bf16 %v764_v46, %v763_v45  ;;  %v8658_v59 = vpack.c.bf16 %v766_v48, %v765_v47  ;;  %v725_v3 = vmul.f32 %v9374_v20, %v703_v63  ;;  %v769_v6 = vmax.f32 %v753_v53, 0.0  ;;  %v8775_v36 = vld [vmem:[%s10874_s7 + $0x78] sm:$0xff]   ;;  %8346 = vmatprep.mubr.f32.mxu0 %v779_v42  ;;  %v8778_v47 = vld [vmem:[%s10874_s7 + $0x140] sm:$0xff]   ;;  %v8781_v8 = vld [vmem:[%s10874_s7 + $0xc8] sm:$0xff]  }
  0x1e   : > { %v726_v7 = vmul.f32 %v9374_v20, %v704_v0  ;;  %v8662_v9 = vpack.c.bf16 %v768_v52, %v767_v51  ;;  %v770_v10 = vmax.f32 %v754_v54, 0.0  ;;  %v755_v11 = vadd.f32 %v739_v55, %v723_v60  ;;  %7937 = vmatpush3.bf16.msra.mxu1 %v8772_v14  ;;  %v746_v41 = vld [vmem:[%s10870_s3 + $0x78] sm:$0xff]  ;;  %v8780_v54 = vld [vmem:[%s10874_s7 + $0x100] sm:$0xff]   ;;  %v8782_v55 = vld [vmem:[%s10874_s7 + $0x148] sm:$0xff]  }
  0x1f   : > { %8655 = vmatprep.subr.bf16.mxu0 %v8654_v58  ;;  %v756_v12 = vadd.f32 %v740_v56, %v724_v61  ;;  %v757_v17 = vadd.f32 %v741_v4, %v725_v3  ;;  %v727_v18 = vmul.f32 %v9374_v20, %v705_v15  ;;  %v728_v19 = vmul.f32 %v9374_v20, %v706_v16  ;;  %v8786_v60 = vld [vmem:[%s10874_s7 + $0x150] sm:$0xff]   ;;  %v8790_v63 = vld [vmem:[%s10874_s7 + $0x158] sm:$0xff]   ;;  %v8777_v0 = vld [vmem:[%s10874_s7 + $0xc0] sm:$0xff]  }
  0x20   : > { %8657 = vmatpush3.bf16.msra.mxu0 %v8654_v58  ;;  %v758_v23 = vadd.f32 %v742_v13, %v726_v7  ;;  %v8666_v25 = vpack.c.bf16 %v770_v10, %v769_v6  ;;  %v771_v26 = vmax.f32 %v755_v11, 0.0  ;;  %7938 = vmatprep.subr.bf16.mxu1 %v8773_v24  ;;  %v880_v34 = vsub.s32 1, %v9322_v2  ;;  %v780_v3 = vld [vmem:[%s10871_s4 + $0x8] sm:$0xff]  ;;  %v8792_v4 = vld [vmem:[%s10874_s7 + $0x118] sm:$0xff]   ;;  %v8779_v6 = vld [vmem:[%s10874_s7 + $0x80] sm:$0xff]  }
  0x21   : > { %8659 = vmatprep.subr.bf16.mxu0 %v8658_v59  ;;  %v772_v27 = vmax.f32 %v756_v12, 0.0  ;;  %v759_v28 = vadd.f32 %v743_v21, %v727_v18  ;;  %v773_v32 = vmax.f32 %v757_v17, 0.0  ;;  %v760_v33 = vadd.f32 %v744_v22, %v728_v19  ;;  %v8794_v7 = vld [vmem:[%s10874_s7 + $0x160] sm:$0xff]   ;;  %v8783_v10 = vld [vmem:[%s10874_s7 + $0x88] sm:$0xff]   ;;  %v8785_v13 = vld [vmem:[%s10874_s7 + $0xd0] sm:$0xff]  }
  0x22   : > { %v774_v35 = vmax.f32 %v758_v23, 0.0  ;;  %v729_v38 = vmul.f32 %v9374_v20, %v707_v30  ;;  %v730_v39 = vmul.f32 %v9374_v20, %v708_v31  ;;  %7939 = vmatpush3.bf16.msra.mxu1 %v8774_v29  ;;  %v872_v20 = vld [vmem:[%s582_s21] sm:$0x3]  ;;  %v8798_v11 = vld [vmem:[%s10874_s7 + $0x168] sm:$0xff]   ;;  %v9208_v12 = vmov 0   ;;  %v8787_v15 = vld [vmem:[%s10874_s7 + $0x90] sm:$0xff]   ;;  %s586_s21 = scalar_lea.vmem %s10885_s18, %s6956_s23 }
  0x23   : > { %v8670_v37 = vpack.c.bf16 %v772_v27, %v771_v26  ;;  %v775_v43 = vmax.f32 %v759_v28, 0.0  ;;  %v776_v45 = vmax.f32 %v760_v33, 0.0  ;;  %7940 = vmatprep.subr.bf16.mxu1 %v8775_v36  ;;  %v881_v46 = vrot.slane %v872_v20, %v880_v34  ;;  %8760 = vset.pattern.permute.xlu1 %v9208_v12  ;;  %v8800_v14 = vld [vmem:[%s10874_s7 + $0x128] sm:$0xff]   ;;  %v8802_v16 = vld [vmem:[%s10874_s7 + $0x170] sm:$0xff]   ;;  %v8789_v17 = vld [vmem:[%s10874_s7 + $0xd8] sm:$0xff]  }
  0x24   : > { %8661 = vmatpush3.bf16.msra.mxu0 %v8658_v59  ;;  %v877_v48 = vrot.slane %v872_v20, %v9335_v5  ;;  %v8674_v49 = vpack.c.bf16 %v774_v35, %v773_v32  ;;  %v761_v50 = vadd.f32 %v745_v40, %v729_v38  ;;  %v762_v51 = vadd.f32 %v746_v41, %v730_v39  ;;  %v8784_v59 = vld [vmem:[%s10874_s7 + $0x108] sm:$0xff]   ;;  %v8804_v18 = vld [vmem:[%s10874_s7 + $0x130] sm:$0xff]   ;;  %v782_v21 = vld [vmem:[%s10871_s4 + $0x18] sm:$0xff] }
  0x25   : > { %8663 = vmatprep.subr.bf16.mxu0 %v8662_v9  ;;  %v9508_v52 = vpack.c.bf16 %v881_v46, %v881_v46  ;;  %v8678_v56 = vpack.c.bf16 %v776_v45, %v775_v43  ;;  %8759 = vset.pattern.permute.xlu0 %v9208_v12  ;;  %v781_v19 = vld [vmem:[%s10871_s4 + $0x10] sm:$0xff]  ;;  %v8791_v22 = vld [vmem:[%s10874_s7 + $0x98] sm:$0xff]   ;;  %v8793_v24 = vld [vmem:[%s10874_s7 + $0xe0] sm:$0xff]  }
  0x26   : > { %v9510_v53 = vpack.c.bf16 %v877_v48, %v877_v48  ;;  %7941 = vmatpush3.bf16.msra.mxu1 %v8776_v44  ;;  %v777_v57 = vmax.f32 %v761_v50, 0.0  ;;  %v778_v58 = vmax.f32 %v762_v51, 0.0  ;;  %v8806_v23 = vld [vmem:[%s10874_s7 + $0x178] sm:$0xff]   ;;  %v8795_v26 = vld [vmem:[%s10874_s7 + $0xa0] sm:$0xff]   ;;  %v8797_v28 = vld [vmem:[%s10874_s7 + $0xe8] sm:$0xff]  }
  0x27   : > { %1046 = vmatprep.mubr.bf16.mxu1 %v9508_v52  ;;  %7970 = vmatprep.subr.bf16.mxu1 %v8778_v47  ;;  %v8810_v27 = vld [vmem:[%s10874_s7 + $0x240] sm:$0xff]   ;;  %v8799_v30 = vld [vmem:[%s10874_s7 + $0xa8] sm:$0xff]   ;;  %v8801_v32 = vld [vmem:[%s10874_s7 + $0xf0] sm:$0xff]  }
  0x28   : > { %8665 = vmatpush3.bf16.msra.mxu0 %v8662_v9  ;;  %v8682_v61 = vpack.c.bf16 %v778_v58, %v777_v57  ;;  %v8796_v9 = vld [vmem:[%s10874_s7 + $0x120] sm:$0xff]   ;;  %v8814_v31 = vld [vmem:[%s10874_s7 + $0x248] sm:$0xff]   ;;  %v8803_v34 = vld [vmem:[%s10874_s7 + $0xb0] sm:$0xff]  }
  0x29   : > { %8667 = vmatprep.subr.bf16.mxu0 %v8666_v25  ;;  %1047 = vmatmul.mubr.bf16.vlgmr.msra.gmra.mrb[0].mxu1 %v9510_v53  ;;  %v8812_v29 = vld [vmem:[%s10874_s7 + $0x200] sm:$0xff]   ;;  %v8816_v33 = vld [vmem:[%s10874_s7 + $0x208] sm:$0xff]   ;;  %v8818_v35 = vld [vmem:[%s10874_s7 + $0x250] sm:$0xff]  }
  0x2a   : > { %7971 = vmatpush3.bf16.msra.mxu1 %v8780_v54  ;;  %1384 = vmatprep.mubr.bf16.mxu1 %v9508_v52  ;;  %v8805_v36 = vld [vmem:[%s10874_s7 + $0xf8] sm:$0xff]   ;;  %v8809_v40 = vld [vmem:[%s10874_s7 + $0x1c0] sm:$0xff]   ;;  %v8813_v44 = vld [vmem:[%s10874_s7 + $0x1c8] sm:$0xff]  }
  0x2b   : > { %7972 = vmatprep.subr.bf16.mxu1 %v8782_v55  ;;  %v8807_v38 = vld [vmem:[%s10874_s7 + $0xb8] sm:$0xff]   ;;  %v8811_v42 = vld [vmem:[%s10874_s7 + $0x180] sm:$0xff]   ;;  %v8815_v45 = vld [vmem:[%s10874_s7 + $0x188] sm:$0xff]  }
  0x2c   : > { %8669 = vmatpush3.bf16.msra.mxu0 %v8666_v25  ;;  %v8808_v25 = vld [vmem:[%s10874_s7 + $0x138] sm:$0xff]   ;;  %v8826_v43 = vld [vmem:[%s10874_s7 + $0x260] sm:$0xff]   ;;  %v8830_v46 = vld [vmem:[%s10874_s7 + $0x268] sm:$0xff]  }
  0x2d   : > { %8671 = vmatprep.subr.bf16.mxu0 %v8670_v37  ;;  %v8822_v39 = vld [vmem:[%s10874_s7 + $0x258] sm:$0xff]   ;;  %v8828_v20 = vld [vmem:[%s10874_s7 + $0x220] sm:$0xff]   ;;  %v8817_v47 = vld [vmem:[%s10874_s7 + $0x1d0] sm:$0xff]  }
  0x2e   : > { %7973 = vmatpush3.bf16.msra.mxu1 %v8784_v59  ;;  %v8824_v41 = vld [vmem:[%s10874_s7 + $0x218] sm:$0xff]   ;;  %v8832_v48 = vld [vmem:[%s10874_s7 + $0x228] sm:$0xff]   ;;  %v8834_v50 = vld [vmem:[%s10874_s7 + $0x270] sm:$0xff]  }
  0x2f   : > { %7974 = vmatprep.subr.bf16.mxu1 %v8786_v60  ;;  %v8821_v51 = vld [vmem:[%s10874_s7 + $0x1d8] sm:$0xff]   ;;  %v8836_v54 = vld [vmem:[%s10874_s7 + $0x230] sm:$0xff]   ;;  %v8825_v57 = vld [vmem:[%s10874_s7 + $0x1e0] sm:$0xff]  }
  0x30   : > { %8673 = vmatpush3.bf16.msra.mxu0 %v8670_v37  ;;  %v8820_v37 = vld [vmem:[%s10874_s7 + $0x210] sm:$0xff]   ;;  %v8823_v55 = vld [vmem:[%s10874_s7 + $0x198] sm:$0xff]   ;;  %v8827_v59 = vld [vmem:[%s10874_s7 + $0x1a0] sm:$0xff]  }
  0x31   : > { %8675 = vmatprep.subr.bf16.mxu0 %v8674_v49  ;;  %v8840_v58 = vld [vmem:[%s10874_s7 + $0x238] sm:$0xff]   ;;  %v8842_v60 = vld [vmem:[%s10874_s7 + $0x340] sm:$0xff]  }
  0x32   : > { %7975 = vmatpush3.bf16.msra.mxu1 %v8788_v62  ;;  %v8844_v62 = vld [vmem:[%s10874_s7 + $0x300] sm:$0xff]  }
  0x33   : > { %7976 = vmatprep.subr.bf16.mxu1 %v8790_v63  ;;  %v8831_v63 = vld [vmem:[%s10874_s7 + $0x1a8] sm:$0xff]  }
  0x34   : > { %8677 = vmatpush3.bf16.msra.mxu0 %v8674_v49  ;;  %v8819_v49 = vld [vmem:[%s10874_s7 + $0x190] sm:$0xff]  }
  0x35   : > { %8679 = vmatprep.subr.bf16.mxu0 %v8678_v56 }
  0x36   : > { %7977 = vmatpush3.bf16.msra.mxu1 %v8792_v4  ;;  %v8848_v4 = vld [vmem:[%s10874_s7 + $0x308] sm:$0xff]  }
  0x37   : > { %7978 = vmatprep.subr.bf16.mxu1 %v8794_v7  ;;  %v8850_v7 = vld [vmem:[%s10874_s7 + $0x350] sm:$0xff]  }
  0x38   : > { %8681 = vmatpush3.bf16.msra.mxu0 %v8678_v56  ;;  %v8838_v56 = vld [vmem:[%s10874_s7 + $0x278] sm:$0xff]  }
  0x39   : > { %8683 = vmatprep.subr.bf16.mxu0 %v8682_v61 }
  0x3a   : > { %7979 = vmatpush3.bf16.msra.mxu1 %v8796_v9  ;;  %v8852_v9 = vld [vmem:[%s10874_s7 + $0x310] sm:$0xff]  }
  0x3b   : > { %7980 = vmatprep.subr.bf16.mxu1 %v8798_v11  ;;  %v8854_v11 = vld [vmem:[%s10874_s7 + $0x358] sm:$0xff]  }
  0x3c   : > { %8685 = vmatpush3.bf16.msra.mxu0 %v8682_v61  ;;  %v8829_v61 = vld [vmem:[%s10874_s7 + $0x1e8] sm:$0xff]  }
  0x3d   : > { %7948 = vmatprep.subr.bf16.mxu0 %v8777_v0  ;;  %v8846_v0 = vld [vmem:[%s10874_s7 + $0x348] sm:$0xff]  }
  0x3e   : > { %7981 = vmatpush3.bf16.msra.mxu1 %v8800_v14  ;;  %v8856_v14 = vld [vmem:[%s10874_s7 + $0x318] sm:$0xff]  }
  0x3f   : > { %8347 = vmatmul.mubr.f32.vlgmr.msra.gmra.mrb[0].mxu0 %v780_v3  ;;  %7982 = vmatprep.subr.bf16.mxu1 %v8802_v16  ;;  %v8833_v3 = vld [vmem:[%s10874_s7 + $0x1f0] sm:$0xff]   ;;  %v8858_v16 = vld [vmem:[%s10874_s7 + $0x360] sm:$0xff]  }
  0x40   : > { %7949 = vmatpush3.bf16.msra.mxu0 %v8779_v6  ;;  %8349 = vmatprep.mubr.f32.mxu0 %v781_v19  ;;  %v8835_v6 = vld [vmem:[%s10874_s7 + $0x1b0] sm:$0xff]   ;;  %v8847_v19 = vld [vmem:[%s10874_s7 + $0x288] sm:$0xff]  }
  0x41   : > { %7950 = vmatprep.subr.bf16.mxu0 %v8781_v8  ;;  %v8837_v8 = vld [vmem:[%s10874_s7 + $0x1f8] sm:$0xff]  }
  0x42   : > { %7983 = vmatpush3.bf16.msra.mxu1 %v8804_v18  ;;  %v8860_v18 = vld [vmem:[%s10874_s7 + $0x320] sm:$0xff]  }
  0x43   : > { %8350 = vmatmul.mubr.f32.gmra.mrb[2].mxu0 %v782_v21  ;;  %7984 = vmatprep.subr.bf16.mxu1 %v8806_v23  ;;  %v8862_v21 = vld [vmem:[%s10874_s7 + $0x368] sm:$0xff]  }
  0x44   : > { %7951 = vmatpush3.bf16.msra.mxu0 %v8783_v10  ;;  %1215 = vmatprep.mubr.bf16.mxu0 %v9508_v52  ;;  %v8839_v10 = vld [vmem:[%s10874_s7 + $0x1b8] sm:$0xff]   ;;  %v8864_v23 = vld [vmem:[%s10874_s7 + $0x328] sm:$0xff]  }
  0x45   : > { %7952 = vmatprep.subr.bf16.mxu0 %v8785_v13  ;;  %v8841_v13 = vld [vmem:[%s10874_s7 + $0x2c0] sm:$0xff]  }
  0x46   : > { %7985 = vmatpush3.bf16.msra.mxu1 %v8808_v25  ;;  %v8866_v25 = vld [vmem:[%s10874_s7 + $0x370] sm:$0xff]  }
  0x47   : > { %8014 = vmatprep.subr.bf16.mxu1 %v8810_v27  ;;  %v8868_v27 = vld [vmem:[%s10874_s7 + $0x330] sm:$0xff]  }
  0x48   : > { %7953 = vmatpush3.bf16.msra.mxu0 %v8787_v15  ;;  %v8843_v15 = vld [vmem:[%s10874_s7 + $0x280] sm:$0xff]  }
  0x49   : > { %7954 = vmatprep.subr.bf16.mxu0 %v8789_v17  ;;  %1385 = vmatmul.mubr.bf16.vlgmr.msra.gmra.mrb[4].mxu1 %v9510_v53  ;;  %v8845_v17 = vld [vmem:[%s10874_s7 + $0x2c8] sm:$0xff]  }
  0x4a   : > { %8015 = vmatpush3.bf16.msra.mxu1 %v8812_v29  ;;  %1722 = vmatprep.mubr.bf16.mxu1 %v9508_v52  ;;  %v8870_v29 = vld [vmem:[%s10874_s7 + $0x378] sm:$0xff]  }
  0x4b   : > { %8016 = vmatprep.subr.bf16.mxu1 %v8814_v31  ;;  %v8872_v31 = vld [vmem:[%s10874_s7 + $0x338] sm:$0xff]  }
  0x4c   : > { %7955 = vmatpush3.bf16.msra.mxu0 %v8791_v22  ;;  %v8849_v22 = vld [vmem:[%s10874_s7 + $0x2d0] sm:$0xff]  }
  0x4d   : > { %7956 = vmatprep.subr.bf16.mxu0 %v8793_v24  ;;  %v8851_v24 = vld [vmem:[%s10874_s7 + $0x290] sm:$0xff]  }
  0x4e   : > { %8017 = vmatpush3.bf16.msra.mxu1 %v8816_v33  ;;  %v8874_v33 = vld [vmem:[%s10874_s7 + $0x440] sm:$0xff]  }
  0x4f   : > { %8018 = vmatprep.subr.bf16.mxu1 %v8818_v35  ;;  %v8876_v35 = vld [vmem:[%s10874_s7 + $0x400] sm:$0xff]  }
  0x50   : > { %7957 = vmatpush3.bf16.msra.mxu0 %v8795_v26  ;;  %v8853_v26 = vld [vmem:[%s10874_s7 + $0x2d8] sm:$0xff]  }
  0x51   : > { %7958 = vmatprep.subr.bf16.mxu0 %v8797_v28  ;;  %v8855_v28 = vld [vmem:[%s10874_s7 + $0x298] sm:$0xff]  }
  0x52   : > { %8019 = vmatpush3.bf16.msra.mxu1 %v8820_v37  ;;  %v8878_v37 = vld [vmem:[%s10874_s7 + $0x448] sm:$0xff]  }
  0x53   : > { %8020 = vmatprep.subr.bf16.mxu1 %v8822_v39  ;;  %v8880_v39 = vld [vmem:[%s10874_s7 + $0x408] sm:$0xff]  }
  0x54   : > { %7959 = vmatpush3.bf16.msra.mxu0 %v8799_v30  ;;  %v8857_v30 = vld [vmem:[%s10874_s7 + $0x2e0] sm:$0xff]  }
  0x55   : > { %7960 = vmatprep.subr.bf16.mxu0 %v8801_v32  ;;  %v8859_v32 = vld [vmem:[%s10874_s7 + $0x2a0] sm:$0xff]  }
  0x56   : > { %8021 = vmatpush3.bf16.msra.mxu1 %v8824_v41  ;;  %v8882_v41 = vld [vmem:[%s10874_s7 + $0x450] sm:$0xff]  }
  0x57   : > { %8022 = vmatprep.subr.bf16.mxu1 %v8826_v43  ;;  %v8884_v43 = vld [vmem:[%s10874_s7 + $0x410] sm:$0xff]  }
  0x58   : > { %7961 = vmatpush3.bf16.msra.mxu0 %v8803_v34  ;;  %v8861_v34 = vld [vmem:[%s10874_s7 + $0x2e8] sm:$0xff]  }
  0x59   : > { %7962 = vmatprep.subr.bf16.mxu0 %v8805_v36  ;;  %v8863_v36 = vld [vmem:[%s10874_s7 + $0x2a8] sm:$0xff]  }
  0x5a   : > { %8023 = vmatpush3.bf16.msra.mxu1 %v8828_v20  ;;  %v8886_v20 = vld [vmem:[%s10874_s7 + $0x458] sm:$0xff]  }
  0x5b   : > { %8024 = vmatprep.subr.bf16.mxu1 %v8830_v46  ;;  %v8888_v46 = vld [vmem:[%s10874_s7 + $0x418] sm:$0xff]  }
  0x5c   : > { %7963 = vmatpush3.bf16.msra.mxu0 %v8807_v38  ;;  %v8865_v38 = vld [vmem:[%s10874_s7 + $0x2f0] sm:$0xff]  }
  0x5d   : > { %7992 = vmatprep.subr.bf16.mxu0 %v8809_v40  ;;  %v8867_v40 = vld [vmem:[%s10874_s7 + $0x2b0] sm:$0xff]  }
  0x5e   : > { %8025 = vmatpush3.bf16.msra.mxu1 %v8832_v48  ;;  %v8890_v48 = vld [vmem:[%s10874_s7 + $0x460] sm:$0xff]  }
  0x5f   : > { %1216 = vmatmul.mubr.bf16.vlgmr.msra.gmra.mrb[4].mxu0 %v9510_v53  ;;  %8026 = vmatprep.subr.bf16.mxu1 %v8834_v50  ;;  %v8892_v50 = vld [vmem:[%s10874_s7 + $0x420] sm:$0xff]  }
  0x60   : > { %7993 = vmatpush3.bf16.msra.mxu0 %v8811_v42  ;;  %1553 = vmatprep.mubr.bf16.mxu0 %v9508_v52  ;;  %v8869_v42 = vld [vmem:[%s10874_s7 + $0x2f8] sm:$0xff]  }
  0x61   : > { %7994 = vmatprep.subr.bf16.mxu0 %v8813_v44  ;;  %v8871_v44 = vld [vmem:[%s10874_s7 + $0x2b8] sm:$0xff]  }
  0x62   : > { %8027 = vmatpush3.bf16.msra.mxu1 %v8836_v54  ;;  %v8894_v54 = vld [vmem:[%s10874_s7 + $0x468] sm:$0xff]  }
  0x63   : > { %8028 = vmatprep.subr.bf16.mxu1 %v8838_v56  ;;  %v8896_v56 = vld [vmem:[%s10874_s7 + $0x428] sm:$0xff]  }
  0x64   : > { %7995 = vmatpush3.bf16.msra.mxu0 %v8815_v45  ;;  %v8873_v45 = vld [vmem:[%s10874_s7 + $0x3c0] sm:$0xff]  }
  0x65   : > { %7996 = vmatprep.subr.bf16.mxu0 %v8817_v47  ;;  %v8875_v47 = vld [vmem:[%s10874_s7 + $0x380] sm:$0xff]  }
  0x66   : > { %8029 = vmatpush3.bf16.msra.mxu1 %v8840_v58  ;;  %v8885_v58 = vld [vmem:[%s10874_s7 + $0x3d8] sm:$0xff]  }
  0x67   : > { %8058 = vmatprep.subr.bf16.mxu1 %v8842_v60  ;;  %v8887_v60 = vld [vmem:[%s10874_s7 + $0x398] sm:$0xff]  }
  0x68   : > { %7997 = vmatpush3.bf16.msra.mxu0 %v8819_v49  ;;  %v8877_v49 = vld [vmem:[%s10874_s7 + $0x3c8] sm:$0xff]  }
  0x69   : > { %7998 = vmatprep.subr.bf16.mxu0 %v8821_v51  ;;  %1723 = vmatmul.mubr.bf16.vlgmr.msra.gmra.mrb[8].mxu1 %v9510_v53  ;;  %v8879_v51 = vld [vmem:[%s10874_s7 + $0x388] sm:$0xff]  }
  0x6a   : > { %8059 = vmatpush3.bf16.msra.mxu1 %v8844_v62  ;;  %2060 = vmatprep.mubr.bf16.mxu1 %v9508_v52  ;;  %v8889_v62 = vld [vmem:[%s10874_s7 + $0x3e0] sm:$0xff]  }
  0x6b   : > { %8060 = vmatprep.subr.bf16.mxu1 %v8846_v0  ;;  %v676_v0 = vld [vmem:[%s10875_s8 + $0x10] sm:$0xff] }
  0x6c   : > { %7999 = vmatpush3.bf16.msra.mxu0 %v8823_v55  ;;  %v8881_v55 = vld [vmem:[%s10874_s7 + $0x3d0] sm:$0xff]   ;;  %2454 = vperm.xlu1 %8760, %v676_v0  }
  0x6d   : > { %8000 = vmatprep.subr.bf16.mxu0 %v8825_v57  ;;  %v8883_v57 = vld [vmem:[%s10874_s7 + $0x390] sm:$0xff]  }
  0x6e   : > { %8061 = vmatpush3.bf16.msra.mxu1 %v8848_v4  ;;  %v8891_v4 = vld [vmem:[%s10874_s7 + $0x3a0] sm:$0xff]  }
  0x6f   : > { %8062 = vmatprep.subr.bf16.mxu1 %v8850_v7  ;;  %v677_v7 = vld [vmem:[%s10875_s8 + $0x18] sm:$0xff] }
  0x70   : > { %8001 = vmatpush3.bf16.msra.mxu0 %v8827_v59  ;;  %v8900_v59 = vld [vmem:[%s10874_s7 + $0x430] sm:$0xff]   ;;  %2459 = vperm.xlu1 %8760, %v677_v7  }
  0x71   : > { %8002 = vmatprep.subr.bf16.mxu0 %v8829_v61  ;;  %v8902_v61 = vld [vmem:[%s10874_s7 + $0x478] sm:$0xff]  }
  0x72   : > { %8063 = vmatpush3.bf16.msra.mxu1 %v8852_v9  ;;  %v8895_v9 = vld [vmem:[%s10874_s7 + $0x3a8] sm:$0xff]  }
  0x73   : > { %8064 = vmatprep.subr.bf16.mxu1 %v8854_v11  ;;  %v8899_v11 = vld [vmem:[%s10874_s7 + $0x3b0] sm:$0xff]  }
  0x74   : > { %8003 = vmatpush3.bf16.msra.mxu0 %v8831_v63  ;;  %v8904_v63 = vld [vmem:[%s10874_s7 + $0x438] sm:$0xff]  }
  0x75   : > { %8004 = vmatprep.subr.bf16.mxu0 %v8833_v3  ;;  %v674_v3 = vld [vmem:[%s10875_s8] sm:$0xff] }
  0x76   : > { %8065 = vmatpush3.bf16.msra.mxu1 %v8856_v14  ;;  %2444 = vperm.xlu0 %8759, %v674_v3   ;;  %v8903_v14 = vld [vmem:[%s10874_s7 + $0x3b8] sm:$0xff]  }
  0x77   : > { %8066 = vmatprep.subr.bf16.mxu1 %v8858_v16 }
  0x78   : > { %8005 = vmatpush3.bf16.msra.mxu0 %v8835_v6  ;;  %v8893_v6 = vld [vmem:[%s10874_s7 + $0x3e8] sm:$0xff]  }
  0x79   : > { %8006 = vmatprep.subr.bf16.mxu0 %v8837_v8  ;;  %v675_v8 = vld [vmem:[%s10875_s8 + $0x8] sm:$0xff] }
  0x7a   : > { %8067 = vmatpush3.bf16.msra.mxu1 %v8860_v18  ;;  %2449 = vperm.xlu0 %8759, %v675_v8  }
  0x7b   : > { %8068 = vmatprep.subr.bf16.mxu1 %v8862_v21  ;;  %v784_v21 = vld [vmem:[%s10872_s5 + $0x8] sm:$0xff] }
  0x7c   : > { %8007 = vmatpush3.bf16.msra.mxu0 %v8839_v10  ;;  %v8897_v10 = vld [vmem:[%s10874_s7 + $0x3f0] sm:$0xff]  }
  0x7d   : > { %8036 = vmatprep.subr.bf16.mxu0 %v8841_v13  ;;  %v8901_v13 = vld [vmem:[%s10874_s7 + $0x3f8] sm:$0xff]  }
  0x7e   : > { %8069 = vmatpush3.bf16.msra.mxu1 %v8864_v23 }
  0x7f   : > { %1554 = vmatmul.mubr.bf16.vlgmr.msra.gmra.mrb[8].mxu0 %v9510_v53  ;;  %8070 = vmatprep.subr.bf16.mxu1 %v8866_v25 }
  0x80   : > { %8037 = vmatpush3.bf16.msra.mxu0 %v8843_v15  ;;  %1891 = vmatprep.mubr.bf16.mxu0 %v9508_v52 }
  0x81   : > { %8038 = vmatprep.subr.bf16.mxu0 %v8845_v17 }
  0x82   : > { %8071 = vmatpush3.bf16.msra.mxu1 %v8868_v27  ;;  %v785_v27 = vld [vmem:[%s10872_s5 + $0x10] sm:$0xff] }
  0x83   : > { %8072 = vmatprep.subr.bf16.mxu1 %v8870_v29 }
  0x84   : > { %8039 = vmatpush3.bf16.msra.mxu0 %v8847_v19 }
  0x85   : > { %8040 = vmatprep.subr.bf16.mxu0 %v8849_v22  ;;  %v783_v22 = vld [vmem:[%s10872_s5] sm:$0xff] }
  0x86   : > { %8073 = vmatpush3.bf16.msra.mxu1 %v8872_v31 }
  0x87   : > { %8102 = vmatprep.subr.bf16.mxu1 %v8874_v33  ;;  %v678_v33 = vld [vmem:[%s10878_s11] sm:$0xff] }
  0x88   : > { %8041 = vmatpush3.bf16.msra.mxu0 %v8851_v24 }
  0x89   : > { %8042 = vmatprep.subr.bf16.mxu0 %v8853_v26  ;;  %2061 = vmatmul.mubr.bf16.vlgmr.msra.gmra.mrb[12].mxu1 %v9510_v53 }
  0x8a   : > { %8103 = vmatpush3.bf16.msra.mxu1 %v8876_v35  ;;  %2398 = vmatprep.mubr.bf16.mxu1 %v9508_v52 }
  0x8b   : > { %8104 = vmatprep.subr.bf16.mxu1 %v8878_v37 }
  0x8c   : > { %8043 = vmatpush3.bf16.msra.mxu0 %v8855_v28 }
  0x8d   : > { %8044 = vmatprep.subr.bf16.mxu0 %v8857_v30 }
  0x8e   : > { %8105 = vmatpush3.bf16.msra.mxu1 %v8880_v39 }
  0x8f   : > { %8106 = vmatprep.subr.bf16.mxu1 %v8882_v41 }
  0x90   : > { %8045 = vmatpush3.bf16.msra.mxu0 %v8859_v32  ;;  %v8905_v32 = vld [vmem:[%s10873_s6] sm:$0xff]  }
  0x91   : > { %8046 = vmatprep.subr.bf16.mxu0 %v8861_v34  ;;  %v679_v34 = vld [vmem:[%s10878_s11 + $0x8] sm:$0xff] }
  0x92   : > { %8107 = vmatpush3.bf16.msra.mxu1 %v8884_v43  ;;  %v682_v43 = vld [vmem:[%s10878_s11 + $0x20] sm:$0xff] }
  0x93   : > { %8108 = vmatprep.subr.bf16.mxu1 %v8886_v20  ;;  %v684_v20 = vld [vmem:[%s10878_s11 + $0x30] sm:$0xff] }
  0x94   : > { %8047 = vmatpush3.bf16.msra.mxu0 %v8863_v36  ;;  %v681_v36 = vld [vmem:[%s10878_s11 + $0x18] sm:$0xff] }
  0x95   : > { %8048 = vmatprep.subr.bf16.mxu0 %v8865_v38  ;;  %v680_v38 = vld [vmem:[%s10878_s11 + $0x10] sm:$0xff] }
  0x96   : > { %8109 = vmatpush3.bf16.msra.mxu1 %v8888_v46  ;;  %v686_v46 = vld [vmem:[%s10881_s14] sm:$0xff] }
  0x97   : > { %8110 = vmatprep.subr.bf16.mxu1 %v8890_v48 }
  0x98   : > { %8049 = vmatpush3.bf16.msra.mxu0 %v8867_v40 }
  0x99   : > { %8050 = vmatprep.subr.bf16.mxu0 %v8869_v42  ;;  %v683_v42 = vld [vmem:[%s10878_s11 + $0x28] sm:$0xff] }
  0x9a   : > { %8111 = vmatpush3.bf16.msra.mxu1 %v8892_v50 }
  0x9b   : > { %8112 = vmatprep.subr.bf16.mxu1 %v8894_v54 }
  0x9c   : > { %8051 = vmatpush3.bf16.msra.mxu0 %v8871_v44  ;;  %v685_v44 = vld [vmem:[%s10878_s11 + $0x38] sm:$0xff] }
  0x9d   : > { %8080 = vmatprep.subr.bf16.mxu0 %v8873_v45  ;;  %v687_v45 = vld [vmem:[%s10881_s14 + $0x8] sm:$0xff] }
  0x9e   : > { %8113 = vmatpush3.bf16.msra.mxu1 %v8896_v56  ;;  %v688_v56 = vld [vmem:[%s10881_s14 + $0x10] sm:$0xff] }
  0x9f   : > { %1892 = vmatmul.mubr.bf16.vlgmr.msra.gmra.mrb[12].mxu0 %v9510_v53 }
  0xa0   : > { %8081 = vmatpush3.bf16.msra.mxu0 %v8875_v47  ;;  %2229 = vmatprep.mubr.bf16.mxu0 %v9508_v52  ;;  %v8898_v52 = vld [vmem:[%s10874_s7 + $0x470] sm:$0xff]  }
  0xa1   : > { %8082 = vmatprep.subr.bf16.mxu0 %v8877_v49  ;;  %8114 = vmatprep.subr.bf16.mxu1 %v8898_v52  ;;  %v8907_v52 = vld [vmem:[%s10877_s10] sm:$0xff]  }
  0xa2   : > { %8115 = vmatpush3.bf16.msra.mxu1 %v8900_v59 }
  0xa3   : > { %8116 = vmatprep.subr.bf16.mxu1 %v8902_v61 }
  0xa4   : > { %8083 = vmatpush3.bf16.msra.mxu0 %v8879_v51  ;;  %v689_v51 = vld [vmem:[%s10881_s14 + $0x18] sm:$0xff] }
  0xa5   : > { %8084 = vmatprep.subr.bf16.mxu0 %v8881_v55 }
  0xa6   : > { %8117 = vmatpush3.bf16.msra.mxu1 %v8904_v63 }
  0xa7   : > { %8358 = vmatprep.subr.bf16.mxu1 %v8907_v52 }
  0xa8   : > { %8085 = vmatpush3.bf16.msra.mxu0 %v8883_v57 }
  0xa9   : > { %8086 = vmatprep.subr.bf16.mxu0 %v8885_v58  ;;  %2399 = vmatmul.mubr.bf16.vlgmr.msra.gmra.mrb[16].mxu1 %v9510_v53 }
  0xaa   : > { %8359 = vmatpush3.bf16.msra.mxu1 %v8907_v52 }
  0xac   : > { %8087 = vmatpush3.bf16.msra.mxu0 %v8887_v60  ;;  %v690_v60 = vld [vmem:[#allocation2] sm:$0x1] }
  0xad   : > { %8088 = vmatprep.subr.bf16.mxu0 %v8889_v62 }
  0xb0   : > { %8089 = vmatpush3.bf16.msra.mxu0 %v8891_v4 }
  0xb1   : > { %8090 = vmatprep.subr.bf16.mxu0 %v8893_v6 }
  0xb4   : > { %8091 = vmatpush3.bf16.msra.mxu0 %v8895_v9 }
  0xb5   : > { %8092 = vmatprep.subr.bf16.mxu0 %v8897_v10 }
  0xb8   : > { %8093 = vmatpush3.bf16.msra.mxu0 %v8899_v11 }
  0xb9   : > { %8094 = vmatprep.subr.bf16.mxu0 %v8901_v13 }
  0xbc   : > { %8095 = vmatpush3.bf16.msra.mxu0 %v8903_v14 }
  0xbf   : > { %2230 = vmatmul.mubr.bf16.vlgmr.msra.gmra.mrb[16].mxu0 %v9510_v53  ;;  %v786_v53 = vld [vmem:[%s10872_s5 + $0x18] sm:$0xff] }
  0xc0   : > { %8354 = vmatprep.mubr.msk.bf16.mxu0 %vm2472_vm0, %v8905_v32 }
  0xf5   : > { %v2445_v52 = vpop.permute.xlu0 %2444 }
  0xfc   : > { %v7942_v15 = vpop.f32.mrb[0].mxu1 }
  0xfd   : > { %v7943_v16 = vpop.f32.mrb[1].mxu1 }
  0xfe   : > { %v7944_v17 = vadd.f32 %v7943_v16, %v7942_v15  ;;  %v7945_v18 = vpop.f32.mrb[2].mxu1 }
  0xff   : > { %v7946_v19 = vpop.f32.mrb[3].mxu1 }
 0x112   : > { %v8348_v23 = vpop.f32.mrb[0].mxu0 }
 0x113   : > { %v859_v24 = vadd.f32 %v8348_v23, %v784_v21  ;;  %v853_v25 = vpop.f32.mrb[1].mxu0 }
 0x114   : > { %v854_v26 = vadd.f32 %v853_v25, %v783_v22 }
 0x115   : > { %2544 = vperm.xlu1 %8760, %v859_v24  }
 0x116   : > { %2539 = vperm.xlu0 %8759, %v854_v26   ;;  %v8351_v28 = vpop.f32.mrb[2].mxu0 }
 0x117   : > { %v869_v29 = vadd.f32 %v8351_v28, %v786_v53  ;;  %v863_v30 = vpop.f32.mrb[3].mxu0 }
 0x118   : > { %v864_v31 = vadd.f32 %v863_v30, %v785_v27 }
 0x119   : > { %2554 = vperm.xlu1 %8760, %v869_v29  }
 0x11a   : > { %2549 = vperm.xlu0 %8759, %v864_v31  }
 0x11c   : > { %v7986_v35 = vpop.f32.mrb[4].mxu1 }
 0x11d   : > { %3332 = vperm.xlu1 %8760, %v679_v34   ;;  %v7987_v37 = vpop.f32.mrb[5].mxu1 }
 0x11e   : > { %3327 = vperm.xlu0 %8759, %v678_v33   ;;  %v7988_v39 = vadd.f32 %v7987_v37, %v7986_v35  ;;  %v7989_v40 = vpop.f32.mrb[6].mxu1 }
 0x11f   : > { %v7990_v41 = vpop.f32.mrb[7].mxu1 }
 0x120   : > { %v2410_v54 = vrot.slane %v7988_v39, 6  ;;  %v9209_v39 = vmov 65535  }
 0x121   : > { %3342 = vperm.xlu1 %8760, %v681_v36   ;;  %v2479_v40 = vsel %vm2433_vm4, 4294967295, %v9209_v39  ;;  %v8934_v39 = vld [vmem:[%s10877_s10 + $0xe8] sm:$0xff]  }
 0x122   : > { %3337 = vperm.xlu0 %8759, %v680_v38  }
 0x125   : > { %3352 = vperm.xlu1 %8760, %v683_v42  }
 0x126   : > { %3347 = vperm.xlu0 %8759, %v682_v43   ;;  %v2480_v43 = vsel %vm2435_vm5, %v2479_v40, 0  ;;  %v8935_v40 = vld [vmem:[%s10877_s10 + $0xd0] sm:$0xff]  }
 0x129   : > { %3362 = vperm.xlu1 %8760, %v685_v44  }
 0x12a   : > { %3357 = vperm.xlu0 %8759, %v684_v20  }
 0x12d   : > { %5244 = vperm.xlu1 %8760, %v687_v45   ;;  %v8908_v45 = vld [vmem:[%s10877_s10 + $0x20] sm:$0xff]  }
 0x12e   : > { %5239 = vperm.xlu0 %8759, %v686_v46   ;;  %v8906_v46 = vld [vmem:[%s10873_s6 + $0x8] sm:$0xff]  }
 0x131   : > { %5254 = vperm.xlu1 %8760, %v689_v51   ;;  %v8913_v51 = vld [vmem:[%s10877_s10 + $0x18] sm:$0xff]  }
 0x132   : > { %v7964_v47 = vpop.f32.mrb[4].mxu0  ;;  %5249 = vperm.xlu0 %8759, %v688_v56   ;;  %v8916_v56 = vld [vmem:[%s10877_s10 + $0x60] sm:$0xff]  }
 0x133   : > { %v7965_v48 = vpop.f32.mrb[5].mxu0 }
 0x134   : > { %v7966_v49 = vadd.f32 %v7965_v48, %v7964_v47  ;;  %v7967_v50 = vpop.f32.mrb[6].mxu0  ;;  %v8909_v47 = vld [vmem:[%s10877_s10 + $0x8] sm:$0xff]  }
 0x135   : > { %v7968_v55 = vpop.f32.mrb[7].mxu0  ;;  %v8910_v48 = vld [vmem:[%s10877_s10 + $0x28] sm:$0xff]   ;;  %8360 = vmatprep.subr.bf16.mxu1 %v8909_v47  ;;  %v8912_v50 = vld [vmem:[%s10877_s10 + $0x30] sm:$0xff]  }
 0x136   : > { %v2407_v57 = vrot.slane %v7966_v49, 7  ;;  %6857 = vperm.xlu0 %8759, %v690_v60   ;;  %8361 = vmatpush3.bf16.msra.mxu1 %v8909_v47  ;;  %v8911_v49 = vld [vmem:[%s10877_s10 + $0x10] sm:$0xff]   ;;  %v8915_v55 = vld [vmem:[%s10877_s10 + $0x40] sm:$0xff]  }
 0x137   : > { %8362 = vmatprep.subr.bf16.mxu1 %v8911_v49  ;;  %v8945_v47 = vld [vmem:[%s10876_s9 + $0x4] ss:$12 sps:$4 sm:$0xff]  }
 0x138   : > { %v2428_v58 = vsel %vm2427_vm1, %v7944_v17, %v2407_v57  ;;  %v2455_v57 = vpop.permute.xlu1 %2454 }
 0x139   : > { %v2430_v59 = vsel %vm2429_vm2, %v2428_v58, %v2410_v54  ;;  %v8914_v54 = vld [vmem:[%s10877_s10 + $0x38] sm:$0xff]  }
 0x13a   : > { %8363 = vmatpush3.bf16.msra.mxu1 %v8911_v49 }
 0x13b   : > { %8364 = vmatprep.subr.bf16.mxu1 %v8913_v51 }
 0x13c   : > { %v8030_v61 = vpop.f32.mrb[8].mxu1  ;;  %v2460_v58 = vpop.permute.xlu1 %2459 }
 0x13d   : > { %v8031_v62 = vpop.f32.mrb[9].mxu1 }
 0x13e   : > { %v8032_v63 = vadd.f32 %v8031_v62, %v8030_v61  ;;  %v8033_v0 = vpop.f32.mrb[10].mxu1  ;;  %8365 = vmatpush3.bf16.msra.mxu1 %v8913_v51 }
 0x13f   : > { %v8034_v3 = vpop.f32.mrb[11].mxu1  ;;  %8382 = vmatprep.subr.bf16.mxu1 %v8915_v55 }
 0x140   : > { %v2416_v9 = vrot.slane %v8032_v63, 4 }
 0x152   : > { %v8008_v4 = vpop.f32.mrb[8].mxu0 }
 0x153   : > { %v8009_v6 = vpop.f32.mrb[9].mxu0 }
 0x154   : > { %v8010_v7 = vadd.f32 %v8009_v6, %v8008_v4  ;;  %v8011_v8 = vpop.f32.mrb[10].mxu0 }
 0x155   : > { %v8012_v10 = vpop.f32.mrb[11].mxu0 }
 0x156   : > { %v2413_v11 = vrot.slane %v8010_v7, 5 }
 0x158   : > { %v2432_v13 = vsel %vm2431_vm3, %v2430_v59, %v2413_v11  ;;  %v2450_v59 = vpop.permute.xlu0 %2449 }
 0x159   : > { %v2434_v14 = vsel %vm2433_vm4, %v2432_v13, %v2416_v9 }
 0x15c   : > { %v8074_v15 = vpop.f32.mrb[12].mxu1 }
 0x15d   : > { %v8075_v16 = vpop.f32.mrb[13].mxu1 }
 0x15e   : > { %v8076_v17 = vadd.f32 %v8075_v16, %v8074_v15  ;;  %v8077_v18 = vpop.f32.mrb[14].mxu1 }
 0x15f   : > { %v8078_v19 = vpop.f32.mrb[15].mxu1 }
 0x160   : > { %v2422_v25 = vrot.slane %v8076_v17, 2 }
 0x172   : > { %v8052_v21 = vpop.f32.mrb[12].mxu0 }
 0x173   : > { %v8053_v22 = vpop.f32.mrb[13].mxu0 }
 0x174   : > { %v8054_v23 = vadd.f32 %v8053_v22, %v8052_v21  ;;  %v8055_v24 = vpop.f32.mrb[14].mxu0 }
 0x175   : > { %v8056_v26 = vpop.f32.mrb[15].mxu0  ;;  %v8918_v24 = vld [vmem:[%s10877_s10 + $0x68] sm:$0xff]  }
 0x176   : > { %v2419_v53 = vrot.slane %v8054_v23, 3  ;;  %v8917_v23 = vld [vmem:[%s10877_s10 + $0x48] sm:$0xff]   ;;  %v8920_v26 = vld [vmem:[%s10877_s10 + $0x70] sm:$0xff]  }
 0x178   : > { %v2436_v27 = vsel %vm2435_vm5, %v2434_v14, %v2419_v53  ;;  %v8921_v53 = vld [vmem:[%s10877_s10 + $0x58] sm:$0xff]  }
 0x179   : > { %v2438_v28 = vsel %vm2437_vm6, %v2436_v27, %v2422_v25  ;;  %v8919_v25 = vld [vmem:[%s10877_s10 + $0x50] sm:$0xff]   ;;  %v8922_v27 = vld [vmem:[%s10877_s10 + $0x78] sm:$0xff]  }
 0x17c   : > { %v8118_v29 = vpop.f32.mrb[16].mxu1 }
 0x17d   : > { %v8119_v30 = vpop.f32.mrb[17].mxu1 }
 0x17e   : > { %v8120_v31 = vadd.f32 %v8119_v30, %v8118_v29  ;;  %v8121_v32 = vpop.f32.mrb[18].mxu1  ;;  %v8924_v29 = vld [vmem:[%s10877_s10 + $0xa0] sm:$0xff]   ;;  %v8925_v30 = vld [vmem:[%s10877_s10 + $0x88] sm:$0xff]  }
 0x17f   : > { %v8122_v33 = vpop.f32.mrb[19].mxu1  ;;  %v8927_v32 = vld [vmem:[%s10877_s10 + $0x90] sm:$0xff]  }
 0x180   : > { %v8928_v33 = vld [vmem:[%s10877_s10 + $0xb0] sm:$0xff]  }
 0x192   : > { %v8096_v34 = vpop.f32.mrb[16].mxu0 }
 0x193   : > { %v8097_v35 = vpop.f32.mrb[17].mxu0 }
 0x194   : > { %v8098_v36 = vadd.f32 %v8097_v35, %v8096_v34  ;;  %v8099_v37 = vpop.f32.mrb[18].mxu0  ;;  %v2545_v63 = vpop.permute.xlu1 %2544  ;;  %v8929_v34 = vld [vmem:[%s10877_s10 + $0x98] sm:$0xff]  }
 0x195   : > { %v8100_v38 = vpop.f32.mrb[19].mxu0  ;;  %v2540_v7 = vpop.permute.xlu0 %2539  ;;  %v8930_v35 = vld [vmem:[%s10877_s10 + $0xb8] sm:$0xff]   ;;  %v8932_v37 = vld [vmem:[%s10877_s10 + $0xe0] sm:$0xff]  }
 0x196   : > { %v2425_v41 = vrot.slane %v8098_v36, 1  ;;  %v8931_v36 = vld [vmem:[%s10877_s10 + $0xc0] sm:$0xff]   ;;  %v8933_v38 = vld [vmem:[%s10877_s10 + $0xc8] sm:$0xff]  }
 0x198   : > { %v2440_v42 = vsel %vm2439_vm7, %v2438_v28, %v2425_v41  ;;  %v2555_v13 = vpop.permute.xlu1 %2554  ;;  %v8923_v28 = vld [vmem:[%s10877_s10 + $0x80] sm:$0xff]   ;;  %v8936_v41 = vld [vmem:[%s10877_s10 + $0xf0] sm:$0xff]  }
 0x199   : > { %v2441_v44 = vpack.c.bf16 %v8120_v31, %v2440_v42  ;;  %v2550_v16 = vpop.permute.xlu0 %2549  ;;  %v8926_v31 = vld [vmem:[%s10877_s10 + $0xa8] sm:$0xff]   ;;  %v8937_v42 = vld [vmem:[%s10877_s10 + $0xd8] sm:$0xff]  }
 0x19b   : > { %v2482_v20 = vand.u32 %v2480_v43, %v2441_v44  ;;  %v8938_v43 = vld [vmem:[%s10877_s10 + $0xf8] sm:$0xff]   ;;  %v8939_v44 = vld [vmem:[%s10877_s10 + $0x100] sm:$0xff]  }
 0x19d   : > { %8352 = vmatprep.subr.bf16.mxu0 %v2482_v20 }
 0x19e   : > { %8353 = vmatpush3.bf16.msra.mxu0 %v2482_v20  ;;  %v8940_v20 = vld [vmem:[%s10877_s10 + $0x108] sm:$0xff]  }
 0x19f   : > { %8370 = vmatprep.subr.bf16.mxu0 %v8908_v45 }
 0x1a1   : > { %8355 = vmatmul.mubr.msk.bf16.vlgmr.msra.gmra.mrb[20].mxu0 %vm2472_vm0, %v8906_v46  ;;  %v8942_v46 = vld [vmem:[%s10877_s10 + $0x118] sm:$0xff]  }
 0x1a2   : > { %8371 = vmatpush3.bf16.msra.mxu0 %v8908_v45  ;;  %v8941_v45 = vld [vmem:[%s10877_s10 + $0x110] sm:$0xff]  }
 0x1a3   : > { %8372 = vmatprep.subr.bf16.mxu0 %v8910_v48 }
 0x1a6   : > { %8373 = vmatpush3.bf16.msra.mxu0 %v8910_v48  ;;  %v8948_v48 = vld [vmem:[%s10876_s9 + $0x8] ss:$12 sps:$4 sm:$0xff]  }
 0x1a7   : > { %8374 = vmatprep.subr.bf16.mxu0 %v8912_v50 }
 0x1aa   : > { %8375 = vmatpush3.bf16.msra.mxu0 %v8912_v50 }
 0x1ab   : > { %8376 = vmatprep.subr.bf16.mxu0 %v8914_v54 }
 0x1ae   : > { %8377 = vmatpush3.bf16.msra.mxu0 %v8914_v54 }
 0x1af   : > { %8394 = vmatprep.subr.bf16.mxu0 %v8916_v56 }
 0x274   : > { %v8356_v60 = vpop.f32.mrb[20].mxu0 }
 0x275   : > { %v2527_v61 = vadd.f32 %v8356_v60, %v2455_v57  ;;  %v2518_v62 = vpop.f32.mrb[21].mxu0 }
 0x276   : > { %v2519_v0 = vadd.f32 %v2518_v62, %v2445_v52  ;;  %v8357_v3 = vpop.f32.mrb[22].mxu0 }
 0x277   : > { %v2530_v4 = vadd.f32 %v8357_v3, %v2460_v58  ;;  %v2521_v6 = vpop.f32.mrb[23].mxu0  ;;  %v2535_v10 = vmax.f32 %v2527_v61, 0.0 }
 0x278   : > { %v2533_v8 = vmax.f32 %v2519_v0, 0.0  ;;  %v2522_v9 = vadd.f32 %v2521_v6, %v2450_v59 }
 0x279   : > { %v2536_v11 = vmax.f32 %v2530_v4, 0.0  ;;  %v10030_v19 = vadd.f32 %v2550_v16, %v2535_v10 }
 0x27a   : > { %v2534_v14 = vmax.f32 %v2522_v9, 0.0  ;;  %v10026_v17 = vadd.f32 %v2540_v7, %v2533_v8 }
 0x27b   : > { %v10024_v15 = vadd.f32 %v2555_v13, %v2536_v11 }
 0x27c   : > { %v10028_v18 = vadd.f32 %v2545_v63, %v2534_v14 }
 0x27d   : > { %v10038_v22 = vpack.c.bf16 %v10024_v15, %v10030_v19 }
 0x27e   : > { %v10034_v21 = vpack.c.bf16 %v10028_v18, %v10026_v17 }
 0x280   : > { %8366 = vmatprep.mubr.msk.bf16.mxu1 %vm2595_vm8, %v10034_v21  ;;  %8378 = vmatprep.mubr.msk.bf16.mxu0 %vm2595_vm8, %v10034_v21 }
 0x281   : > { %8367 = vmatmul.mubr.msk.bf16.vlgmr.msra.gmra.mrb[20].mxu1 %vm2595_vm8, %v10038_v22  ;;  %8379 = vmatmul.mubr.msk.bf16.vlgmr.msra.gmra.mrb[24].mxu0 %vm2595_vm8, %v10038_v22 }
 0x282   : > { %8383 = vmatpush3.bf16.msra.mxu1 %v8915_v55  ;;  %8395 = vmatpush3.bf16.msra.mxu0 %v8916_v56 }
 0x283   : > { %8390 = vmatprep.mubr.msk.bf16.mxu1 %vm2595_vm8, %v10034_v21  ;;  %8402 = vmatprep.mubr.msk.bf16.mxu0 %vm2595_vm8, %v10034_v21 }
 0x284   : > { %8384 = vmatprep.subr.bf16.mxu1 %v8917_v23  ;;  %8396 = vmatprep.subr.bf16.mxu0 %v8918_v24 }
 0x286   : > { %8385 = vmatpush3.bf16.msra.mxu1 %v8917_v23  ;;  %8397 = vmatpush3.bf16.msra.mxu0 %v8918_v24 }
 0x287   : > { %8386 = vmatprep.subr.bf16.mxu1 %v8919_v25  ;;  %8398 = vmatprep.subr.bf16.mxu0 %v8920_v26 }
 0x28a   : > { %8387 = vmatpush3.bf16.msra.mxu1 %v8919_v25  ;;  %8399 = vmatpush3.bf16.msra.mxu0 %v8920_v26 }
 0x28b   : > { %8388 = vmatprep.subr.bf16.mxu1 %v8921_v53  ;;  %8400 = vmatprep.subr.bf16.mxu0 %v8922_v27 }
 0x28e   : > { %8389 = vmatpush3.bf16.msra.mxu1 %v8921_v53  ;;  %8401 = vmatpush3.bf16.msra.mxu0 %v8922_v27 }
 0x28f   : > { %8406 = vmatprep.subr.bf16.mxu1 %v8923_v28  ;;  %8418 = vmatprep.subr.bf16.mxu0 %v8924_v29 }
 0x291   : > { %8391 = vmatmul.mubr.msk.bf16.vlgmr.msra.gmra.mrb[24].mxu1 %vm2595_vm8, %v10038_v22  ;;  %8403 = vmatmul.mubr.msk.bf16.vlgmr.msra.gmra.mrb[28].mxu0 %vm2595_vm8, %v10038_v22 }
 0x292   : > { %8407 = vmatpush3.bf16.msra.mxu1 %v8923_v28  ;;  %8414 = vmatprep.mubr.msk.bf16.mxu1 %vm2595_vm8, %v10034_v21 }
 0x293   : > { %8419 = vmatpush3.bf16.msra.mxu0 %v8924_v29  ;;  %8426 = vmatprep.mubr.msk.bf16.mxu0 %vm2595_vm8, %v10034_v21 }
 0x294   : > { %8408 = vmatprep.subr.bf16.mxu1 %v8925_v30  ;;  %8420 = vmatprep.subr.bf16.mxu0 %v8926_v31 }
 0x296   : > { %8409 = vmatpush3.bf16.msra.mxu1 %v8925_v30 }
 0x297   : > { %8421 = vmatpush3.bf16.msra.mxu0 %v8926_v31  ;;  %8410 = vmatprep.subr.bf16.mxu1 %v8927_v32 }
 0x298   : > { %8422 = vmatprep.subr.bf16.mxu0 %v8928_v33 }
 0x29a   : > { %8411 = vmatpush3.bf16.msra.mxu1 %v8927_v32 }
 0x29b   : > { %8423 = vmatpush3.bf16.msra.mxu0 %v8928_v33  ;;  %8412 = vmatprep.subr.bf16.mxu1 %v8929_v34 }
 0x29c   : > { %8424 = vmatprep.subr.bf16.mxu0 %v8930_v35 }
 0x29e   : > { %8413 = vmatpush3.bf16.msra.mxu1 %v8929_v34 }
 0x29f   : > { %8425 = vmatpush3.bf16.msra.mxu0 %v8930_v35  ;;  %8430 = vmatprep.subr.bf16.mxu1 %v8931_v36 }
 0x2a0   : > { %8442 = vmatprep.subr.bf16.mxu0 %v8932_v37 }
 0x2a1   : > { %8415 = vmatmul.mubr.msk.bf16.vlgmr.msra.gmra.mrb[28].mxu1 %vm2595_vm8, %v10038_v22 }
 0x2a2   : > { %8427 = vmatmul.mubr.msk.bf16.vlgmr.msra.gmra.mrb[32].mxu0 %vm2595_vm8, %v10038_v22  ;;  %8431 = vmatpush3.bf16.msra.mxu1 %v8931_v36 }
 0x2a3   : > { %8438 = vmatprep.mubr.msk.bf16.mxu1 %vm2595_vm8, %v10034_v21  ;;  %8443 = vmatpush3.bf16.msra.mxu0 %v8932_v37 }
 0x2a4   : > { %8450 = vmatprep.mubr.msk.bf16.mxu0 %vm2595_vm8, %v10034_v21  ;;  %8432 = vmatprep.subr.bf16.mxu1 %v8933_v38 }
 0x2a5   : > { %8444 = vmatprep.subr.bf16.mxu0 %v8934_v39 }
 0x2a6   : > { %8433 = vmatpush3.bf16.msra.mxu1 %v8933_v38 }
 0x2a7   : > { %8445 = vmatpush3.bf16.msra.mxu0 %v8934_v39  ;;  %8434 = vmatprep.subr.bf16.mxu1 %v8935_v40 }
 0x2a8   : > { %8446 = vmatprep.subr.bf16.mxu0 %v8936_v41 }
 0x2aa   : > { %8435 = vmatpush3.bf16.msra.mxu1 %v8935_v40 }
 0x2ab   : > { %8447 = vmatpush3.bf16.msra.mxu0 %v8936_v41  ;;  %8436 = vmatprep.subr.bf16.mxu1 %v8937_v42 }
 0x2ac   : > { %8448 = vmatprep.subr.bf16.mxu0 %v8938_v43 }
 0x2ae   : > { %8437 = vmatpush3.bf16.msra.mxu1 %v8937_v42 }
 0x2af   : > { %8449 = vmatpush3.bf16.msra.mxu0 %v8938_v43  ;;  %8454 = vmatprep.subr.bf16.mxu1 %v8939_v44 }
 0x2b1   : > { %8439 = vmatmul.mubr.msk.bf16.vlgmr.msra.gmra.mrb[32].mxu1 %vm2595_vm8, %v10038_v22 }
 0x2b2   : > { %8451 = vmatmul.mubr.msk.bf16.vlgmr.msra.gmra.mrb[36].mxu0 %vm2595_vm8, %v10038_v22  ;;  %8455 = vmatpush3.bf16.msra.mxu1 %v8939_v44 }
 0x2b3   : > { %8462 = vmatprep.mubr.msk.bf16.mxu1 %vm2595_vm8, %v10034_v21  ;;  %8456 = vmatprep.subr.bf16.mxu1 %v8940_v20 }
 0x2b4   : > { %3470 = vmatprep.mubr.bf16.mxu0 %v8945_v47  ;;  %v8946_v47 = vld [vmem:[%s10876_s9 + $0x1c] ss:$12 sps:$4 sm:$0xff]  }
 0x2b6   : > { %8457 = vmatpush3.bf16.msra.mxu1 %v8940_v20  ;;  %v8943_v20 = vld [vmem:[%s10876_s9] ss:$12 sps:$4 sm:$0xff]  }
 0x2b7   : > { %8458 = vmatprep.subr.bf16.mxu1 %v8941_v45 }
 0x2ba   : > { %8459 = vmatpush3.bf16.msra.mxu1 %v8941_v45 }
 0x2bb   : > { %8460 = vmatprep.subr.bf16.mxu1 %v8942_v46 }
 0x2be   : > { %8461 = vmatpush3.bf16.msra.mxu1 %v8942_v46 }
 0x2c1   : > { %8463 = vmatmul.mubr.msk.bf16.vlgmr.msra.gmra.mrb[36].mxu1 %vm2595_vm8, %v10038_v22 }
 0x2c2   : > { %8470 = vmatprep.mubr.msk.bf16.mxu1 %vm3425_vm9, %v8948_v48 }
 0x354   : > { %v8368_v49 = vpop.f32.mrb[20].mxu1  ;;  %v8380_v50 = vpop.f32.mrb[24].mxu0 }
 0x355   : > { %v2636_v51 = vpop.f32.mrb[21].mxu1  ;;  %v2718_v54 = vpop.f32.mrb[25].mxu0 }
 0x356   : > { %v8369_v55 = vpop.f32.mrb[22].mxu1  ;;  %v8381_v56 = vpop.f32.mrb[26].mxu0 }
 0x357   : > { %v3308_v57 = vpack.c.bf16 %v8369_v55, %v8368_v49  ;;  %v3310_v52 = vpack.c.bf16 %v8381_v56, %v8380_v50  ;;  %v2639_v58 = vpop.f32.mrb[23].mxu1  ;;  %v2721_v59 = vpop.f32.mrb[27].mxu0  ;;  %v8949_v49 = vld [vmem:[%s10876_s9 + $0x18] ss:$12 sps:$4 sm:$0xff]   ;;  %v8950_v50 = vld [vmem:[%s10876_s9 + $0x20] ss:$12 sps:$4 sm:$0xff]  }
 0x358   : > { %v3307_v60 = vpack.c.bf16 %v2639_v58, %v2636_v51  ;;  %v3309_v61 = vpack.c.bf16 %v2721_v59, %v2718_v54  ;;  %v8951_v51 = vld [vmem:[%s10876_s9 + $0x34] ss:$12 sps:$4 sm:$0xff]   ;;  %v8954_v54 = vld [vmem:[%s10876_s9 + $0x38] ss:$12 sps:$4 sm:$0xff]   ;;  %v8953_v55 = vld [vmem:[%s10876_s9 + $0x30] ss:$12 sps:$4 sm:$0xff]  }
 0x359   : > { %v8955_v56 = vld [vmem:[%s10876_s9 + $0x50] ss:$12 sps:$4 sm:$0xff]   ;;  %v8959_v58 = vld [vmem:[%s10879_s12] sm:$0xff]  }
 0x364   : > { %v8392_v62 = vpop.f32.mrb[24].mxu1  ;;  %v8404_v63 = vpop.f32.mrb[28].mxu0 }
 0x365   : > { %v2800_v0 = vpop.f32.mrb[25].mxu1  ;;  %v2882_v3 = vpop.f32.mrb[29].mxu0 }
 0x366   : > { %v8393_v4 = vpop.f32.mrb[26].mxu1  ;;  %v8405_v6 = vpop.f32.mrb[30].mxu0 }
 0x367   : > { %v3312_v7 = vpack.c.bf16 %v8393_v4, %v8392_v62  ;;  %v3314_v8 = vpack.c.bf16 %v8405_v6, %v8404_v63  ;;  %v2803_v9 = vpop.f32.mrb[27].mxu1  ;;  %v2885_v10 = vpop.f32.mrb[31].mxu0 }
 0x368   : > { %v3311_v11 = vpack.c.bf16 %v2803_v9, %v2800_v0  ;;  %v3313_v13 = vpack.c.bf16 %v2885_v10, %v2882_v3  ;;  %v3333_v4 = vpop.permute.xlu1 %3332 }
 0x374   : > { %v8416_v14 = vpop.f32.mrb[28].mxu1 }
 0x375   : > { %v8428_v16 = vpop.f32.mrb[32].mxu0  ;;  %v2964_v21 = vpop.f32.mrb[29].mxu1 }
 0x376   : > { %v3046_v22 = vpop.f32.mrb[33].mxu0  ;;  %v8417_v23 = vpop.f32.mrb[30].mxu1 }
 0x377   : > { %v3316_v24 = vpack.c.bf16 %v8417_v23, %v8416_v14  ;;  %v8429_v25 = vpop.f32.mrb[34].mxu0  ;;  %v2967_v26 = vpop.f32.mrb[31].mxu1 }
 0x378   : > { %v3318_v53 = vpack.c.bf16 %v8429_v25, %v8428_v16  ;;  %v3315_v27 = vpack.c.bf16 %v2967_v26, %v2964_v21  ;;  %v3049_v28 = vpop.f32.mrb[35].mxu0 }
 0x379   : > { %v3317_v29 = vpack.c.bf16 %v3049_v28, %v3046_v22 }
 0x37a   : > { %8181 = vmatprep.subr.bf16.mxu0 %v3315_v27  ;;  %v3343_v27 = vpop.permute.xlu1 %3342 }
 0x37b   : > { %8182 = vmatpush3.bf16.msra.mxu0 %v3307_v60  ;;  %v3328_v60 = vpop.permute.xlu0 %3327 }
 0x37c   : > { %8183 = vmatprep.subr.bf16.mxu0 %v3316_v24 }
 0x37f   : > { %8184 = vmatpush3.bf16.msra.mxu0 %v3308_v57  ;;  %v8956_v57 = vld [vmem:[%s10876_s9 + $0x4c] ss:$12 sps:$4 sm:$0xff]   ;;  %v3338_v6 = vpop.permute.xlu0 %3337 }
 0x380   : > { %8185 = vmatprep.subr.bf16.mxu0 %v3317_v29 }
 0x383   : > { %8186 = vmatpush3.bf16.msra.mxu0 %v3309_v61 }
 0x384   : > { %v8440_v30 = vpop.f32.mrb[32].mxu1  ;;  %8187 = vmatprep.subr.bf16.mxu0 %v3318_v53 }
 0x385   : > { %v8452_v31 = vpop.f32.mrb[36].mxu0  ;;  %v3128_v32 = vpop.f32.mrb[33].mxu1 }
 0x386   : > { %v3210_v33 = vpop.f32.mrb[37].mxu0  ;;  %v8441_v34 = vpop.f32.mrb[34].mxu1 }
 0x387   : > { %v3320_v35 = vpack.c.bf16 %v8441_v34, %v8440_v30  ;;  %v8453_v36 = vpop.f32.mrb[38].mxu0  ;;  %v3131_v37 = vpop.f32.mrb[35].mxu1  ;;  %8188 = vmatpush3.bf16.msra.mxu0 %v3310_v52  ;;  %v8958_v52 = vld [vmem:[%s10876_s9 + $0x48] ss:$12 sps:$4 sm:$0xff]  }
 0x388   : > { %v3322_v38 = vpack.c.bf16 %v8453_v36, %v8452_v31  ;;  %v3319_v39 = vpack.c.bf16 %v3131_v37, %v3128_v32  ;;  %v3213_v40 = vpop.f32.mrb[39].mxu0  ;;  %v3348_v32 = vpop.permute.xlu0 %3347 }
 0x389   : > { %v3321_v41 = vpack.c.bf16 %v3213_v40, %v3210_v33 }
 0x38a   : > { %8189 = vmatprep.subr.bf16.mxu0 %v3319_v39 }
 0x38b   : > { %8190 = vmatpush3.bf16.msra.mxu0 %v3311_v11 }
 0x38c   : > { %8191 = vmatprep.subr.bf16.mxu0 %v3320_v35 }
 0x38f   : > { %8192 = vmatpush3.bf16.msra.mxu0 %v3312_v7 }
 0x390   : > { %8193 = vmatprep.subr.bf16.mxu0 %v3321_v41 }
 0x393   : > { %8194 = vmatpush3.bf16.msra.mxu0 %v3313_v13 }
 0x394   : > { %v8464_v42 = vpop.f32.mrb[36].mxu1  ;;  %8195 = vmatprep.subr.bf16.mxu0 %v3322_v38 }
 0x395   : > { %v3292_v43 = vpop.f32.mrb[37].mxu1 }
 0x396   : > { %v8465_v44 = vpop.f32.mrb[38].mxu1 }
 0x397   : > { %v3324_v45 = vpack.c.bf16 %v8465_v44, %v8464_v42  ;;  %v3295_v46 = vpop.f32.mrb[39].mxu1  ;;  %8196 = vmatpush3.bf16.msra.mxu0 %v3314_v8 }
 0x398   : > { %v3323_v48 = vpack.c.bf16 %v3295_v46, %v3292_v43 }
 0x39a   : > { %3471 = vmatmul.mubr.bf16.vlgmr.msra.gmra.mrb[40].mxu0 %v8943_v20  ;;  %8466 = vmatprep.subr.bf16.mxu1 %v3323_v48 }
 0x39b   : > { %8467 = vmatpush3.bf16.msra.mxu1 %v3323_v48  ;;  %3478 = vmatprep.mubr.bf16.mxu0 %v8946_v47  ;;  %v3353_v48 = vpop.permute.xlu1 %3352 }
 0x39c   : > { %8468 = vmatprep.subr.bf16.mxu1 %v3324_v45 }
 0x39f   : > { %8469 = vmatpush3.bf16.msra.mxu1 %v3324_v45 }
 0x3a2   : > { %3479 = vmatmul.mubr.bf16.gmra.mrb[44].mxu0 %v8949_v49  ;;  %8471 = vmatmul.mubr.msk.bf16.vlgmr.msra.gmra.mrb[40].mxu1 %vm3425_vm9, %v8950_v50 }
 0x3a3   : > { %3486 = vmatprep.mubr.bf16.mxu0 %v8951_v51  ;;  %8474 = vmatprep.mubr.msk.bf16.mxu1 %vm3425_vm9, %v8954_v54 }
 0x3aa   : > { %3487 = vmatmul.mubr.bf16.gmra.mrb[48].mxu0 %v8953_v55  ;;  %8475 = vmatmul.mubr.msk.bf16.gmra.mrb[44].mxu1 %vm3425_vm9, %v8955_v56 }
 0x3ab   : > { %3494 = vmatprep.mubr.bf16.mxu0 %v8956_v57  ;;  %8486 = vmatprep.mubr.msk.bf16.mxu1 %vm2595_vm8, %v8959_v58 }
 0x3b2   : > { %3495 = vmatmul.mubr.bf16.gmra.mrb[52].mxu0 %v8958_v52 }
 0x46d   : > { %v8197_v59 = vpop.f32.mrb[40].mxu0 }
 0x46e   : > { %v8198_v61 = vpop.f32.mrb[41].mxu0 }
 0x46f   : > { %v8199_v62 = vadd.f32 %v8198_v61, %v8197_v59  ;;  %v8200_v63 = vpop.f32.mrb[42].mxu0  ;;  %v3358_v59 = vpop.permute.xlu0 %3357 }
 0x470   : > { %v8201_v0 = vpop.f32.mrb[43].mxu0 }
 0x471   : > { %v8202_v3 = vadd.f32 %v8201_v0, %v8200_v63  ;;  %v3473_v9 = vadd.f32 %v8199_v62, %v3328_v60  ;;  %v3363_v0 = vpop.permute.xlu1 %3362 }
 0x473   : > { %v3476_v22 = vadd.f32 %v8202_v3, %v3333_v4 }
 0x475   : > { %v8203_v7 = vpop.f32.mrb[44].mxu0  ;;  %v8472_v8 = vpop.f32.mrb[40].mxu1 }
 0x476   : > { %v8204_v10 = vpop.f32.mrb[45].mxu0  ;;  %v3537_v11 = vpop.f32.mrb[41].mxu1 }
 0x477   : > { %v8205_v13 = vadd.f32 %v8204_v10, %v8203_v7  ;;  %v3538_v14 = vadd.f32 %v3537_v11, %v3473_v9  ;;  %v8206_v16 = vpop.f32.mrb[46].mxu0  ;;  %v8473_v21 = vpop.f32.mrb[42].mxu1  ;;  %v8960_v10 = vld [vmem:[%s10879_s12 + $0x8] sm:$0xff]   ;;  %v8961_v11 = vld [vmem:[%s10879_s12 + $0x10] sm:$0xff]  }
 0x478   : > { %v8207_v23 = vpop.f32.mrb[47].mxu0  ;;  %v3540_v24 = vpop.f32.mrb[43].mxu1 }
 0x479   : > { %v3481_v25 = vadd.f32 %v8205_v13, %v3338_v6  ;;  %v8208_v26 = vadd.f32 %v8207_v23, %v8206_v16  ;;  %v3541_v53 = vadd.f32 %v3540_v24, %v3476_v22  ;;  %v3568_v29 = vmax.f32 %v3538_v14, 0.0  ;;  %v8962_v13 = vld [vmem:[%s10879_s12 + $0x18] sm:$0xff]   ;;  %v8963_v14 = vld [vmem:[%s10879_s12 + $0x20] sm:$0xff]   ;;  %v8964_v16 = vld [vmem:[%s10879_s12 + $0x28] sm:$0xff]  }
 0x47a   : > { %v8966_v22 = vld [vmem:[%s10879_s12 + $0x38] sm:$0xff]   ;;  %v8967_v23 = vld [vmem:[%s10879_s12 + $0x40] sm:$0xff]   ;;  %v8968_v24 = vld [vmem:[%s10879_s12 + $0x48] sm:$0xff]  }
 0x47b   : > { %v3546_v28 = vadd.f32 %v8472_v8, %v3481_v25  ;;  %v3484_v30 = vadd.f32 %v8208_v26, %v3343_v27  ;;  %v3569_v31 = vmax.f32 %v3541_v53, 0.0  ;;  %v8969_v25 = vld [vmem:[%s10879_s12 + $0x50] sm:$0xff]   ;;  %v8970_v26 = vld [vmem:[%s10879_s12 + $0x58] sm:$0xff]   ;;  %v8971_v53 = vld [vmem:[%s10879_s12 + $0x60] sm:$0xff]  }
 0x47c   : > { %v8972_v27 = vld [vmem:[%s10879_s12 + $0x68] sm:$0xff]  }
 0x47d   : > { %v3549_v33 = vadd.f32 %v8473_v21, %v3484_v30  ;;  %v3576_v34 = vpack.c.bf16 %v3569_v31, %v3568_v29  ;;  %v8209_v35 = vpop.f32.mrb[48].mxu0  ;;  %v8476_v36 = vpop.f32.mrb[44].mxu1  ;;  %v3570_v39 = vmax.f32 %v3546_v28, 0.0  ;;  %v8965_v21 = vld [vmem:[%s10879_s12 + $0x30] sm:$0xff]   ;;  %v8974_v29 = vld [vmem:[%s10879_s12 + $0x78] sm:$0xff]   ;;  %v8975_v30 = vld [vmem:[%s10879_s12 + $0x80] sm:$0xff]  }
 0x47e   : > { %v8210_v37 = vpop.f32.mrb[49].mxu0  ;;  %v3553_v38 = vpop.f32.mrb[45].mxu1  ;;  %v8973_v28 = vld [vmem:[%s10879_s12 + $0x70] sm:$0xff]   ;;  %v8976_v31 = vld [vmem:[%s10879_s12 + $0x88] sm:$0xff]  }
 0x47f   : > { %v3571_v40 = vmax.f32 %v3549_v33, 0.0  ;;  %v8211_v41 = vadd.f32 %v8210_v37, %v8209_v35  ;;  %v8212_v42 = vpop.f32.mrb[50].mxu0  ;;  %8478 = vmatprep.subr.bf16.mxu1 %v3576_v34  ;;  %v8477_v43 = vpop.f32.mrb[46].mxu1  ;;  %v8978_v33 = vld [vmem:[%s10879_s12 + $0x98] sm:$0xff]   ;;  %v8980_v35 = vld [vmem:[%s10879_s12 + $0xa8] sm:$0xff]  }
 0x480   : > { %v8213_v44 = vpop.f32.mrb[51].mxu0  ;;  %8479 = vmatpush3.bf16.msra.mxu1 %v3576_v34  ;;  %v3556_v20 = vpop.f32.mrb[47].mxu1  ;;  %v8979_v34 = vld [vmem:[%s10879_s12 + $0xa0] sm:$0xff]   ;;  %v8982_v37 = vld [vmem:[%s10879_s12 + $0xb8] sm:$0xff]  }
 0x481   : > { %v8214_v45 = vadd.f32 %v8213_v44, %v8212_v42  ;;  %v3489_v46 = vadd.f32 %v8211_v41, %v3348_v32  ;;  %v3577_v47 = vpack.c.bf16 %v3571_v40, %v3570_v39  ;;  %v8977_v32 = vld [vmem:[%s10879_s12 + $0x90] sm:$0xff]   ;;  %v8984_v39 = vld [vmem:[%s10879_s12 + $0xc8] sm:$0xff]   ;;  %v8992_v42 = vld [vmem:[%s10880_s13] sm:$0xff]  }
 0x482   : > { %v8985_v40 = vld [vmem:[%s10879_s12 + $0xd0] sm:$0xff]   ;;  %v8991_v41 = vld [vmem:[%s10880_s13 + $0x8] sm:$0xff]   ;;  %v8987_v44 = vld [vmem:[%s10879_s12 + $0xe0] sm:$0xff]  }
 0x483   : > { %v3554_v49 = vadd.f32 %v3553_v38, %v3489_v46  ;;  %8480 = vmatprep.subr.bf16.mxu1 %v3577_v47  ;;  %v3492_v50 = vadd.f32 %v8214_v45, %v3353_v48  ;;  %v8983_v38 = vld [vmem:[%s10879_s12 + $0xc0] sm:$0xff]   ;;  %8550 = vmatprep.subr.bf16.mxu0 %v8991_v41  ;;  %v8989_v45 = vld [vmem:[%s10879_s12 + $0xf0] sm:$0xff]   ;;  %v8990_v46 = vld [vmem:[%s10879_s12 + $0xf8] sm:$0xff]  }
 0x484   : > { %8481 = vmatpush3.bf16.msra.mxu1 %v3577_v47  ;;  %8551 = vmatpush3.bf16.msra.mxu0 %v8991_v41 }
 0x485   : > { %v3557_v51 = vadd.f32 %v3556_v20, %v3492_v50  ;;  %v8215_v54 = vpop.f32.mrb[52].mxu0  ;;  %v3572_v56 = vmax.f32 %v3554_v49, 0.0  ;;  %8556 = vmatprep.subr.bf16.mxu0 %v8992_v42  ;;  %v8988_v20 = vld [vmem:[%s10879_s12 + $0xe8] sm:$0xff]  }
 0x486   : > { %v8216_v55 = vpop.f32.mrb[53].mxu0 }
 0x487   : > { %v3573_v57 = vmax.f32 %v3557_v51, 0.0  ;;  %v8217_v52 = vadd.f32 %v8216_v55, %v8215_v54  ;;  %v8218_v58 = vpop.f32.mrb[54].mxu0 }
 0x488   : > { %v8219_v60 = vpop.f32.mrb[55].mxu0 }
 0x489   : > { %v3578_v61 = vpack.c.bf16 %v3573_v57, %v3572_v56  ;;  %v3497_v62 = vadd.f32 %v8217_v52, %v3358_v59  ;;  %v8220_v63 = vadd.f32 %v8219_v60, %v8218_v58  ;;  %v8993_v60 = vld [vmem:[%s10880_s13 + $0x10] sm:$0xff]  }
 0x48b   : > { %v3562_v3 = vadd.f32 %v8476_v36, %v3497_v62  ;;  %v3500_v4 = vadd.f32 %v8220_v63, %v3363_v0  ;;  %8482 = vmatprep.subr.bf16.mxu1 %v3578_v61  ;;  %v8981_v36 = vld [vmem:[%s10879_s12 + $0xb0] sm:$0xff]  }
 0x48c   : > { %8483 = vmatpush3.bf16.msra.mxu1 %v3578_v61 }
 0x48d   : > { %v3565_v6 = vadd.f32 %v8477_v43, %v3500_v4  ;;  %v3574_v7 = vmax.f32 %v3562_v3, 0.0  ;;  %v8986_v43 = vld [vmem:[%s10879_s12 + $0xd8] sm:$0xff]  }
 0x48f   : > { %v3575_v8 = vmax.f32 %v3565_v6, 0.0 }
 0x491   : > { %v3579_v9 = vpack.c.bf16 %v3575_v8, %v3574_v7  ;;  %v8994_v8 = vld [vmem:[%s10880_s13 + $0x18] sm:$0xff]  }
 0x493   : > { %8484 = vmatprep.subr.bf16.mxu1 %v3579_v9 }
 0x494   : > { %8485 = vmatpush3.bf16.msra.mxu1 %v3579_v9 }
 0x497   : > { %8487 = vmatmul.mubr.msk.bf16.vlgmr.msra.gmra.mrb[48].mxu1 %vm2595_vm8, %v8960_v10 }
 0x498   : > { %8490 = vmatprep.mubr.msk.bf16.mxu1 %vm2595_vm8, %v8961_v11 }
 0x49f   : > { %8491 = vmatmul.mubr.msk.bf16.gmra.mrb[52].mxu1 %vm2595_vm8, %v8962_v13 }
 0x4a0   : > { %8494 = vmatprep.mubr.msk.bf16.mxu1 %vm2595_vm8, %v8963_v14 }
 0x4a7   : > { %8495 = vmatmul.mubr.msk.bf16.gmra.mrb[56].mxu1 %vm2595_vm8, %v8964_v16 }
 0x4a8   : > { %8498 = vmatprep.mubr.msk.bf16.mxu1 %vm2595_vm8, %v8965_v21 }
 0x4af   : > { %8499 = vmatmul.mubr.msk.bf16.gmra.mrb[60].mxu1 %vm2595_vm8, %v8966_v22 }
 0x4b0   : > { %8502 = vmatprep.mubr.msk.bf16.mxu1 %vm2595_vm8, %v8967_v23 }
 0x4b7   : > { %8503 = vmatmul.mubr.msk.bf16.gmra.mrb[64].mxu1 %vm2595_vm8, %v8968_v24 }
 0x4b8   : > { %8506 = vmatprep.mubr.msk.bf16.mxu1 %vm2595_vm8, %v8969_v25  ;;  %v8995_v25 = vld [vmem:[%s10880_s13 + $0x20] sm:$0xff]  }
 0x4bf   : > { %8507 = vmatmul.mubr.msk.bf16.gmra.mrb[68].mxu1 %vm2595_vm8, %v8970_v26 }
 0x4c0   : > { %8510 = vmatprep.mubr.msk.bf16.mxu1 %vm2595_vm8, %v8971_v53 }
 0x4c7   : > { %8511 = vmatmul.mubr.msk.bf16.gmra.mrb[72].mxu1 %vm2595_vm8, %v8972_v27 }
 0x4c8   : > { %8514 = vmatprep.mubr.msk.bf16.mxu1 %vm2595_vm8, %v8973_v28 }
 0x4cf   : > { %8515 = vmatmul.mubr.msk.bf16.gmra.mrb[76].mxu1 %vm2595_vm8, %v8974_v29 }
 0x4d0   : > { %8518 = vmatprep.mubr.msk.bf16.mxu1 %vm2595_vm8, %v8975_v30 }
 0x4d7   : > { %8519 = vmatmul.mubr.msk.bf16.gmra.mrb[80].mxu1 %vm2595_vm8, %v8976_v31 }
 0x4d8   : > { %8522 = vmatprep.mubr.msk.bf16.mxu1 %vm2595_vm8, %v8977_v32  ;;  %v8996_v32 = vld [vmem:[%s10880_s13 + $0x28] sm:$0xff]  }
 0x4df   : > { %8523 = vmatmul.mubr.msk.bf16.gmra.mrb[84].mxu1 %vm2595_vm8, %v8978_v33 }
 0x4e0   : > { %8526 = vmatprep.mubr.msk.bf16.mxu1 %vm2595_vm8, %v8979_v34 }
 0x4e7   : > { %8527 = vmatmul.mubr.msk.bf16.gmra.mrb[88].mxu1 %vm2595_vm8, %v8980_v35 }
 0x4e8   : > { %8530 = vmatprep.mubr.msk.bf16.mxu1 %vm2595_vm8, %v8981_v36 }
 0x4ef   : > { %8531 = vmatmul.mubr.msk.bf16.gmra.mrb[92].mxu1 %vm2595_vm8, %v8982_v37 }
 0x4f0   : > { %8534 = vmatprep.mubr.msk.bf16.mxu1 %vm2595_vm8, %v8983_v38 }
 0x4f7   : > { %8535 = vmatmul.mubr.msk.bf16.gmra.mrb[96].mxu1 %vm2595_vm8, %v8984_v39 }
 0x4f8   : > { %8538 = vmatprep.mubr.msk.bf16.mxu1 %vm2595_vm8, %v8985_v40 }
 0x4ff   : > { %8539 = vmatmul.mubr.msk.bf16.gmra.mrb[100].mxu1 %vm2595_vm8, %v8986_v43 }
 0x500   : > { %8542 = vmatprep.mubr.msk.bf16.mxu1 %vm2595_vm8, %v8987_v44  ;;  %v8997_v44 = vld [vmem:[%s10880_s13 + $0x30] sm:$0xff]  }
 0x507   : > { %8543 = vmatmul.mubr.msk.bf16.gmra.mrb[104].mxu1 %vm2595_vm8, %v8988_v20 }
 0x508   : > { %8546 = vmatprep.mubr.msk.bf16.mxu1 %vm2595_vm8, %v8989_v45 }
 0x50f   : > { %8547 = vmatmul.mubr.msk.bf16.gmra.mrb[108].mxu1 %vm2595_vm8, %v8990_v46 }
 0x56a   : > { %v8488_v47 = vpop.f32.mrb[48].mxu1 }
 0x56b   : > { %v3870_v48 = vpop.f32.mrb[49].mxu1 }
 0x56c   : > { %v8489_v49 = vpop.f32.mrb[50].mxu1 }
 0x56d   : > { %v4126_v50 = vpack.c.bf16 %v8489_v49, %v8488_v47  ;;  %v3873_v51 = vpop.f32.mrb[51].mxu1 }
 0x56e   : > { %v4125_v54 = vpack.c.bf16 %v3873_v51, %v3870_v48  ;;  %v8998_v51 = vld [vmem:[%s10880_s13 + $0x38] sm:$0xff]  }
 0x572   : > { %v8492_v55 = vpop.f32.mrb[52].mxu1 }
 0x573   : > { %v3886_v56 = vpop.f32.mrb[53].mxu1 }
 0x574   : > { %v8493_v57 = vpop.f32.mrb[54].mxu1 }
 0x575   : > { %v4130_v52 = vpack.c.bf16 %v8493_v57, %v8492_v55  ;;  %v3889_v58 = vpop.f32.mrb[55].mxu1 }
 0x576   : > { %v4129_v59 = vpack.c.bf16 %v3889_v58, %v3886_v56 }
 0x578   : > { %8552 = vmatprep.mubr.msk.bf16.mxu0 %vm4140_vm10, %v4129_v59 }
 0x579   : > { %8553 = vmatmul.mubr.msk.bf16.vlgmr.msra.gmra.mrb[56].mxu0 %vm4140_vm10, %v4130_v52 }
 0x57a   : > { %8558 = vmatprep.mubr.msk.bf16.mxu0 %vm4140_vm10, %v4125_v54  ;;  %8557 = vmatpush3.bf16.msra.mxu0 %v8992_v42  ;;  %v8496_v61 = vpop.f32.mrb[56].mxu1 }
 0x57b   : > { %v3902_v62 = vpop.f32.mrb[57].mxu1  ;;  %8562 = vmatprep.subr.bf16.mxu0 %v8993_v60 }
 0x57c   : > { %v8497_v63 = vpop.f32.mrb[58].mxu1 }
 0x57d   : > { %v4258_v0 = vpack.c.bf16 %v8497_v63, %v8496_v61  ;;  %v3905_v3 = vpop.f32.mrb[59].mxu1 }
 0x57e   : > { %v4257_v4 = vpack.c.bf16 %v3905_v3, %v3902_v62 }
 0x582   : > { %v8500_v6 = vpop.f32.mrb[60].mxu1 }
 0x583   : > { %v3918_v7 = vpop.f32.mrb[61].mxu1 }
 0x584   : > { %v8501_v9 = vpop.f32.mrb[62].mxu1 }
 0x585   : > { %8559 = vmatmul.mubr.msk.bf16.vlgmr.msra.gmra.mrb[56].mxu0 %vm4140_vm10, %v4126_v50  ;;  %v4328_v10 = vpack.c.bf16 %v8501_v9, %v8500_v6  ;;  %v3921_v11 = vpop.f32.mrb[63].mxu1 }
 0x586   : > { %8564 = vmatprep.mubr.msk.bf16.mxu0 %vm4140_vm10, %v4257_v4  ;;  %8563 = vmatpush3.bf16.msra.mxu0 %v8993_v60  ;;  %v4327_v13 = vpack.c.bf16 %v3921_v11, %v3918_v7  ;;  %v9000_v11 = vld [vmem:[%s10880_s13 + $0x48] sm:$0xff]  }
 0x587   : > { %8568 = vmatprep.subr.bf16.mxu0 %v8994_v8 }
 0x58a   : > { %v8504_v14 = vpop.f32.mrb[64].mxu1 }
 0x58b   : > { %v3934_v16 = vpop.f32.mrb[65].mxu1 }
 0x58c   : > { %v8505_v21 = vpop.f32.mrb[66].mxu1 }
 0x58d   : > { %v4398_v22 = vpack.c.bf16 %v8505_v21, %v8504_v14  ;;  %v3937_v23 = vpop.f32.mrb[67].mxu1 }
 0x58e   : > { %v4397_v24 = vpack.c.bf16 %v3937_v23, %v3934_v16 }
 0x591   : > { %8565 = vmatmul.mubr.msk.bf16.vlgmr.msra.gmra.mrb[56].mxu0 %vm4140_vm10, %v4258_v0  ;;  %v8999_v0 = vld [vmem:[%s10880_s13 + $0x40] sm:$0xff]  }
 0x592   : > { %8570 = vmatprep.mubr.msk.bf16.mxu0 %vm4140_vm10, %v4327_v13  ;;  %8569 = vmatpush3.bf16.msra.mxu0 %v8994_v8  ;;  %v8508_v26 = vpop.f32.mrb[68].mxu1 }
 0x593   : > { %8574 = vmatprep.subr.bf16.mxu0 %v8995_v25  ;;  %v3950_v53 = vpop.f32.mrb[69].mxu1 }
 0x594   : > { %v8509_v27 = vpop.f32.mrb[70].mxu1 }
 0x595   : > { %v4468_v28 = vpack.c.bf16 %v8509_v27, %v8508_v26  ;;  %v3953_v29 = vpop.f32.mrb[71].mxu1 }
 0x596   : > { %v4467_v30 = vpack.c.bf16 %v3953_v29, %v3950_v53 }
 0x59a   : > { %v8512_v31 = vpop.f32.mrb[72].mxu1 }
 0x59b   : > { %v3966_v33 = vpop.f32.mrb[73].mxu1 }
 0x59c   : > { %v8513_v34 = vpop.f32.mrb[74].mxu1 }
 0x59d   : > { %8571 = vmatmul.mubr.msk.bf16.vlgmr.msra.gmra.mrb[56].mxu0 %vm4140_vm10, %v4328_v10  ;;  %v4538_v35 = vpack.c.bf16 %v8513_v34, %v8512_v31  ;;  %v3969_v36 = vpop.f32.mrb[75].mxu1 }
 0x59e   : > { %8576 = vmatprep.mubr.msk.bf16.mxu0 %vm4140_vm10, %v4397_v24  ;;  %8575 = vmatpush3.bf16.msra.mxu0 %v8995_v25  ;;  %v4537_v37 = vpack.c.bf16 %v3969_v36, %v3966_v33  ;;  %v9002_v36 = vld [vmem:[%s10880_s13 + $0x58] sm:$0xff]  }
 0x59f   : > { %8580 = vmatprep.subr.bf16.mxu0 %v8996_v32 }
 0x5a2   : > { %v8516_v38 = vpop.f32.mrb[76].mxu1 }
 0x5a3   : > { %v3982_v39 = vpop.f32.mrb[77].mxu1 }
 0x5a4   : > { %v8517_v40 = vpop.f32.mrb[78].mxu1 }
 0x5a5   : > { %v4608_v41 = vpack.c.bf16 %v8517_v40, %v8516_v38  ;;  %v3985_v42 = vpop.f32.mrb[79].mxu1 }
 0x5a6   : > { %v4607_v43 = vpack.c.bf16 %v3985_v42, %v3982_v39  ;;  %v9003_v42 = vld [vmem:[%s10880_s13 + $0x60] sm:$0xff]  }
 0x5a9   : > { %8577 = vmatmul.mubr.msk.bf16.vlgmr.msra.gmra.mrb[56].mxu0 %vm4140_vm10, %v4398_v22 }
 0x5aa   : > { %8582 = vmatprep.mubr.msk.bf16.mxu0 %vm4140_vm10, %v4467_v30  ;;  %8581 = vmatpush3.bf16.msra.mxu0 %v8996_v32  ;;  %v8520_v20 = vpop.f32.mrb[80].mxu1 }
 0x5ab   : > { %8586 = vmatprep.subr.bf16.mxu0 %v8997_v44  ;;  %v3998_v45 = vpop.f32.mrb[81].mxu1 }
 0x5ac   : > { %v8521_v46 = vpop.f32.mrb[82].mxu1 }
 0x5ad   : > { %v4678_v47 = vpack.c.bf16 %v8521_v46, %v8520_v20  ;;  %v4001_v48 = vpop.f32.mrb[83].mxu1  ;;  %v9006_v20 = vld [vmem:[%s10880_s13 + $0x78] sm:$0xff]   ;;  %v5240_v46 = vpop.permute.xlu0 %5239 }
 0x5ae   : > { %v4677_v49 = vpack.c.bf16 %v4001_v48, %v3998_v45  ;;  %v9210_v45 = vmov 0.0  }
 0x5af   : > { %8646 = vmatprep.subr.bf16.mxu1 %v9210_v45  ;;  %8650 = vmatprep.mubr.msk.bf16.mxu1 %vm9211_vm11, %v9210_v45 }
 0x5b1   : > { %v5250_v48 = vpop.permute.xlu0 %5249 }
 0x5b2   : > { %v8524_v50 = vpop.f32.mrb[84].mxu1 }
 0x5b3   : > { %v4014_v54 = vpop.f32.mrb[85].mxu1 }
 0x5b4   : > { %v8525_v55 = vpop.f32.mrb[86].mxu1 }
 0x5b5   : > { %8583 = vmatmul.mubr.msk.bf16.vlgmr.msra.gmra.mrb[56].mxu0 %vm4140_vm10, %v4468_v28  ;;  %v4748_v56 = vpack.c.bf16 %v8525_v55, %v8524_v50  ;;  %v4017_v57 = vpop.f32.mrb[87].mxu1  ;;  %v9001_v28 = vld [vmem:[%s10880_s13 + $0x50] sm:$0xff]  }
 0x5b6   : > { %8588 = vmatprep.mubr.msk.bf16.mxu0 %vm4140_vm10, %v4537_v37  ;;  %8587 = vmatpush3.bf16.msra.mxu0 %v8997_v44  ;;  %v4747_v52 = vpack.c.bf16 %v4017_v57, %v4014_v54  ;;  %v9005_v44 = vld [vmem:[%s10880_s13 + $0x70] sm:$0xff]  }
 0x5b7   : > { %8592 = vmatprep.subr.bf16.mxu0 %v8998_v51 }
 0x5ba   : > { %v8528_v58 = vpop.f32.mrb[88].mxu1 }
 0x5bb   : > { %v4030_v59 = vpop.f32.mrb[89].mxu1 }
 0x5bc   : > { %v8529_v60 = vpop.f32.mrb[90].mxu1 }
 0x5bd   : > { %v4818_v61 = vpack.c.bf16 %v8529_v60, %v8528_v58  ;;  %v4033_v62 = vpop.f32.mrb[91].mxu1 }
 0x5be   : > { %v4817_v63 = vpack.c.bf16 %v4033_v62, %v4030_v59 }
 0x5c1   : > { %8589 = vmatmul.mubr.msk.bf16.vlgmr.msra.gmra.mrb[56].mxu0 %vm4140_vm10, %v4538_v35 }
 0x5c2   : > { %8594 = vmatprep.mubr.msk.bf16.mxu0 %vm4140_vm10, %v4607_v43  ;;  %8593 = vmatpush3.bf16.msra.mxu0 %v8998_v51  ;;  %v8532_v3 = vpop.f32.mrb[92].mxu1  ;;  %v9004_v43 = vld [vmem:[%s10880_s13 + $0x68] sm:$0xff]  }
 0x5c3   : > { %8598 = vmatprep.subr.bf16.mxu0 %v8999_v0  ;;  %v4046_v4 = vpop.f32.mrb[93].mxu1 }
 0x5c4   : > { %v8533_v6 = vpop.f32.mrb[94].mxu1 }
 0x5c5   : > { %v4888_v7 = vpack.c.bf16 %v8533_v6, %v8532_v3  ;;  %v4049_v8 = vpop.f32.mrb[95].mxu1 }
 0x5c6   : > { %v4887_v9 = vpack.c.bf16 %v4049_v8, %v4046_v4  ;;  %v9010_v8 = vld [vmem:[%s10883_s16 + $0x44] ss:$8 sps:$4 sm:$0xff]  }
 0x5ca   : > { %v8536_v10 = vpop.f32.mrb[96].mxu1 }
 0x5cb   : > { %v4062_v13 = vpop.f32.mrb[97].mxu1 }
 0x5cc   : > { %v8537_v14 = vpop.f32.mrb[98].mxu1 }
 0x5cd   : > { %8595 = vmatmul.mubr.msk.bf16.vlgmr.msra.gmra.mrb[56].mxu0 %vm4140_vm10, %v4608_v41  ;;  %v4958_v16 = vpack.c.bf16 %v8537_v14, %v8536_v10  ;;  %v4065_v21 = vpop.f32.mrb[99].mxu1  ;;  %v9014_v10 = vld [vmem:[%s10883_s16 + $0x60] ss:$8 sps:$4 sm:$0xff]   ;;  %v9034_v14 = vld [vmem:[%s10883_s16 + $0x94] ss:$8 sps:$4 sm:$0xff]  }
 0x5ce   : > { %8600 = vmatprep.mubr.msk.bf16.mxu0 %vm4140_vm10, %v4677_v49  ;;  %8599 = vmatpush3.bf16.msra.mxu0 %v8999_v0  ;;  %v4957_v22 = vpack.c.bf16 %v4065_v21, %v4062_v13  ;;  %v9026_v13 = vld [vmem:[%s10883_s16 + $0x80] ss:$8 sps:$4 sm:$0xff]   ;;  %v9040_v21 = vld [vmem:[%s10883_s16 + $0xa4] ss:$8 sps:$4 sm:$0xff]  }
 0x5cf   : > { %8604 = vmatprep.subr.bf16.mxu0 %v9000_v11 }
 0x5d2   : > { %v8540_v23 = vpop.f32.mrb[100].mxu1 }
 0x5d3   : > { %v4078_v24 = vpop.f32.mrb[101].mxu1 }
 0x5d4   : > { %v8541_v25 = vpop.f32.mrb[102].mxu1 }
 0x5d5   : > { %v5028_v26 = vpack.c.bf16 %v8541_v25, %v8540_v23  ;;  %v4081_v53 = vpop.f32.mrb[103].mxu1  ;;  %v9019_v23 = vld [vmem:[%s10883_s16 + $0x74] ss:$8 sps:$4 sm:$0xff]   ;;  %v9017_v25 = vld [vmem:[%s10883_s16 + $0x70] ss:$8 sps:$4 sm:$0xff]  }
 0x5d6   : > { %v5027_v27 = vpack.c.bf16 %v4081_v53, %v4078_v24  ;;  %v9046_v24 = vld [vmem:[%s10883_s16 + $0xb4] ss:$8 sps:$4 sm:$0xff]   ;;  %v9044_v53 = vld [vmem:[%s10883_s16 + $0xb0] ss:$8 sps:$4 sm:$0xff]  }
 0x5d9   : > { %8601 = vmatmul.mubr.msk.bf16.vlgmr.msra.gmra.mrb[56].mxu0 %vm4140_vm10, %v4678_v47  ;;  %v5245_v47 = vpop.permute.xlu1 %5244 }
 0x5da   : > { %8606 = vmatprep.mubr.msk.bf16.mxu0 %vm4140_vm10, %v4747_v52  ;;  %8605 = vmatpush3.bf16.msra.mxu0 %v9000_v11  ;;  %v8544_v29 = vpop.f32.mrb[104].mxu1  ;;  %v9028_v11 = vld [vmem:[%s10883_s16 + $0x84] ss:$8 sps:$4 sm:$0xff]  }
 0x5db   : > { %8610 = vmatprep.subr.bf16.mxu0 %v9001_v28  ;;  %v4094_v30 = vpop.f32.mrb[105].mxu1 }
 0x5dc   : > { %v8545_v31 = vpop.f32.mrb[106].mxu1 }
 0x5dd   : > { %v5098_v32 = vpack.c.bf16 %v8545_v31, %v8544_v29  ;;  %v4097_v33 = vpop.f32.mrb[107].mxu1  ;;  %v5255_v54 = vpop.permute.xlu1 %5254  ;;  %v9020_v31 = vld [vmem:[%s10883_s16] ss:$8 sps:$4 sm:$0xff]  }
 0x5de   : > { %v5097_v34 = vpack.c.bf16 %v4097_v33, %v4094_v30 }
 0x5e2   : > { %v8548_v35 = vpop.f32.mrb[108].mxu1 }
 0x5e3   : > { %v4110_v37 = vpop.f32.mrb[109].mxu1 }
 0x5e4   : > { %v8549_v38 = vpop.f32.mrb[110].mxu1 }
 0x5e5   : > { %8607 = vmatmul.mubr.msk.bf16.vlgmr.msra.gmra.mrb[56].mxu0 %vm4140_vm10, %v4748_v56  ;;  %v5168_v39 = vpack.c.bf16 %v8549_v38, %v8548_v35  ;;  %v4113_v40 = vpop.f32.mrb[111].mxu1  ;;  %v9025_v35 = vld [vmem:[%s10883_s16 + $0x14] ss:$8 sps:$4 sm:$0xff]  }
 0x5e6   : > { %8612 = vmatprep.mubr.msk.bf16.mxu0 %vm4140_vm10, %v4817_v63  ;;  %8611 = vmatpush3.bf16.msra.mxu0 %v9001_v28  ;;  %v5167_v41 = vpack.c.bf16 %v4113_v40, %v4110_v37  ;;  %v9058_v38 = vld [vmem:[%s10883_s16 + $0x114] ss:$8 sps:$4 sm:$0xff]   ;;  %v9031_v40 = vld [vmem:[%s10883_s16 + $0x24] ss:$8 sps:$4 sm:$0xff]  }
 0x5e7   : > { %8616 = vmatprep.subr.bf16.mxu0 %v9002_v36 }
 0x5f1   : > { %8613 = vmatmul.mubr.msk.bf16.vlgmr.msra.gmra.mrb[56].mxu0 %vm4140_vm10, %v4818_v61 }
 0x5f2   : > { %8618 = vmatprep.mubr.msk.bf16.mxu0 %vm4140_vm10, %v4887_v9  ;;  %8617 = vmatpush3.bf16.msra.mxu0 %v9002_v36  ;;  %v9007_v9 = vld [vmem:[%s10882_s15] sm:$0xff]  }
 0x5f3   : > { %8622 = vmatprep.subr.bf16.mxu0 %v9003_v42 }
 0x5fd   : > { %8619 = vmatmul.mubr.msk.bf16.vlgmr.msra.gmra.mrb[56].mxu0 %vm4140_vm10, %v4888_v7 }
 0x5fe   : > { %8624 = vmatprep.mubr.msk.bf16.mxu0 %vm4140_vm10, %v4957_v22  ;;  %8623 = vmatpush3.bf16.msra.mxu0 %v9003_v42  ;;  %v9038_v22 = vld [vmem:[%s10883_s16 + $0xa0] ss:$8 sps:$4 sm:$0xff]   ;;  %v9064_v42 = vld [vmem:[%s10883_s16 + $0x124] ss:$8 sps:$4 sm:$0xff]  }
 0x5ff   : > { %8628 = vmatprep.subr.bf16.mxu0 %v9004_v43 }
 0x609   : > { %8625 = vmatmul.mubr.msk.bf16.vlgmr.msra.gmra.mrb[56].mxu0 %vm4140_vm10, %v4958_v16  ;;  %v9032_v16 = vld [vmem:[%s10883_s16 + $0x90] ss:$8 sps:$4 sm:$0xff]  }
 0x60a   : > { %8630 = vmatprep.mubr.msk.bf16.mxu0 %vm4140_vm10, %v5027_v27  ;;  %8629 = vmatpush3.bf16.msra.mxu0 %v9004_v43  ;;  %v9052_v27 = vld [vmem:[%s10883_s16 + $0x104] ss:$8 sps:$4 sm:$0xff]   ;;  %v9029_v43 = vld [vmem:[%s10883_s16 + $0x20] ss:$8 sps:$4 sm:$0xff]  }
 0x60b   : > { %8634 = vmatprep.subr.bf16.mxu0 %v9005_v44 }
 0x615   : > { %8631 = vmatmul.mubr.msk.bf16.vlgmr.msra.gmra.mrb[56].mxu0 %vm4140_vm10, %v5028_v26  ;;  %v9022_v26 = vld [vmem:[%s10883_s16 + $0x4] ss:$8 sps:$4 sm:$0xff]  }
 0x616   : > { %8636 = vmatprep.mubr.msk.bf16.mxu0 %vm4140_vm10, %v5097_v34  ;;  %8635 = vmatpush3.bf16.msra.mxu0 %v9005_v44  ;;  %v9037_v44 = vld [vmem:[%s10883_s16 + $0x34] ss:$8 sps:$4 sm:$0xff]  }
 0x617   : > { %8640 = vmatprep.subr.bf16.mxu0 %v9006_v20 }
 0x621   : > { %8637 = vmatmul.mubr.msk.bf16.vlgmr.msra.gmra.mrb[56].mxu0 %vm4140_vm10, %v5098_v32  ;;  %v9050_v32 = vld [vmem:[%s10883_s16 + $0x100] ss:$8 sps:$4 sm:$0xff]  }
 0x622   : > { %8642 = vmatprep.mubr.msk.bf16.mxu0 %vm4140_vm10, %v5167_v41  ;;  %8641 = vmatpush3.bf16.msra.mxu0 %v9006_v20  ;;  %v9056_v41 = vld [vmem:[%s10883_s16 + $0x110] ss:$8 sps:$4 sm:$0xff]   ;;  %v9062_v20 = vld [vmem:[%s10883_s16 + $0x120] ss:$8 sps:$4 sm:$0xff]  }
 0x623   : > { %5562 = vmatprep.subr.bf16.mxu0 %v9028_v11  ;;  %v9104_v11 = vld [vmem:[%s10883_s16 + $0x210] ss:$8 sps:$4 sm:$0xff]  }
 0x62d   : > { %8643 = vmatmul.mubr.msk.bf16.vlgmr.msra.gmra.mrb[56].mxu0 %vm4140_vm10, %v5168_v39  ;;  %v9023_v39 = vld [vmem:[%s10883_s16 + $0x10] ss:$8 sps:$4 sm:$0xff]  }
 0x62e   : > { %5594 = vmatprep.mubr.bf16.mxu0 %v9208_v12  ;;  %5563 = vmatpush1.bf16.msra.mxu0 %v9026_v13  ;;  %v9112_v13 = vld [vmem:[%s10883_s16 + $0x224] ss:$8 sps:$4 sm:$0xff]  }
 0x62f   : > { %5564 = vmatprep.subr.bf16.mxu0 %v9034_v14  ;;  %v9077_v14 = vld [vmem:[%s10883_s16 + $0x160] ss:$8 sps:$4 sm:$0xff]  }
 0x632   : > { %5565 = vmatpush1.bf16.msra.mxu0 %v9032_v16  ;;  %v9085_v16 = vld [vmem:[%s10883_s16 + $0x174] ss:$8 sps:$4 sm:$0xff]  }
 0x633   : > { %5566 = vmatprep.subr.bf16.mxu0 %v9040_v21  ;;  %v9110_v21 = vld [vmem:[%s10883_s16 + $0x220] ss:$8 sps:$4 sm:$0xff]  }
 0x636   : > { %5567 = vmatpush1.bf16.msra.mxu0 %v9038_v22  ;;  %v9118_v22 = vld [vmem:[%s10883_s16 + $0x234] ss:$8 sps:$4 sm:$0xff]  }
 0x637   : > { %5568 = vmatprep.subr.bf16.mxu0 %v9046_v24  ;;  %v9091_v24 = vld [vmem:[%s10883_s16 + $0x1c4] ss:$8 sps:$4 sm:$0xff]  }
 0x63a   : > { %5569 = vmatpush1.bf16.msra.mxu0 %v9044_v53  ;;  %v9089_v53 = vld [vmem:[%s10883_s16 + $0x1c0] ss:$8 sps:$4 sm:$0xff]  }
 0x63b   : > { %5754 = vmatprep.subr.bf16.mxu0 %v9052_v27 }
 0x700   : > { %v8644_v49 = vpop.f32.mrb[56].mxu0 }
 0x701   : > { %v5259_v50 = vadd.f32 %v8644_v49, %v5250_v48  ;;  %v5218_v51 = vpop.f32.mrb[57].mxu0  ;;  %v9068_v48 = vld [vmem:[%s10883_s16 + $0x130] ss:$8 sps:$4 sm:$0xff]   ;;  %v9076_v49 = vld [vmem:[%s10883_s16 + $0x184] ss:$8 sps:$4 sm:$0xff]  }
 0x702   : > { %v5257_v55 = vadd.f32 %v5240_v46, %v5218_v51  ;;  %v8645_v56 = vpop.f32.mrb[58].mxu0  ;;  %v9035_v46 = vld [vmem:[%s10883_s16 + $0x30] ss:$8 sps:$4 sm:$0xff]   ;;  %v9049_v51 = vld [vmem:[%s10883_s16 + $0xd4] ss:$8 sps:$4 sm:$0xff]  }
 0x703   : > { %v5263_v57 = vmax.f32 %v5259_v50, 0.0  ;;  %v5260_v52 = vadd.f32 %v8645_v56, %v5255_v54  ;;  %v5221_v58 = vpop.f32.mrb[59].mxu0  ;;  %v9041_v50 = vld [vmem:[%s10883_s16 + $0xc0] ss:$8 sps:$4 sm:$0xff]   ;;  %v9082_v56 = vld [vmem:[%s10883_s16 + $0x194] ss:$8 sps:$4 sm:$0xff]  }
 0x704   : > { %v5261_v59 = vmax.f32 %v5257_v55, 0.0  ;;  %v5258_v60 = vadd.f32 %v5245_v47, %v5221_v58  ;;  %v9043_v47 = vld [vmem:[%s10883_s16 + $0xc4] ss:$8 sps:$4 sm:$0xff]   ;;  %v9074_v54 = vld [vmem:[%s10883_s16 + $0x180] ss:$8 sps:$4 sm:$0xff]  }
 0x705   : > { %v5264_v61 = vmax.f32 %v5260_v52, 0.0  ;;  %v5267_v63 = vadd.f32 %v5263_v57, %v10030_v19  ;;  %v9016_v19 = vld [vmem:[%s10883_s16 + $0x64] ss:$8 sps:$4 sm:$0xff]   ;;  %v9047_v57 = vld [vmem:[%s10883_s16 + $0xd0] ss:$8 sps:$4 sm:$0xff]  }
 0x706   : > { %v5262_v62 = vmax.f32 %v5258_v60, 0.0  ;;  %v5265_v3 = vadd.f32 %v5261_v59, %v10026_v17  ;;  %v9013_v17 = vld [vmem:[%s10883_s16 + $0x54] ss:$8 sps:$4 sm:$0xff]   ;;  %v9055_v52 = vld [vmem:[%s10883_s16 + $0xe4] ss:$8 sps:$4 sm:$0xff]  }
 0x707   : > { %v5268_v0 = vadd.f32 %v5264_v61, %v10024_v15  ;;  %v9008_v15 = vld [vmem:[%s10883_s16 + $0x40] ss:$8 sps:$4 sm:$0xff]   ;;  %v9080_v58 = vld [vmem:[%s10883_s16 + $0x190] ss:$8 sps:$4 sm:$0xff]   ;;  %v9088_v59 = vld [vmem:[%s10883_s16 + $0x1a4] ss:$8 sps:$4 sm:$0xff]  }
 0x708   : > { %v5266_v4 = vadd.f32 %v5262_v62, %v10028_v18  ;;  %v9011_v18 = vld [vmem:[%s10883_s16 + $0x50] ss:$8 sps:$4 sm:$0xff]   ;;  %v9053_v60 = vld [vmem:[%s10883_s16 + $0xe0] ss:$8 sps:$4 sm:$0xff]   ;;  %v9061_v61 = vld [vmem:[%s10883_s16 + $0xf4] ss:$8 sps:$4 sm:$0xff]  }
 0x709   : > { %v5270_v6 = vpack.c.bf16 %v5268_v0, %v5267_v63  ;;  %v9086_v62 = vld [vmem:[%s10883_s16 + $0x1a0] ss:$8 sps:$4 sm:$0xff]   ;;  %v9094_v63 = vld [vmem:[%s10883_s16 + $0x1b4] ss:$8 sps:$4 sm:$0xff]   ;;  %v9059_v0 = vld [vmem:[%s10883_s16 + $0xf0] ss:$8 sps:$4 sm:$0xff]  }
 0x70a   : > { %v5269_v7 = vpack.c.bf16 %v5266_v4, %v5265_v3  ;;  %v9067_v3 = vld [vmem:[%s10883_s16 + $0x144] ss:$8 sps:$4 sm:$0xff]   ;;  %v9092_v4 = vld [vmem:[%s10883_s16 + $0x1b0] ss:$8 sps:$4 sm:$0xff]  }
 0x70c   : > { %8647 = vmatpush3.bf16.msra.mxu1 %v5269_v7  ;;  %v9065_v7 = vld [vmem:[%s10883_s16 + $0x140] ss:$8 sps:$4 sm:$0xff]  }
 0x70d   : > { %8648 = vmatprep.subr.bf16.mxu1 %v9210_v45  ;;  %v9070_v45 = vld [vmem:[%s10883_s16 + $0x134] ss:$8 sps:$4 sm:$0xff]  }
 0x710   : > { %8649 = vmatpush3.bf16.msra.mxu1 %v5270_v6  ;;  %v9100_v6 = vld [vmem:[%s10883_s16 + $0x204] ss:$8 sps:$4 sm:$0xff]  }
 0x711   : > { %5384 = vmatprep.subr.bf16.mxu1 %v9010_v8 }
 0x713   : > { %8651 = vmatmul.mubr.msk.bf16.vlgmr.msra.gmra.mrb[112].mxu1 %vm3425_vm9, %v9007_v9  ;;  %v9073_v9 = vld [vmem:[%s10883_s16 + $0x154] ss:$8 sps:$4 sm:$0xff]  }
 0x714   : > { %5385 = vmatpush1.bf16.msra.mxu1 %v9008_v15  ;;  %5416 = vmatprep.mubr.bf16.mxu1 %v9208_v12  ;;  %v9098_v15 = vld [vmem:[%s10883_s16 + $0x200] ss:$8 sps:$4 sm:$0xff]  }
 0x715   : > { %5386 = vmatprep.subr.bf16.mxu1 %v9013_v17 }
 0x718   : > { %5387 = vmatpush1.bf16.msra.mxu1 %v9011_v18  ;;  %v9106_v18 = vld [vmem:[%s10883_s16 + $0x214] ss:$8 sps:$4 sm:$0xff]  }
 0x719   : > { %5388 = vmatprep.subr.bf16.mxu1 %v9016_v19  ;;  %v9071_v19 = vld [vmem:[%s10883_s16 + $0x150] ss:$8 sps:$4 sm:$0xff]  }
 0x71c   : > { %5389 = vmatpush1.bf16.msra.mxu1 %v9014_v10  ;;  %v9079_v10 = vld [vmem:[%s10883_s16 + $0x164] ss:$8 sps:$4 sm:$0xff]  }
 0x71d   : > { %5390 = vmatprep.subr.bf16.mxu1 %v9019_v23  ;;  %v9083_v23 = vld [vmem:[%s10883_s16 + $0x170] ss:$8 sps:$4 sm:$0xff]  }
 0x720   : > { %5391 = vmatpush1.bf16.msra.mxu1 %v9017_v25  ;;  %v9116_v25 = vld [vmem:[%s10883_s16 + $0x230] ss:$8 sps:$4 sm:$0xff]  }
 0x721   : > { %5467 = vmatprep.subr.bf16.mxu1 %v9022_v26  ;;  %v9124_v26 = vld [vmem:[%s10883_s16 + $0x284] ss:$8 sps:$4 sm:$0xff]  }
 0x7e6   : > { %v5313_v28 = vpop.f32.mrb[112].mxu1 }
 0x7e7   : > { %v10466_v29 = vpack.c.bf16 %v5313_v28, %v5313_v28  ;;  %v8652_v30 = vpop.f32.mrb[113].mxu1  ;;  %v9097_v28 = vld [vmem:[%s10883_s16 + $0x1d4] ss:$8 sps:$4 sm:$0xff]  }
 0x7e8   : > { %v10474_v33 = vpop.f32.mrb[114].mxu1 }
 0x7e9   : > { %v10477_v34 = vshrl.u32 %v10466_v29, 16  ;;  %v5518_v36 = vrot.slane %v10466_v29, 1  ;;  %v8653_v37 = vpop.f32.mrb[115].mxu1  ;;  %v5710_v55 = vrot.slane %v10466_v29, 2  ;;  %v5902_v17 = vrot.slane %v10466_v29, 3 }
 0x7ea   : > { %v10648_v30 = vpack.c.bf16 %v10474_v33, %v10474_v33  ;;  %v9128_v33 = vld [vmem:[%s10883_s16 + $0x290] ss:$8 sps:$4 sm:$0xff]   ;;  %v9101_v37 = vld [vmem:[%s10883_s16 + $0x1e0] ss:$8 sps:$4 sm:$0xff]  }
 0x7eb   : > { %7656 = vmatmul.mubr.msk.bf16.vlgmr.msra.gmra.mrb[116].mxu1 %vm2595_vm8, %v10477_v34  ;;  %7682 = vmatmul.mubr.msk.bf16.vlgmr.msra.gmra.mrb[60].mxu0 %vm2595_vm8, %v5518_v36  ;;  %v5614_v8 = vrot.slane %v10477_v34, 1  ;;  %v5806_v27 = vrot.slane %v10477_v34, 2  ;;  %v9136_v36 = vld [vmem:[%s10883_s16 + $0x2a4] ss:$8 sps:$4 sm:$0xff]  }
 0x7ec   : > { %5468 = vmatpush1.bf16.msra.mxu1 %v9020_v31  ;;  %5499 = vmatprep.mubr.bf16.mxu1 %v9208_v12  ;;  %v9130_v31 = vld [vmem:[%s10883_s16 + $0x294] ss:$8 sps:$4 sm:$0xff]  }
 0x7ed   : > { %5469 = vmatprep.subr.bf16.mxu1 %v9025_v35  ;;  %5755 = vmatpush1.bf16.msra.mxu0 %v9050_v32  ;;  %v9095_v32 = vld [vmem:[%s10883_s16 + $0x1d0] ss:$8 sps:$4 sm:$0xff]   ;;  %v9103_v35 = vld [vmem:[%s10883_s16 + $0x1e4] ss:$8 sps:$4 sm:$0xff]  }
 0x7ee   : > { %5756 = vmatprep.subr.bf16.mxu0 %v9058_v38  ;;  %5786 = vmatprep.mubr.bf16.mxu0 %v9208_v12  ;;  %v9109_v38 = vld [vmem:[%s10883_s16 + $0x1f4] ss:$8 sps:$4 sm:$0xff]  }
 0x7f0   : > { %5470 = vmatpush1.bf16.msra.mxu1 %v9023_v39  ;;  %v9134_v39 = vld [vmem:[%s10883_s16 + $0x2a0] ss:$8 sps:$4 sm:$0xff]  }
 0x7f1   : > { %5471 = vmatprep.subr.bf16.mxu1 %v9031_v40  ;;  %5757 = vmatpush1.bf16.msra.mxu0 %v9056_v41  ;;  %v9142_v40 = vld [vmem:[%s10883_s16 + $0x2b4] ss:$8 sps:$4 sm:$0xff]   ;;  %v9107_v41 = vld [vmem:[%s10883_s16 + $0x1f0] ss:$8 sps:$4 sm:$0xff]  }
 0x7f2   : > { %5758 = vmatprep.subr.bf16.mxu0 %v9064_v42  ;;  %v9115_v42 = vld [vmem:[%s10883_s16 + $0x244] ss:$8 sps:$4 sm:$0xff]  }
 0x7f4   : > { %5472 = vmatpush1.bf16.msra.mxu1 %v9029_v43  ;;  %v9140_v43 = vld [vmem:[%s10883_s16 + $0x2b0] ss:$8 sps:$4 sm:$0xff]  }
 0x7f5   : > { %5473 = vmatprep.subr.bf16.mxu1 %v9037_v44  ;;  %5759 = vmatpush1.bf16.msra.mxu0 %v9062_v20  ;;  %v9148_v44 = vld [vmem:[%s10883_s16 + $0x304] ss:$8 sps:$4 sm:$0xff]   ;;  %v9113_v20 = vld [vmem:[%s10883_s16 + $0x240] ss:$8 sps:$4 sm:$0xff]  }
 0x7f6   : > { %5760 = vmatprep.subr.bf16.mxu0 %v9070_v45  ;;  %v5998_v45 = vrot.slane %v10477_v34, 3  ;;  %v9119_v34 = vld [vmem:[%s10883_s16 + $0x250] ss:$8 sps:$4 sm:$0xff]  }
 0x7f8   : > { %5474 = vmatpush1.bf16.msra.mxu1 %v9035_v46  ;;  %v9121_v46 = vld [vmem:[%s10883_s16 + $0x254] ss:$8 sps:$4 sm:$0xff]  }
 0x7f9   : > { %5658 = vmatprep.subr.bf16.mxu1 %v9043_v47  ;;  %5761 = vmatpush1.bf16.msra.mxu0 %v9068_v48  ;;  %v9146_v47 = vld [vmem:[%s10883_s16 + $0x300] ss:$8 sps:$4 sm:$0xff]   ;;  %v6288_v48 = vrot.slane %v10648_v30, 1 }
 0x7fa   : > { %5946 = vmatprep.subr.bf16.mxu0 %v9076_v49  ;;  %v9154_v49 = vld [vmem:[%s10883_s16 + $0x314] ss:$8 sps:$4 sm:$0xff]  }
 0x7fb   : > { %7665 = vmatmul.mubr.msk.bf16.vlgmr.msra.gmra.mrb[120].mxu1 %vm2595_vm8, %v10466_v29  ;;  %v9122_v29 = vld [vmem:[%s10883_s16 + $0x280] ss:$8 sps:$4 sm:$0xff]  }
 0x7fc   : > { %5659 = vmatpush1.bf16.msra.mxu1 %v9041_v50  ;;  %5690 = vmatprep.mubr.bf16.mxu1 %v9208_v12  ;;  %v9127_v50 = vld [vmem:[%s10883_s16 + $0x264] ss:$8 sps:$4 sm:$0xff]  }
 0x7fd   : > { %5660 = vmatprep.subr.bf16.mxu1 %v9049_v51  ;;  %7716 = vmatmul.mubr.msk.bf16.vlgmr.msra.gmra.mrb[64].mxu0 %vm2595_vm8, %v5710_v55  ;;  %v9152_v51 = vld [vmem:[%s10883_s16 + $0x310] ss:$8 sps:$4 sm:$0xff]   ;;  %v9125_v55 = vld [vmem:[%s10883_s16 + $0x260] ss:$8 sps:$4 sm:$0xff]  }
 0x7fe   : > { %5947 = vmatpush1.bf16.msra.mxu0 %v9074_v54  ;;  %5978 = vmatprep.mubr.bf16.mxu0 %v9208_v12  ;;  %v9160_v54 = vld [vmem:[%s10883_s16 + $0x324] ss:$8 sps:$4 sm:$0xff]  }
 0x7ff   : > { %5948 = vmatprep.subr.bf16.mxu0 %v9082_v56  ;;  %v9133_v56 = vld [vmem:[%s10883_s16 + $0x274] ss:$8 sps:$4 sm:$0xff]  }
 0x800   : > { %5661 = vmatpush1.bf16.msra.mxu1 %v9047_v57  ;;  %v9158_v57 = vld [vmem:[%s10883_s16 + $0x320] ss:$8 sps:$4 sm:$0xff]  }
 0x801   : > { %5662 = vmatprep.subr.bf16.mxu1 %v9055_v52  ;;  %v9166_v52 = vld [vmem:[%s10883_s16 + $0x334] ss:$8 sps:$4 sm:$0xff]  }
 0x802   : > { %5949 = vmatpush1.bf16.msra.mxu0 %v9080_v58  ;;  %v9131_v58 = vld [vmem:[%s10883_s16 + $0x270] ss:$8 sps:$4 sm:$0xff]  }
 0x803   : > { %5950 = vmatprep.subr.bf16.mxu0 %v9088_v59  ;;  %v9139_v59 = vld [vmem:[%s10883_s16 + $0x2c4] ss:$8 sps:$4 sm:$0xff]  }
 0x804   : > { %5663 = vmatpush1.bf16.msra.mxu1 %v9053_v60  ;;  %v9164_v60 = vld [vmem:[%s10883_s16 + $0x330] ss:$8 sps:$4 sm:$0xff]  }
 0x805   : > { %5664 = vmatprep.subr.bf16.mxu1 %v9061_v61  ;;  %v9172_v61 = vld [vmem:[%s10883_s16 + $0x384] ss:$8 sps:$4 sm:$0xff]  }
 0x806   : > { %5951 = vmatpush1.bf16.msra.mxu0 %v9086_v62  ;;  %v9137_v62 = vld [vmem:[%s10883_s16 + $0x2c0] ss:$8 sps:$4 sm:$0xff]  }
 0x807   : > { %5952 = vmatprep.subr.bf16.mxu0 %v9094_v63  ;;  %v10751_v63 = vshrl.u32 %v10648_v30, 16 }
 0x808   : > { %5665 = vmatpush1.bf16.msra.mxu1 %v9059_v0  ;;  %v9145_v0 = vld [vmem:[%s10883_s16 + $0x2d4] ss:$8 sps:$4 sm:$0xff]  }
 0x809   : > { %5850 = vmatprep.subr.bf16.mxu1 %v9067_v3  ;;  %v9170_v3 = vld [vmem:[%s10883_s16 + $0x380] ss:$8 sps:$4 sm:$0xff]  }
 0x80a   : > { %5953 = vmatpush1.bf16.msra.mxu0 %v9092_v4  ;;  %v6480_v4 = vrot.slane %v10648_v30, 2 }
 0x80b   : > { %7699 = vmatmul.mubr.msk.bf16.vlgmr.msra.gmra.mrb[124].mxu1 %vm2595_vm8, %v5614_v8  ;;  %6138 = vmatprep.subr.bf16.mxu0 %v9100_v6  ;;  %v9178_v6 = vld [vmem:[%s10883_s16 + $0x394] ss:$8 sps:$4 sm:$0xff]   ;;  %v9151_v8 = vld [vmem:[%s10883_s16 + $0x2e4] ss:$8 sps:$4 sm:$0xff]  }
 0x80c   : > { %5851 = vmatpush1.bf16.msra.mxu1 %v9065_v7  ;;  %5882 = vmatprep.mubr.bf16.mxu1 %v9208_v12  ;;  %v9143_v7 = vld [vmem:[%s10883_s16 + $0x2d0] ss:$8 sps:$4 sm:$0xff]  }
 0x80d   : > { %5852 = vmatprep.subr.bf16.mxu1 %v9073_v9  ;;  %7750 = vmatmul.mubr.msk.bf16.vlgmr.msra.gmra.mrb[68].mxu0 %vm2595_vm8, %v5902_v17  ;;  %v9176_v9 = vld [vmem:[%s10883_s16 + $0x390] ss:$8 sps:$4 sm:$0xff]   ;;  %v9149_v17 = vld [vmem:[%s10883_s16 + $0x2e0] ss:$8 sps:$4 sm:$0xff]  }
 0x80e   : > { %6139 = vmatpush1.bf16.msra.mxu0 %v9098_v15  ;;  %6170 = vmatprep.mubr.bf16.mxu0 %v9208_v12  ;;  %v9184_v15 = vld [vmem:[%s10883_s16 + $0x3a4] ss:$8 sps:$4 sm:$0xff]  }
 0x80f   : > { %6140 = vmatprep.subr.bf16.mxu0 %v9106_v18  ;;  %v9157_v18 = vld [vmem:[%s10883_s16 + $0x2f4] ss:$8 sps:$4 sm:$0xff]  }
 0x810   : > { %5853 = vmatpush1.bf16.msra.mxu1 %v9071_v19  ;;  %v9182_v19 = vld [vmem:[%s10883_s16 + $0x3a0] ss:$8 sps:$4 sm:$0xff]  }
 0x811   : > { %5854 = vmatprep.subr.bf16.mxu1 %v9079_v10  ;;  %v9190_v10 = vld [vmem:[%s10883_s16 + $0x3b4] ss:$8 sps:$4 sm:$0xff]  }
 0x812   : > { %6141 = vmatpush1.bf16.msra.mxu0 %v9104_v11  ;;  %v9155_v11 = vld [vmem:[%s10883_s16 + $0x2f0] ss:$8 sps:$4 sm:$0xff]  }
 0x813   : > { %6142 = vmatprep.subr.bf16.mxu0 %v9112_v13  ;;  %v9163_v13 = vld [vmem:[%s10883_s16 + $0x344] ss:$8 sps:$4 sm:$0xff]  }
 0x814   : > { %5855 = vmatpush1.bf16.msra.mxu1 %v9077_v14  ;;  %v9188_v14 = vld [vmem:[%s10883_s16 + $0x3b0] ss:$8 sps:$4 sm:$0xff]  }
 0x815   : > { %5856 = vmatprep.subr.bf16.mxu1 %v9085_v16  ;;  %v9161_v16 = vld [vmem:[%s10883_s16 + $0x340] ss:$8 sps:$4 sm:$0xff]  }
 0x816   : > { %6143 = vmatpush1.bf16.msra.mxu0 %v9110_v21  ;;  %v6384_v21 = vrot.slane %v10751_v63, 1 }
 0x817   : > { %6144 = vmatprep.subr.bf16.mxu0 %v9118_v22  ;;  %v9169_v22 = vld [vmem:[%s10883_s16 + $0x354] ss:$8 sps:$4 sm:$0xff]  }
 0x818   : > { %5857 = vmatpush1.bf16.msra.mxu1 %v9083_v23  ;;  %v6672_v23 = vrot.slane %v10648_v30, 3 }
 0x819   : > { %6042 = vmatprep.subr.bf16.mxu1 %v9091_v24  ;;  %v9167_v24 = vld [vmem:[%s10883_s16 + $0x350] ss:$8 sps:$4 sm:$0xff]  }
 0x81a   : > { %6145 = vmatpush1.bf16.msra.mxu0 %v9116_v25  ;;  %v9175_v25 = vld [vmem:[%s10883_s16 + $0x364] ss:$8 sps:$4 sm:$0xff]  }
 0x81b   : > { %7733 = vmatmul.mubr.msk.bf16.vlgmr.msra.gmra.mrb[128].mxu1 %vm2595_vm8, %v5806_v27  ;;  %6332 = vmatprep.subr.bf16.mxu0 %v9124_v26  ;;  %v9173_v26 = vld [vmem:[%s10883_s16 + $0x360] ss:$8 sps:$4 sm:$0xff]   ;;  %v9179_v27 = vld [vmem:[%s10883_s16 + $0x370] ss:$8 sps:$4 sm:$0xff]  }
 0x81c   : > { %6043 = vmatpush1.bf16.msra.mxu1 %v9089_v53  ;;  %6074 = vmatprep.mubr.bf16.mxu1 %v9208_v12  ;;  %v9181_v53 = vld [vmem:[%s10883_s16 + $0x374] ss:$8 sps:$4 sm:$0xff]  }
 0x81d   : > { %6044 = vmatprep.subr.bf16.mxu1 %v9097_v28  ;;  %7784 = vmatmul.mubr.msk.bf16.vlgmr.msra.gmra.mrb[72].mxu0 %vm2595_vm8, %v10648_v30  ;;  %v9187_v28 = vld [vmem:[%s10883_s16 + $0x3c4] ss:$8 sps:$4 sm:$0xff]   ;;  %v6576_v30 = vrot.slane %v10751_v63, 2 }
 0x81e   : > { %6333 = vmatpush1.bf16.msra.mxu0 %v9122_v29  ;;  %6364 = vmatprep.mubr.bf16.mxu0 %v9208_v12  ;;  %v9185_v29 = vld [vmem:[%s10883_s16 + $0x3c0] ss:$8 sps:$4 sm:$0xff]  }
 0x81f   : > { %6334 = vmatprep.subr.bf16.mxu0 %v9130_v31  ;;  %v9193_v31 = vld [vmem:[%s10883_s16 + $0x3d4] ss:$8 sps:$4 sm:$0xff]  }
 0x820   : > { %6045 = vmatpush1.bf16.msra.mxu1 %v9095_v32  ;;  %v9191_v32 = vld [vmem:[%s10883_s16 + $0x3d0] ss:$8 sps:$4 sm:$0xff]  }
 0x821   : > { %6046 = vmatprep.subr.bf16.mxu1 %v9103_v35  ;;  %v9196_v35 = vld [vmem:[%s10883_s16 + $0x3e4] ss:$8 sps:$4 sm:$0xff]  }
 0x822   : > { %6335 = vmatpush1.bf16.msra.mxu0 %v9128_v33  ;;  %v9194_v33 = vld [vmem:[%s10883_s16 + $0x3e0] ss:$8 sps:$4 sm:$0xff]  }
 0x823   : > { %6336 = vmatprep.subr.bf16.mxu0 %v9136_v36  ;;  %v9199_v36 = vld [vmem:[%s10883_s16 + $0x3f4] ss:$8 sps:$4 sm:$0xff]  }
 0x824   : > { %6047 = vmatpush1.bf16.msra.mxu1 %v9101_v37  ;;  %v6768_v37 = vrot.slane %v10751_v63, 3 }
 0x825   : > { %6048 = vmatprep.subr.bf16.mxu1 %v9109_v38 }
 0x826   : > { %6337 = vmatpush1.bf16.msra.mxu0 %v9134_v39 }
 0x827   : > { %6338 = vmatprep.subr.bf16.mxu0 %v9142_v40 }
 0x828   : > { %6049 = vmatpush1.bf16.msra.mxu1 %v9107_v41 }
 0x829   : > { %6235 = vmatprep.subr.bf16.mxu1 %v9115_v42 }
 0x82a   : > { %6339 = vmatpush1.bf16.msra.mxu0 %v9140_v43 }
 0x82b   : > { %7767 = vmatmul.mubr.msk.bf16.vlgmr.msra.gmra.mrb[132].mxu1 %vm2595_vm8, %v5998_v45  ;;  %6524 = vmatprep.subr.bf16.mxu0 %v9148_v44 }
 0x82c   : > { %6236 = vmatpush1.bf16.msra.mxu1 %v9113_v20  ;;  %6267 = vmatprep.mubr.bf16.mxu1 %v9208_v12 }
 0x82d   : > { %6237 = vmatprep.subr.bf16.mxu1 %v9121_v46  ;;  %7818 = vmatmul.mubr.msk.bf16.vlgmr.msra.gmra.mrb[76].mxu0 %vm2595_vm8, %v6288_v48 }
 0x82e   : > { %6525 = vmatpush1.bf16.msra.mxu0 %v9146_v47  ;;  %6556 = vmatprep.mubr.bf16.mxu0 %v9208_v12 }
 0x82f   : > { %6526 = vmatprep.subr.bf16.mxu0 %v9154_v49 }
 0x830   : > { %6238 = vmatpush1.bf16.msra.mxu1 %v9119_v34 }
 0x831   : > { %6239 = vmatprep.subr.bf16.mxu1 %v9127_v50 }
 0x832   : > { %6527 = vmatpush1.bf16.msra.mxu0 %v9152_v51 }
 0x833   : > { %6528 = vmatprep.subr.bf16.mxu0 %v9160_v54 }
 0x834   : > { %6240 = vmatpush1.bf16.msra.mxu1 %v9125_v55 }
 0x835   : > { %6241 = vmatprep.subr.bf16.mxu1 %v9133_v56 }
 0x836   : > { %6529 = vmatpush1.bf16.msra.mxu0 %v9158_v57 }
 0x837   : > { %6530 = vmatprep.subr.bf16.mxu0 %v9166_v52 }
 0x838   : > { %6242 = vmatpush1.bf16.msra.mxu1 %v9131_v58 }
 0x839   : > { %6428 = vmatprep.subr.bf16.mxu1 %v9139_v59 }
 0x83a   : > { %6531 = vmatpush1.bf16.msra.mxu0 %v9164_v60 }
 0x83b   : > { %7801 = vmatmul.mubr.msk.bf16.vlgmr.msra.gmra.mrb[136].mxu1 %vm2595_vm8, %v10751_v63  ;;  %6716 = vmatprep.subr.bf16.mxu0 %v9172_v61 }
 0x83c   : > { %6429 = vmatpush1.bf16.msra.mxu1 %v9137_v62  ;;  %6460 = vmatprep.mubr.bf16.mxu1 %v9208_v12 }
 0x83d   : > { %6430 = vmatprep.subr.bf16.mxu1 %v9145_v0  ;;  %7852 = vmatmul.mubr.msk.bf16.vlgmr.msra.gmra.mrb[80].mxu0 %vm2595_vm8, %v6480_v4 }
 0x83e   : > { %6717 = vmatpush1.bf16.msra.mxu0 %v9170_v3  ;;  %6748 = vmatprep.mubr.bf16.mxu0 %v9208_v12 }
 0x83f   : > { %6718 = vmatprep.subr.bf16.mxu0 %v9178_v6 }
 0x840   : > { %6431 = vmatpush1.bf16.msra.mxu1 %v9143_v7 }
 0x841   : > { %6432 = vmatprep.subr.bf16.mxu1 %v9151_v8 }
 0x842   : > { %6719 = vmatpush1.bf16.msra.mxu0 %v9176_v9 }
 0x843   : > { %6720 = vmatprep.subr.bf16.mxu0 %v9184_v15 }
 0x844   : > { %6433 = vmatpush1.bf16.msra.mxu1 %v9149_v17 }
 0x845   : > { %6434 = vmatprep.subr.bf16.mxu1 %v9157_v18 }
 0x846   : > { %6721 = vmatpush1.bf16.msra.mxu0 %v9182_v19 }
 0x847   : > { %6722 = vmatprep.subr.bf16.mxu0 %v9190_v10 }
 0x848   : > { %6435 = vmatpush1.bf16.msra.mxu1 %v9155_v11 }
 0x849   : > { %6620 = vmatprep.subr.bf16.mxu1 %v9163_v13 }
 0x84a   : > { %6723 = vmatpush1.bf16.msra.mxu0 %v9188_v14 }
 0x84b   : > { %7835 = vmatmul.mubr.msk.bf16.vlgmr.msra.gmra.mrb[140].mxu1 %vm2595_vm8, %v6384_v21 }
 0x84c   : > { %6621 = vmatpush1.bf16.msra.mxu1 %v9161_v16  ;;  %6652 = vmatprep.mubr.bf16.mxu1 %v9208_v12 }
 0x84d   : > { %6622 = vmatprep.subr.bf16.mxu1 %v9169_v22  ;;  %7886 = vmatmul.mubr.msk.bf16.vlgmr.msra.gmra.mrb[84].mxu0 %vm2595_vm8, %v6672_v23 }
 0x850   : > { %6623 = vmatpush1.bf16.msra.mxu1 %v9167_v24 }
 0x851   : > { %6624 = vmatprep.subr.bf16.mxu1 %v9175_v25 }
 0x854   : > { %6625 = vmatpush1.bf16.msra.mxu1 %v9173_v26 }
 0x855   : > { %6626 = vmatprep.subr.bf16.mxu1 %v9181_v53 }
 0x858   : > { %6627 = vmatpush1.bf16.msra.mxu1 %v9179_v27 }
 0x859   : > { %6812 = vmatprep.subr.bf16.mxu1 %v9187_v28 }
 0x85b   : > { %7869 = vmatmul.mubr.msk.bf16.vlgmr.msra.gmra.mrb[144].mxu1 %vm2595_vm8, %v6576_v30 }
 0x85c   : > { %6813 = vmatpush1.bf16.msra.mxu1 %v9185_v29  ;;  %6844 = vmatprep.mubr.bf16.mxu1 %v9208_v12  ;;  %v9197_v12 = vld [vmem:[%s10883_s16 + $0x3f0] ss:$8 sps:$4 sm:$0xff]  }
 0x85d   : > { %6814 = vmatprep.subr.bf16.mxu1 %v9193_v31 }
 0x860   : > { %6815 = vmatpush1.bf16.msra.mxu1 %v9191_v32 }
 0x861   : > { %6816 = vmatprep.subr.bf16.mxu1 %v9196_v35 }
 0x864   : > { %6817 = vmatpush1.bf16.msra.mxu1 %v9194_v33 }
 0x865   : > { %6818 = vmatprep.subr.bf16.mxu1 %v9199_v36 }
 0x868   : > { %6819 = vmatpush1.bf16.msra.mxu1 %v9197_v12 }
 0x86b   : > { %7903 = vmatmul.mubr.msk.bf16.vlgmr.msra.gmra.mrb[148].mxu1 %vm2595_vm8, %v6768_v37 }
 0x8be   : > { %v5418_v38 = vpop.f32.mrb[116].mxu1  ;;  %v5596_v39 = vpop.f32.mrb[60].mxu0 }
 0x8bf   : > { %v5420_v40 = vpop.f32.mrb[117].mxu1  ;;  %v5598_v41 = vpop.f32.mrb[61].mxu0 }
 0x8c0   : > { %v5422_v42 = vpop.f32.mrb[118].mxu1  ;;  %v5600_v43 = vpop.f32.mrb[62].mxu0 }
 0x8c1   : > { %v5423_v44 = vpop.f32.mrb[119].mxu1  ;;  %v5601_v20 = vpop.f32.mrb[63].mxu0 }
 0x8ce   : > { %v5501_v45 = vpop.f32.mrb[120].mxu1 }
 0x8cf   : > { %v5502_v46 = vadd.f32 %v5501_v45, %v5418_v38  ;;  %v5503_v47 = vpop.f32.mrb[121].mxu1 }
 0x8d0   : > { %v5504_v48 = vadd.f32 %v5503_v47, %v5420_v40  ;;  %v5505_v49 = vpop.f32.mrb[122].mxu1  ;;  %v5788_v34 = vpop.f32.mrb[64].mxu0 }
 0x8d1   : > { %v5603_v50 = vadd.f32 %v5596_v39, %v5502_v46  ;;  %v5506_v51 = vpop.f32.mrb[123].mxu1  ;;  %v5790_v54 = vpop.f32.mrb[65].mxu0 }
 0x8d2   : > { %v5604_v55 = vadd.f32 %v5598_v41, %v5504_v48  ;;  %v5792_v56 = vpop.f32.mrb[66].mxu0 }
 0x8d3   : > { %v5793_v57 = vpop.f32.mrb[67].mxu0 }
 0x8de   : > { %v5692_v52 = vpop.f32.mrb[124].mxu1 }
 0x8df   : > { %v5699_v58 = vadd.f32 %v5692_v52, %v5603_v50  ;;  %v5694_v59 = vpop.f32.mrb[125].mxu1 }
 0x8e0   : > { %v5700_v60 = vadd.f32 %v5694_v59, %v5604_v55  ;;  %v5696_v61 = vpop.f32.mrb[126].mxu1  ;;  %v5980_v62 = vpop.f32.mrb[68].mxu0 }
 0x8e1   : > { %v5795_v63 = vadd.f32 %v5788_v34, %v5699_v58  ;;  %v5697_v0 = vpop.f32.mrb[127].mxu1  ;;  %v5982_v3 = vpop.f32.mrb[69].mxu0 }
 0x8e2   : > { %v5796_v4 = vadd.f32 %v5790_v54, %v5700_v60  ;;  %v5984_v6 = vpop.f32.mrb[70].mxu0  ;;  %v9212_v0 = vmov 1966171168  }
 0x8e3   : > { %v5985_v7 = vpop.f32.mrb[71].mxu0 }
 0x8ee   : > { %v5884_v8 = vpop.f32.mrb[128].mxu1 }
 0x8ef   : > { %v5891_v9 = vadd.f32 %v5884_v8, %v5795_v63  ;;  %v5886_v15 = vpop.f32.mrb[129].mxu1 }
 0x8f0   : > { %v5892_v17 = vadd.f32 %v5886_v15, %v5796_v4  ;;  %v5888_v18 = vpop.f32.mrb[130].mxu1  ;;  %v6172_v19 = vpop.f32.mrb[72].mxu0 }
 0x8f1   : > { %v5987_v10 = vadd.f32 %v5980_v62, %v5891_v9  ;;  %v5889_v11 = vpop.f32.mrb[131].mxu1  ;;  %v6174_v13 = vpop.f32.mrb[73].mxu0 }
 0x8f2   : > { %v5988_v14 = vadd.f32 %v5982_v3, %v5892_v17  ;;  %v6176_v16 = vpop.f32.mrb[74].mxu0  ;;  %v6870_v3 = vunpack.c.l.s4 %v9212_v0  ;;  %v6858_v4 = vpop.permute.xlu0 %6857 }
 0x8f3   : > { %v6177_v21 = vpop.f32.mrb[75].mxu0  ;;  %v6863_v8 = vrot.slane %v6858_v4, %v9335_v5 }
 0x8f4   : > { %v6871_v7 = vunpack.c.0.s8 %v6870_v3 }
 0x8fe   : > { %v6076_v22 = vpop.f32.mrb[132].mxu1 }
 0x8ff   : > { %v6083_v23 = vadd.f32 %v6076_v22, %v5987_v10  ;;  %v6078_v24 = vpop.f32.mrb[133].mxu1 }
 0x900   : > { %v6084_v25 = vadd.f32 %v6078_v24, %v5988_v14  ;;  %v6080_v26 = vpop.f32.mrb[134].mxu1  ;;  %v6366_v53 = vpop.f32.mrb[76].mxu0 }
 0x901   : > { %v6179_v27 = vadd.f32 %v6172_v19, %v6083_v23  ;;  %v6081_v28 = vpop.f32.mrb[135].mxu1  ;;  %v6368_v29 = vpop.f32.mrb[77].mxu0 }
 0x902   : > { %v6180_v30 = vadd.f32 %v6174_v13, %v6084_v25  ;;  %v6370_v31 = vpop.f32.mrb[78].mxu0  ;;  %v6874_v13 = vsub.s32 %v6871_v7, %v9322_v2 }
 0x903   : > { %v6371_v32 = vpop.f32.mrb[79].mxu0 }
 0x90e   : > { %v6269_v35 = vpop.f32.mrb[136].mxu1 }
 0x90f   : > { %v6276_v33 = vadd.f32 %v6269_v35, %v6179_v27  ;;  %v6271_v36 = vpop.f32.mrb[137].mxu1 }
 0x910   : > { %v6277_v12 = vadd.f32 %v6271_v36, %v6180_v30  ;;  %v6273_v37 = vpop.f32.mrb[138].mxu1  ;;  %v6558_v38 = vpop.f32.mrb[80].mxu0 }
 0x911   : > { %v6373_v39 = vadd.f32 %v6366_v53, %v6276_v33  ;;  %v6274_v40 = vpop.f32.mrb[139].mxu1  ;;  %v6560_v41 = vpop.f32.mrb[81].mxu0 }
 0x912   : > { %v6374_v42 = vadd.f32 %v6368_v29, %v6277_v12  ;;  %v6562_v43 = vpop.f32.mrb[82].mxu0 }
 0x913   : > { %v6563_v44 = vpop.f32.mrb[83].mxu0 }
 0x91e   : > { %v6462_v20 = vpop.f32.mrb[140].mxu1 }
 0x91f   : > { %v6469_v45 = vadd.f32 %v6462_v20, %v6373_v39  ;;  %v6464_v46 = vpop.f32.mrb[141].mxu1 }
 0x920   : > { %v6470_v47 = vadd.f32 %v6464_v46, %v6374_v42  ;;  %v6466_v48 = vpop.f32.mrb[142].mxu1  ;;  %v6750_v49 = vpop.f32.mrb[84].mxu0 }
 0x921   : > { %v6565_v34 = vadd.f32 %v6558_v38, %v6469_v45  ;;  %v6467_v50 = vpop.f32.mrb[143].mxu1  ;;  %v6752_v51 = vpop.f32.mrb[85].mxu0 }
 0x922   : > { %v6566_v54 = vadd.f32 %v6560_v41, %v6470_v47  ;;  %v6754_v55 = vpop.f32.mrb[86].mxu0 }
 0x923   : > { %v6755_v56 = vpop.f32.mrb[87].mxu0 }
 0x92e   : > { %v6654_v57 = vpop.f32.mrb[144].mxu1 }
 0x92f   : > { %v6661_v52 = vadd.f32 %v6654_v57, %v6565_v34  ;;  %v6656_v58 = vpop.f32.mrb[145].mxu1 }
 0x930   : > { %v6662_v59 = vadd.f32 %v6656_v58, %v6566_v54  ;;  %v6658_v60 = vpop.f32.mrb[146].mxu1 }
 0x931   : > { %v6757_v61 = vadd.f32 %v6750_v49, %v6661_v52  ;;  %v6659_v62 = vpop.f32.mrb[147].mxu1 }
 0x932   : > { %v6758_v63 = vadd.f32 %v6752_v51, %v6662_v59 }
 0x93e   : > { %v6846_v6 = vpop.f32.mrb[148].mxu1 }
 0x93f   : > { %v6853_v9 = vadd.f32 %v6846_v6, %v6757_v61  ;;  %v6848_v15 = vpop.f32.mrb[149].mxu1 }
 0x940   : > { %v6854_v17 = vadd.f32 %v6848_v15, %v6758_v63  ;;  %v6850_v18 = vpop.f32.mrb[150].mxu1 }
 0x941   : > { %v6864_v19 = vadd.f32 %v6863_v8, %v6853_v9  ;;  %v6851_v10 = vpop.f32.mrb[151].mxu1 }
 0x942   : > { %v6865_v11 = vadd.f32 %v6863_v8, %v6854_v17 }
 0x944   : > { %v6868_v14 = vcombine.low %v6864_v19, %v6865_v11 }
 0x946   : > { %v6875_v16 = vrot.slane %v6868_v14, %v6874_v13 }
 0x948   : > { %v6882_v21 = vrot.slane %v6875_v16, %v6874_v13 }
 0x94a   : > { %6888 = vst.msk [vmem:[%s586_s21] sm:$0x3] %vm6886_vm12, %v6882_v21 }
 0x94b PF: > { %s30_s29 = sadd.s32 1, %s9206_s29  }
 0x94c   : > { %p27_p4 = scmp.ge.s32.totalorder %s30_s29, 4  }
 0x94e   :  { %29 = sbr.rel (!%p27_p4) target bundleno = 4 (0x4), region = 171 }

</bundles_post_ra>
